<compile_context>
chip_gen: v7x
topology: tpu7x:2x2x1
jax: 0.10.0
libtpu: 0.0.40
codegen_flags: <defaults>
</compile_context>

<pallas_src>
import jax
import jax.numpy as jnp
from jax.experimental import pallas as pl
from jax.experimental.pallas import tpu as pltpu


# Preferred tile edge for the trailing (M, N) plane: multiple of 128 so both
# the input's lane dim and (after the swap) the output's lane dim stay dense.
_PREF_TILE = 512
# Below this total size, launching a Pallas kernel cannot beat XLA's native
# transpose (fixed launch + single-grid-step overhead dominates).
_MIN_PALLAS_BYTES = 1 << 20  # 1 MiB


def _vmem_budgets():
    """Return (vmem_limit_bytes, per-block byte target) for this TPU generation."""
    cap = None
    try:
        info = pltpu.get_tpu_info()
        cap = getattr(info, "vmem_capacity_bytes", None)
    except Exception:
        cap = None
    if cap is None:
        cap = 64 * 1024 * 1024  # conservative (v7x-sized) default
    if cap >= 100 * 1024 * 1024:
        # v5e / v6e: 128 MiB physical VMEM -> bigger blocks, bigger limit.
        return 64 * 1024 * 1024, 4 * 1024 * 1024
    # v7x: 64 MiB per TensorCore -> keep blocks ~2 MiB, limit well under cap
    # (in + out, double-buffered, is ~4x the block bytes).
    return 40 * 1024 * 1024, 2 * 1024 * 1024


def _xpose_last2(x):
    """Transpose the last two axes of a rank-3 VMEM tile."""
    # einshape is lane-layout aware and lowers to a cleaner XLU vxpose
    # sequence (especially for sublane-packed bf16 tiles). Fall back to a
    # generic swap if it is unavailable in this JAX version.
    if hasattr(pltpu, "einshape"):
        try:
            y = pltpu.einshape("bmn->bnm", x)
            if y.shape == (x.shape[0], x.shape[2], x.shape[1]):
                return y
        except Exception:
            pass
    return jnp.swapaxes(x, -1, -2)


def _transpose_last2_kernel(x_ref, o_ref):
    # x_ref block: (LB, TM, TN)  ->  o_ref block: (LB, TN, TM)
    o_ref[...] = _xpose_last2(x_ref[...])


def _pick_tile(dim):
    # Either the full dim (always legal for the last-two block dims) or a
    # 128-multiple tile (legal for both the input's last dim and the output's
    # last dim after the swap).
    return dim if dim <= _PREF_TILE else _PREF_TILE


def pallas_transpose(x, dims):
    """Equivalent of torch.Tensor.transpose(*dims)."""
    assert len(dims) == 2, "dims == 2"
    nd = x.ndim
    d0, d1 = sorted(d % nd for d in dims)
    if d0 == d1:
        return x  # transpose with itself is the identity

    if (d0, d1) != (nd - 2, nd - 1):
        # TODO(synk): non-trailing axis pairs (not used by FCPE) are delegated
        # to XLA's native transpose; a Pallas path would need different
        # BlockSpecs / index_maps.
        return jnp.swapaxes(x, d0, d1)

    lead = x.shape[:-2]
    M, N = x.shape[-2], x.shape[-1]
    itemsize = jnp.dtype(x.dtype).itemsize
    total_bytes = x.size * itemsize

    # Small tensors (the real FCPE hot path) and narrow output lanes (M < 128
    # would force masked, ~8x-cost lane stores) go to XLA's native transpose,
    # which often folds into the consumer's layout for free.
    if total_bytes < _MIN_PALLAS_BYTES or M < 128:
        return jnp.swapaxes(x, -1, -2)

    # Collapse all leading axes into a single axis (free, contiguous reshape).
    L = 1
    for s in lead:
        L *= s
    x3 = x.reshape((L, M, N))

    vmem_limit, block_bytes_target = _vmem_budgets()

    # Trailing-plane tiles: full dim if small, else a 128-multiple tile.
    TM = _pick_tile(M)
    TN = _pick_tile(N)

    # Batch leading slices per grid step (amortizes the ~0.35 us/step
    # overhead).  cdiv batching: the ragged final leading block is handled by
    # Pallas input padding / masked output writes, so any L works.
    tile_bytes = TM * TN * itemsize
    LB = max(1, min(L, block_bytes_target // tile_bytes))

    # If the whole (M, N) plane is a single tile, make sure the grid still has
    # >= 2 programs so v7x's second TensorCore is not idle (pure streaming,
    # splitting the leading axis is free).
    plane_tiles = pl.cdiv(M, TM) * pl.cdiv(N, TN)
    if plane_tiles == 1 and L > 1:
        LB = min(LB, (L + 1) // 2)

    grid = (pl.cdiv(L, LB), pl.cdiv(M, TM), pl.cdiv(N, TN))

    # TODO(synk): measured experiment — making the M-tile axis innermost
    # (contiguous output writeback streams) may help slightly on v5e.
    out3 = pl.pallas_call(
        _transpose_last2_kernel,
        out_shape=jax.ShapeDtypeStruct((L, N, M), x.dtype),
        grid_spec=pltpu.PrefetchScalarGridSpec(
            num_scalar_prefetch=0,
            grid=grid,
            in_specs=[
                pl.BlockSpec((LB, TM, TN), lambda l, i, j: (l, i, j)),
            ],
            out_specs=pl.BlockSpec((LB, TN, TM), lambda l, i, j: (l, j, i)),
        ),
        compiler_params=pltpu.CompilerParams(
            # Pure data movement with disjoint output blocks: every grid axis
            # is independent, so v7x's two TensorCores can split the loop.
            dimension_semantics=("parallel", "parallel", "parallel"),
            vmem_limit_bytes=vmem_limit,
        ),
        cost_estimate=pl.CostEstimate(
            flops=0, transcendentals=0, bytes_accessed=2 * total_bytes
        ),
    )(x3)

    return out3.reshape(lead + (N, M))


class Transpose:
    """JAX/Pallas mirror of the PyTorch FCPE Transpose module."""

    def __init__(self, dims):
        assert len(dims) == 2, "dims == 2"
        self.dims = dims

    def __call__(self, x):
        return pallas_transpose(x, self.dims)


if __name__ == "__main__":
    def check(x, dims, name):
        y = jax.block_until_ready(Transpose(dims)(x))
        ref = jnp.swapaxes(x, dims[0], dims[1])
        assert y.shape == ref.shape, (name, y.shape, ref.shape)
        assert y.dtype == ref.dtype, (name, y.dtype, ref.dtype)
        assert jnp.array_equal(y, ref), f"mismatch vs reference transpose: {name}"

    # Pallas path (primary input): ragged N edge tile (TN=512 vs N=640).
    x = jax.random.normal(jax.random.PRNGKey(0), (3, 272, 640), jnp.float32)
    check(x, (1, 2), "pallas-ragged-N")

    # FCPE-style tiny (batch, channels, time): handled by the XLA bypass
    # (C=16 < 128 output lanes and only a few KiB).
    check(jax.random.normal(jax.random.PRNGKey(1), (2, 16, 32), jnp.float32),
          (1, 2), "fcpe-small-bypass")

    # Pallas path: single-tile plane, leading axis split across >= 2 programs.
    check(jax.random.normal(jax.random.PRNGKey(2), (6, 256, 256), jnp.float32),
          (-1, -2), "single-tile-plane")

    # Pallas path: ragged leading block from cdiv batching of L.
    check(jax.random.normal(jax.random.PRNGKey(3), (21, 256, 512), jnp.float32),
          (1, 2), "ragged-L")

    # Pallas path: 4-D input with negative dims (leading axes collapsed).
    check(jax.random.normal(jax.random.PRNGKey(4), (2, 4, 272, 320), jnp.float32),
          (-1, -2), "4d-negative-dims")

    # Pallas path: bfloat16 (sublane-packed tiles).
    xb = jax.random.normal(jax.random.PRNGKey(5), (2, 384, 768),
                           jnp.float32).astype(jnp.bfloat16)
    check(xb, (1, 2), "bf16")

    print("KERNEL_OK")
</pallas_src>

<mosaic_0001>
module attributes {stable_mosaic.version = 11 : i64} {
  func.func @_transpose_last2_kernel(%arg0: i32, %arg1: i32, %arg2: i32, %arg3: memref<3x272x512xf32, #tpu.memory_space<vmem>>, %arg4: memref<3x512x272xf32, #tpu.memory_space<vmem>>) attributes {dimension_semantics = [#tpu.dimension_semantics<parallel>, #tpu.dimension_semantics<parallel>, #tpu.dimension_semantics<parallel>], iteration_bounds = array<i64: 1, 1, 2>, scalar_prefetch = 0 : i64, scratch_operands = 0 : i64, tpu.core_type = #tpu.core_type<tc>, window_params = [{transform_indices = @transform_0, window_bounds = array<i64: 3, 272, 512>}, {transform_indices = @transform_1, window_bounds = array<i64: 3, 512, 272>}]} {
    %c0 = arith.constant 0 : index
    %c0_0 = arith.constant 0 : index
    %c0_1 = arith.constant 0 : index
    %0 = vector.load %arg3[%c0, %c0_0, %c0_1] : memref<3x272x512xf32, #tpu.memory_space<vmem>>, vector<3x272x512xf32>
    %1 = tpu.transpose %0, [0, 2, 1] : vector<3x272x512xf32> -> vector<3x512x272xf32>
    %c0_2 = arith.constant 0 : index
    %c0_3 = arith.constant 0 : index
    %c0_4 = arith.constant 0 : index
    %2 = vector.load %arg4[%c0_2, %c0_3, %c0_4] : memref<3x512x272xf32, #tpu.memory_space<vmem>>, vector<3x512x272xf32>
    tpu.vector_store %arg4[%c0_2, %c0_3, %c0_4], %1 {strides = array<i32>} : memref<3x512x272xf32, #tpu.memory_space<vmem>>, vector<3x512x272xf32>,
    return
  }
  func.func @transform_0(%arg0: i32, %arg1: i32, %arg2: i32) -> (i32, i32, i32) {
    %c0_i32 = arith.constant 0 : i32
    return %arg0, %arg1, %arg2 : i32, i32, i32
  }
  func.func @transform_1(%arg0: i32, %arg1: i32, %arg2: i32) -> (i32, i32, i32) {
    %c0_i32 = arith.constant 0 : i32
    return %arg0, %arg2, %arg1 : i32, i32, i32
  }
}

</mosaic_0001>

<bundles_post_ra>
// kernel: tpu_custom_call.1
= control target key start
LH: loop header
LB: loop body
LE: loop exit
PB: predicated region body
PF: predicated region fallthrough
CT: control target
= control target key end

     0   :  { %6 = vsyncpa [#allocation3], 0  ;;  %s4528_s0 = inlined_call_operand.hbm [shape: f32[3,272,640], index: 0, kind: input, shape index: {}]   ;;  %s4529_s1 = inlined_call_operand.vmem [shape: f32[3,640,272], index: 1, kind: output, shape index: {}]  }
   0x1   :  { %8 = vsyncpa [#allocation3 + $0x1], 0  ;;  %s2976_s6 = smov 0   ;;  %s2978_s7 = smov 0  }
   0x2   :  { %s2980_s8 = smov 0   ;;  %s2982_s9 = smov 0  }
   0x3   :  { %s2984_s10 = smov 0   ;;  %s2986_s11 = smov 0  }
   0x4 LB: > { %s2674_s12 = sadd.s32 4294967295, %s2929_s11   ;;  %s26_s13 = sadd.s32 1, %s2925_s10  ;;  %s2929_s11 = sphi %s2986_s11, %s14_s11   ;;  %s2925_s10 = sphi %s2984_s10, %s4544_s10   ;;  %s2921_s9 = sphi %s2982_s9, %s4543_s9   ;;  %s2917_s8 = sphi %s2980_s8, %s4542_s8   ;;  %s2913_s7 = sphi %s2978_s7, %s4541_s7   ;;  %s2909_s6 = sphi %s2976_s6, %s4540_s6  }
   0x5   : > { %p27_p0 = scmp.ge.s32.totalorder %s26_s13, 2  ;;  %s44_s14 = sadd.s32 1, %s2917_s8 }
   0x6   : > { %p51_p1 = scmp.ne.s32.totalorder %s2917_s8, %s2913_s7  ;;  %p52_p2 = scmp.eq.s32.totalorder %s2929_s11, 0 }
   0x7   : > { %s4546_s13 = smov (%p27_p0, %s26_s13), 0  ;;  %p57_p4 = scmp.ne.s32.totalorder %s2913_s7, %s2909_s6 }
   0x8   : > { %p53_p3 = por %p52_p2, %p51_p1  ;;  %s40_s15 = ssub.s32 %s2925_s10, %s4546_s13 }
   0x9   : > { %p58_p5 = scmp.eq.s32.totalorder %s2674_s12, 0  ;;  %p42_p6 = scmp.eq.s32.totalorder %s40_s15, 0 }
   0xa   : > { %p85_p7 = scmp.eq.s32.totalorder %s2674_s12, 1  ;;  %p2677_p10 = scmp.ge.s32.totalorder %s2929_s11, 2 }
   0xb   : > { %p3015_p8 = por %p58_p5, %p57_p4 }
   0xc   : > { %s3020_s17 = scalar_select %p42_p6, %s2917_s8, %s44_s14  }
   0xd   : > { %p3022_p9 = por %p85_p7, %p51_p1  ;;  %107 = sbr.rel (%p2677_p10) target bundleno = 56 (0x38), region = 16 }
  0x14   : > { %110 = sbr.rel (!%p53_p3) target bundleno = 56 (0x38), region = 20  ;;  %s111_s19 = sand.u32 (%p53_p3), 1, %s2917_s8  }
  0x15   : > { %s2678_s20 = sshll.u32 (%p53_p3), %s2925_s10, 2  ;;  %s2699_s21 = smul.u32 (%p53_p3), 3264, %s111_s19 }
  0x16   : > { %s119_s22 = ssub.s32 (%p53_p3), 5, %s2678_s20  ;;  %s3035_s25 = scalar_lea.sflag (%p53_p3), [#allocation3], %s111_s19 }
  0x17   : > { %p120_p11 = scmp.lt.s32.totalorder (%p53_p3), %s119_s22, 4  ;;  %s115_s26 = scalar_lea.vmem (%p53_p3), [#allocation2], %s2699_s21 }
  0x1b   : > { %s4548_s22 = smov (!%p120_p11, %s119_s22), 4 }
  0x1c   : > { %s3032_s23 = smul.u32 13056, %s4548_s22 }
  0x1e   : > { %s124_s24 = ssub.s32 52224, %s3032_s23 }
  0x1f   : > { %125 = vsyncadd %s3035_s25, %s124_s24  ;;  %p2679_p12 = scmp.ne.s32.totalorder %s3032_s23, 0  ;;  %s2698_s27 = sshll.u32 %s2925_s10, 9 }
  0x20   : > { %s3043_s30 = scalar_lea.hbm %s4528_s0, %s2698_s27  ;;  %s2681_s2 = sshll.u32 %s4548_s22, 3 }
  0x21   : > { %s135_s3 = sshll.u32 %s115_s26, 4  ;;  %s2819_s4 = scalar_lea.hbm %s3043_s30, %s3032_s23  ;;  %s3046_s3 = int_to_ptr.vmem [resolvable:$true] %s135_s3 }
  0x22   : > { %p2820_p13 = scmp.ne.s32.totalorder %s3043_s30, %s2819_s4  ;;  %s2823_s12 = scalar_lea.hbm %s4528_s0, 65280 }
  0x23   : > { %p2824_p2 = scmp.lt.u32.totalorder %s3043_s30, %s4528_s0  ;;  %p2825_p3 = scmp.lt.u32.totalorder %s2823_s12, %s2819_s4 }
  0x24   : > { %p2821_p0 = pnand %p2820_p13, %p2679_p12  ;;  %p2827_p5 = scmp.lt.u32.totalorder %s2819_s4, %s3043_s30 }
  0x25   : > { %p2826_p4 = por %p2825_p3, %p2824_p2 }
  0x26   : > { %p2822_p1 = pneg %p2821_p0 }
  0x27   : > { %p2828_p6 = por %p2827_p5, %p2826_p4 }
  0x29   : > { %p2829_p7 = pnand %p2828_p6, %p2822_p1 }
  0x2b   : > { %2832 = shalt.err (!%p2829_p7)
}
  0x2c   : > { %s2833_s19 = scalar_lea.vmem %s3046_s3, %s3032_s23  ;;  %s2963_s20 = smov [#allocation2]  }
  0x2d   : > { %p2834_p10 = scmp.ne.s32.totalorder %s3046_s3, %s2833_s19  ;;  %s2837_s21 = sshll.u32 %s2963_s20, 4  ;;  %s2838_s21 = int_to_ptr.vmem [resolvable:$false] %s2837_s21 }
  0x2e   : > { %s2839_s24 = scalar_lea.vmem %s2838_s21, 104448  ;;  %p2840_p0 = scmp.lt.s32.totalorder %s3046_s3, %s2838_s21 }
  0x2f   : > { %p2835_p11 = pnand %p2834_p10, %p2679_p12  ;;  %p2841_p2 = scmp.lt.s32.totalorder %s2839_s24, %s2833_s19 }
  0x31   : > { %p2836_p13 = pneg %p2835_p11  ;;  %p2842_p3 = por %p2841_p2, %p2840_p0 }
  0x33   : > { %p2843_p4 = pnand %p2842_p3, %p2836_p13 }
  0x35   : > { %2846 = shalt.err (!%p2843_p4)
}
  0x36   : > { %s2964_s26 = smov 640   ;;  %s2965_s27 = smov 512  }
  0x37   : > { %141 = dma.hbm_to_vmem [thread:$0]  (%p2679_p12), %s3043_s30, %s3032_s23, %s3046_s3, %s3035_s25, %s2964_s26, %s2965_s27, %s2681_s2  }
  0x38 PF: > { %p2684_p1 = scmp.ge.s32.totalorder %s2929_s11, 1  ;;  %p143_p5 = scmp.lt.s32.totalorder %s2929_s11, 3 }
  0x3a   : > { %p144_p6 = pnand %p2684_p1, %p143_p5 }
  0x3b   : > { %s3078_s28 = sand.u32 (!%p144_p6), 1, %s2913_s7  }
  0x3c   : > { %147 = sbr.rel (%p144_p6) target bundleno = 1423 (0x58f), region = 24  ;;  %s150_s4 = scalar_lea.sflag (!%p144_p6), [#allocation3], %s3078_s28 }
  0x3d   : > { %s2700_s29 = smul.u32 (!%p144_p6), 3264, %s3078_s28 }
  0x3f   : > { %s3082_s5 = scalar_lea.vmem (!%p144_p6), [#allocation2], %s2700_s29 }
  0x43   : > { %2904 = dma.done.wait (%p3015_p8), %s150_s4, 52224  }
  0x44   : > { %2906 = vsyncadd (%p3015_p8), %s150_s4, 4294915072  ;;  %v187_v0 = vld [vmem:[%s3082_s5 + $0x8] sm:$0xff]  ;;  %v186_v1 = vld [vmem:[%s3082_s5] sm:$0xff]  ;;  %s2701_s16 = smul.u32 4608, %s3078_s28  ;;  %vm1748_vm0 = vcmask 130048   ;;  %s2685_s23 = sshll.u32 (%p3022_p9), %s2921_s9, 6 }
  0x45   : > { %626 = vxpose.xlu1.b32.start [1/16] %v187_v0, 128  ;;  %594 = vxpose.xlu0.b32.start [1/16] %v186_v1, 128  ;;  %v191_v2 = vld [vmem:[%s3082_s5 + $0x28] sm:$0xff]  ;;  %v190_v3 = vld [vmem:[%s3082_s5 + $0x20] sm:$0xff]  ;;  %v189_v32 = vld [vmem:[%s3082_s5 + $0x18] sm:$0xff]  ;;  %s2702_s25 = smul.u32 (%p3022_p9), 1536, %s2921_s9  ;;  %s2333_s30 = ssub.s32 (%p3022_p9), 80, %s2685_s23 }
  0x46   : > { %v195_v4 = vld [vmem:[%s3082_s5 + $0x48] sm:$0xff]  ;;  %v194_v5 = vld [vmem:[%s3082_s5 + $0x40] sm:$0xff]  ;;  %v188_v33 = vld [vmem:[%s3082_s5 + $0x10] sm:$0xff]  ;;  %s3155_s22 = scalar_lea.vmem [#allocation4], %s2701_s16   ;;  %p2334_p8 = scmp.lt.s32.totalorder (%p3022_p9), %s2333_s30, 64 }
  0x47   : > { %v199_v6 = vld [vmem:[%s3082_s5 + $0x68] sm:$0xff]  ;;  %v198_v7 = vld [vmem:[%s3082_s5 + $0x60] sm:$0xff]  ;;  %v193_v34 = vld [vmem:[%s3082_s5 + $0x38] sm:$0xff]  ;;  %s4274_s6 = scalar_lea.vmem (%p3022_p9), %s4529_s1, %s2702_s25  }
  0x48   : > { %v203_v8 = vld [vmem:[%s3082_s5 + $0x88] sm:$0xff]  ;;  %v202_v9 = vld [vmem:[%s3082_s5 + $0x80] sm:$0xff]  ;;  %v192_v35 = vld [vmem:[%s3082_s5 + $0x30] sm:$0xff] }
  0x49   : > { %627 = vxpose.xlu1.b32.cont [2/16] %v191_v2, 128  ;;  %595 = vxpose.xlu0.b32.cont [2/16] %v190_v3, 128  ;;  %v207_v10 = vld [vmem:[%s3082_s5 + $0xa8] sm:$0xff]  ;;  %v206_v11 = vld [vmem:[%s3082_s5 + $0xa0] sm:$0xff]  ;;  %v197_v36 = vld [vmem:[%s3082_s5 + $0x58] sm:$0xff] }
  0x4a   : > { %v211_v12 = vld [vmem:[%s3082_s5 + $0xc8] sm:$0xff]  ;;  %v210_v13 = vld [vmem:[%s3082_s5 + $0xc0] sm:$0xff]  ;;  %v196_v37 = vld [vmem:[%s3082_s5 + $0x50] sm:$0xff] }
  0x4b   : > { %v215_v14 = vld [vmem:[%s3082_s5 + $0xe8] sm:$0xff]  ;;  %v214_v15 = vld [vmem:[%s3082_s5 + $0xe0] sm:$0xff]  ;;  %v201_v38 = vld [vmem:[%s3082_s5 + $0x78] sm:$0xff] }
  0x4c   : > { %v219_v16 = vld [vmem:[%s3082_s5 + $0x108] sm:$0xff]  ;;  %v218_v17 = vld [vmem:[%s3082_s5 + $0x100] sm:$0xff]  ;;  %v200_v39 = vld [vmem:[%s3082_s5 + $0x70] sm:$0xff] }
  0x4d   : > { %628 = vxpose.xlu1.b32.cont [3/16] %v195_v4, 128  ;;  %596 = vxpose.xlu0.b32.cont [3/16] %v194_v5, 128  ;;  %v223_v18 = vld [vmem:[%s3082_s5 + $0x128] sm:$0xff]  ;;  %v222_v19 = vld [vmem:[%s3082_s5 + $0x120] sm:$0xff]  ;;  %v205_v40 = vld [vmem:[%s3082_s5 + $0x98] sm:$0xff] }
  0x4e   : > { %v227_v20 = vld [vmem:[%s3082_s5 + $0x148] sm:$0xff]  ;;  %v226_v21 = vld [vmem:[%s3082_s5 + $0x140] sm:$0xff]  ;;  %v204_v41 = vld [vmem:[%s3082_s5 + $0x90] sm:$0xff] }
  0x4f   : > { %v231_v22 = vld [vmem:[%s3082_s5 + $0x168] sm:$0xff]  ;;  %v230_v23 = vld [vmem:[%s3082_s5 + $0x160] sm:$0xff]  ;;  %v209_v42 = vld [vmem:[%s3082_s5 + $0xb8] sm:$0xff] }
  0x50   : > { %v235_v24 = vld [vmem:[%s3082_s5 + $0x188] sm:$0xff]  ;;  %v234_v25 = vld [vmem:[%s3082_s5 + $0x180] sm:$0xff]  ;;  %v208_v43 = vld [vmem:[%s3082_s5 + $0xb0] sm:$0xff] }
  0x51   : > { %629 = vxpose.xlu1.b32.cont [4/16] %v199_v6, 128  ;;  %597 = vxpose.xlu0.b32.cont [4/16] %v198_v7, 128  ;;  %v239_v26 = vld [vmem:[%s3082_s5 + $0x1a8] sm:$0xff]  ;;  %v238_v27 = vld [vmem:[%s3082_s5 + $0x1a0] sm:$0xff]  ;;  %v213_v44 = vld [vmem:[%s3082_s5 + $0xd8] sm:$0xff] }
  0x52   : > { %v243_v28 = vld [vmem:[%s3082_s5 + $0x1c8] sm:$0xff]  ;;  %v242_v29 = vld [vmem:[%s3082_s5 + $0x1c0] sm:$0xff]  ;;  %v212_v45 = vld [vmem:[%s3082_s5 + $0xd0] sm:$0xff] }
  0x53   : > { %v247_v30 = vld [vmem:[%s3082_s5 + $0x1e8] sm:$0xff]  ;;  %v246_v31 = vld [vmem:[%s3082_s5 + $0x1e0] sm:$0xff]  ;;  %v217_v46 = vld [vmem:[%s3082_s5 + $0xf8] sm:$0xff] }
  0x54   : > { %v216_v47 = vld [vmem:[%s3082_s5 + $0xf0] sm:$0xff]  ;;  %v221_v48 = vld [vmem:[%s3082_s5 + $0x118] sm:$0xff]  ;;  %v251_v0 = vld [vmem:[%s3082_s5 + $0x208] sm:$0xff] }
  0x55   : > { %630 = vxpose.xlu1.b32.cont [5/16] %v203_v8, 128  ;;  %598 = vxpose.xlu0.b32.cont [5/16] %v202_v9, 128  ;;  %v220_v49 = vld [vmem:[%s3082_s5 + $0x110] sm:$0xff]  ;;  %v225_v50 = vld [vmem:[%s3082_s5 + $0x138] sm:$0xff]  ;;  %v250_v1 = vld [vmem:[%s3082_s5 + $0x200] sm:$0xff] }
  0x56   : > { %v224_v51 = vld [vmem:[%s3082_s5 + $0x130] sm:$0xff]  ;;  %v229_v52 = vld [vmem:[%s3082_s5 + $0x158] sm:$0xff]  ;;  %v255_v4 = vld [vmem:[%s3082_s5 + $0x228] sm:$0xff] }
  0x57   : > { %v228_v53 = vld [vmem:[%s3082_s5 + $0x150] sm:$0xff]  ;;  %v233_v54 = vld [vmem:[%s3082_s5 + $0x178] sm:$0xff]  ;;  %v254_v5 = vld [vmem:[%s3082_s5 + $0x220] sm:$0xff] }
  0x58   : > { %v232_v55 = vld [vmem:[%s3082_s5 + $0x170] sm:$0xff]  ;;  %v237_v56 = vld [vmem:[%s3082_s5 + $0x198] sm:$0xff]  ;;  %v259_v8 = vld [vmem:[%s3082_s5 + $0x248] sm:$0xff] }
  0x59   : > { %631 = vxpose.xlu1.b32.cont [6/16] %v207_v10, 128  ;;  %599 = vxpose.xlu0.b32.cont [6/16] %v206_v11, 128  ;;  %v236_v57 = vld [vmem:[%s3082_s5 + $0x190] sm:$0xff]  ;;  %v241_v58 = vld [vmem:[%s3082_s5 + $0x1b8] sm:$0xff]  ;;  %v258_v9 = vld [vmem:[%s3082_s5 + $0x240] sm:$0xff] }
  0x5a   : > { %v240_v59 = vld [vmem:[%s3082_s5 + $0x1b0] sm:$0xff]  ;;  %v245_v60 = vld [vmem:[%s3082_s5 + $0x1d8] sm:$0xff] }
  0x5b   : > { %v244_v61 = vld [vmem:[%s3082_s5 + $0x1d0] sm:$0xff]  ;;  %v249_v62 = vld [vmem:[%s3082_s5 + $0x1f8] sm:$0xff] }
  0x5c   : > { %v248_v63 = vld [vmem:[%s3082_s5 + $0x1f0] sm:$0xff] }
  0x5d   : > { %632 = vxpose.xlu1.b32.cont [7/16] %v211_v12, 128  ;;  %600 = vxpose.xlu0.b32.cont [7/16] %v210_v13, 128  ;;  %v263_v12 = vld [vmem:[%s3082_s5 + $0x268] sm:$0xff]  ;;  %v262_v13 = vld [vmem:[%s3082_s5 + $0x260] sm:$0xff] }
  0x61   : > { %633 = vxpose.xlu1.b32.cont [8/16] %v215_v14, 128  ;;  %601 = vxpose.xlu0.b32.cont [8/16] %v214_v15, 128 }
  0x65   : > { %634 = vxpose.xlu1.b32.cont [9/16] %v219_v16, 128  ;;  %602 = vxpose.xlu0.b32.cont [9/16] %v218_v17, 128  ;;  %v267_v16 = vld [vmem:[%s3082_s5 + $0x288] sm:$0xff]  ;;  %v266_v17 = vld [vmem:[%s3082_s5 + $0x280] sm:$0xff] }
  0x69   : > { %635 = vxpose.xlu1.b32.cont [10/16] %v223_v18, 128  ;;  %603 = vxpose.xlu0.b32.cont [10/16] %v222_v19, 128 }
  0x6d   : > { %636 = vxpose.xlu1.b32.cont [11/16] %v227_v20, 128  ;;  %604 = vxpose.xlu0.b32.cont [11/16] %v226_v21, 128  ;;  %v271_v20 = vld [vmem:[%s3082_s5 + $0x2a8] sm:$0xff]  ;;  %v270_v21 = vld [vmem:[%s3082_s5 + $0x2a0] sm:$0xff] }
  0x71   : > { %637 = vxpose.xlu1.b32.cont [12/16] %v231_v22, 128  ;;  %605 = vxpose.xlu0.b32.cont [12/16] %v230_v23, 128 }
  0x75   : > { %638 = vxpose.xlu1.b32.cont [13/16] %v235_v24, 128  ;;  %606 = vxpose.xlu0.b32.cont [13/16] %v234_v25, 128  ;;  %v275_v24 = vld [vmem:[%s3082_s5 + $0x2c8] sm:$0xff]  ;;  %v274_v25 = vld [vmem:[%s3082_s5 + $0x2c0] sm:$0xff] }
  0x79   : > { %639 = vxpose.xlu1.b32.cont [14/16] %v239_v26, 128  ;;  %607 = vxpose.xlu0.b32.cont [14/16] %v238_v27, 128 }
  0x7d   : > { %640 = vxpose.xlu1.b32.cont [15/16] %v243_v28, 128  ;;  %608 = vxpose.xlu0.b32.cont [15/16] %v242_v29, 128  ;;  %v279_v28 = vld [vmem:[%s3082_s5 + $0x2e8] sm:$0xff]  ;;  %v278_v29 = vld [vmem:[%s3082_s5 + $0x2e0] sm:$0xff] }
  0x81   : > { %641 = vxpose.xlu1.b32.end [16/16] %v247_v30, 128  ;;  %609 = vxpose.xlu0.b32.end [16/16] %v246_v31, 128 }
  0x85   : > { %690 = vxpose.xlu1.b32.start [1/16] %v189_v32, 128  ;;  %658 = vxpose.xlu0.b32.start [1/16] %v188_v33, 128  ;;  %v283_v32 = vld [vmem:[%s3082_s5 + $0x308] sm:$0xff]  ;;  %v282_v33 = vld [vmem:[%s3082_s5 + $0x300] sm:$0xff] }
  0x89   : > { %691 = vxpose.xlu1.b32.cont [2/16] %v193_v34, 128  ;;  %659 = vxpose.xlu0.b32.cont [2/16] %v192_v35, 128 }
  0x8d   : > { %692 = vxpose.xlu1.b32.cont [3/16] %v197_v36, 128  ;;  %660 = vxpose.xlu0.b32.cont [3/16] %v196_v37, 128  ;;  %v287_v36 = vld [vmem:[%s3082_s5 + $0x328] sm:$0xff]  ;;  %v286_v37 = vld [vmem:[%s3082_s5 + $0x320] sm:$0xff] }
  0x91   : > { %693 = vxpose.xlu1.b32.cont [4/16] %v201_v38, 128  ;;  %661 = vxpose.xlu0.b32.cont [4/16] %v200_v39, 128 }
  0x95   : > { %694 = vxpose.xlu1.b32.cont [5/16] %v205_v40, 128  ;;  %662 = vxpose.xlu0.b32.cont [5/16] %v204_v41, 128  ;;  %v291_v40 = vld [vmem:[%s3082_s5 + $0x348] sm:$0xff]  ;;  %v290_v41 = vld [vmem:[%s3082_s5 + $0x340] sm:$0xff] }
  0x99   : > { %695 = vxpose.xlu1.b32.cont [6/16] %v209_v42, 128  ;;  %663 = vxpose.xlu0.b32.cont [6/16] %v208_v43, 128 }
  0x9d   : > { %696 = vxpose.xlu1.b32.cont [7/16] %v213_v44, 128  ;;  %664 = vxpose.xlu0.b32.cont [7/16] %v212_v45, 128  ;;  %v295_v44 = vld [vmem:[%s3082_s5 + $0x368] sm:$0xff]  ;;  %v294_v45 = vld [vmem:[%s3082_s5 + $0x360] sm:$0xff] }
  0xa1   : > { %697 = vxpose.xlu1.b32.cont [8/16] %v217_v46, 128  ;;  %665 = vxpose.xlu0.b32.cont [8/16] %v216_v47, 128 }
  0xa5   : > { %698 = vxpose.xlu1.b32.cont [9/16] %v221_v48, 128  ;;  %666 = vxpose.xlu0.b32.cont [9/16] %v220_v49, 128  ;;  %v299_v48 = vld [vmem:[%s3082_s5 + $0x388] sm:$0xff]  ;;  %v298_v49 = vld [vmem:[%s3082_s5 + $0x380] sm:$0xff] }
  0xa9   : > { %699 = vxpose.xlu1.b32.cont [10/16] %v225_v50, 128  ;;  %667 = vxpose.xlu0.b32.cont [10/16] %v224_v51, 128 }
  0xad   : > { %700 = vxpose.xlu1.b32.cont [11/16] %v229_v52, 128  ;;  %668 = vxpose.xlu0.b32.cont [11/16] %v228_v53, 128  ;;  %v303_v52 = vld [vmem:[%s3082_s5 + $0x3a8] sm:$0xff]  ;;  %v302_v53 = vld [vmem:[%s3082_s5 + $0x3a0] sm:$0xff] }
  0xb1   : > { %701 = vxpose.xlu1.b32.cont [12/16] %v233_v54, 128  ;;  %669 = vxpose.xlu0.b32.cont [12/16] %v232_v55, 128 }
  0xb5   : > { %702 = vxpose.xlu1.b32.cont [13/16] %v237_v56, 128  ;;  %670 = vxpose.xlu0.b32.cont [13/16] %v236_v57, 128  ;;  %v307_v56 = vld [vmem:[%s3082_s5 + $0x3c8] sm:$0xff]  ;;  %v306_v57 = vld [vmem:[%s3082_s5 + $0x3c0] sm:$0xff] }
  0xb9   : > { %703 = vxpose.xlu1.b32.cont [14/16] %v241_v58, 128  ;;  %671 = vxpose.xlu0.b32.cont [14/16] %v240_v59, 128 }
  0xbd   : > { %704 = vxpose.xlu1.b32.cont [15/16] %v245_v60, 128  ;;  %672 = vxpose.xlu0.b32.cont [15/16] %v244_v61, 128  ;;  %v311_v60 = vld [vmem:[%s3082_s5 + $0x3e8] sm:$0xff]  ;;  %v310_v61 = vld [vmem:[%s3082_s5 + $0x3e0] sm:$0xff] }
  0xc1   : > { %705 = vxpose.xlu1.b32.end [16/16] %v249_v62, 128  ;;  %673 = vxpose.xlu0.b32.end [16/16] %v248_v63, 128 }
  0xc5   : > { %754 = vxpose.xlu1.b32.start [1/16] %v251_v0, 128  ;;  %v642_v2 = vpop.trf.xlu1  ;;  %722 = vxpose.xlu0.b32.start [1/16] %v250_v1, 128  ;;  %v610_v3 = vpop.trf.xlu0  ;;  %v253_v0 = vld [vmem:[%s3082_s5 + $0x218] sm:$0xff]  ;;  %v252_v1 = vld [vmem:[%s3082_s5 + $0x210] sm:$0xff] }
  0xc6   : > { %1795 = vst [vmem:[%s3155_s22 + $0x180] sm:$0xff] %v642_v2  ;;  %1746 = vst [vmem:[%s3155_s22] sm:$0xff] %v610_v3 }
  0xc9   : > { %755 = vxpose.xlu1.b32.cont [2/16] %v255_v4, 128  ;;  %v643_v6 = vpop.trf.xlu1  ;;  %723 = vxpose.xlu0.b32.cont [2/16] %v254_v5, 128  ;;  %v611_v7 = vpop.trf.xlu0  ;;  %v257_v4 = vld [vmem:[%s3082_s5 + $0x238] sm:$0xff]  ;;  %v256_v5 = vld [vmem:[%s3082_s5 + $0x230] sm:$0xff] }
  0xca   : > { %1798 = vst [vmem:[%s3155_s22 + $0x198] sm:$0xff] %v643_v6  ;;  %1750 = vst [vmem:[%s3155_s22 + $0x18] sm:$0xff] %v611_v7 }
  0xcd   : > { %756 = vxpose.xlu1.b32.cont [3/16] %v259_v8, 128  ;;  %v644_v10 = vpop.trf.xlu1  ;;  %724 = vxpose.xlu0.b32.cont [3/16] %v258_v9, 128  ;;  %v612_v11 = vpop.trf.xlu0  ;;  %v261_v8 = vld [vmem:[%s3082_s5 + $0x258] sm:$0xff]  ;;  %v260_v9 = vld [vmem:[%s3082_s5 + $0x250] sm:$0xff] }
  0xce   : > { %1801 = vst [vmem:[%s3155_s22 + $0x1b0] sm:$0xff] %v644_v10  ;;  %1753 = vst [vmem:[%s3155_s22 + $0x30] sm:$0xff] %v612_v11 }
  0xd1   : > { %757 = vxpose.xlu1.b32.cont [4/16] %v263_v12, 128  ;;  %v645_v14 = vpop.trf.xlu1  ;;  %725 = vxpose.xlu0.b32.cont [4/16] %v262_v13, 128  ;;  %v613_v15 = vpop.trf.xlu0  ;;  %v265_v12 = vld [vmem:[%s3082_s5 + $0x278] sm:$0xff]  ;;  %v264_v13 = vld [vmem:[%s3082_s5 + $0x270] sm:$0xff] }
  0xd2   : > { %1804 = vst [vmem:[%s3155_s22 + $0x1c8] sm:$0xff] %v645_v14  ;;  %1756 = vst [vmem:[%s3155_s22 + $0x48] sm:$0xff] %v613_v15 }
  0xd5   : > { %758 = vxpose.xlu1.b32.cont [5/16] %v267_v16, 128  ;;  %v646_v18 = vpop.trf.xlu1  ;;  %726 = vxpose.xlu0.b32.cont [5/16] %v266_v17, 128  ;;  %v614_v19 = vpop.trf.xlu0  ;;  %v269_v16 = vld [vmem:[%s3082_s5 + $0x298] sm:$0xff]  ;;  %v268_v17 = vld [vmem:[%s3082_s5 + $0x290] sm:$0xff] }
  0xd6   : > { %1807 = vst [vmem:[%s3155_s22 + $0x1e0] sm:$0xff] %v646_v18  ;;  %1759 = vst [vmem:[%s3155_s22 + $0x60] sm:$0xff] %v614_v19 }
  0xd9   : > { %759 = vxpose.xlu1.b32.cont [6/16] %v271_v20, 128  ;;  %v647_v22 = vpop.trf.xlu1  ;;  %727 = vxpose.xlu0.b32.cont [6/16] %v270_v21, 128  ;;  %v615_v23 = vpop.trf.xlu0  ;;  %v273_v20 = vld [vmem:[%s3082_s5 + $0x2b8] sm:$0xff]  ;;  %v272_v21 = vld [vmem:[%s3082_s5 + $0x2b0] sm:$0xff] }
  0xda   : > { %1810 = vst [vmem:[%s3155_s22 + $0x1f8] sm:$0xff] %v647_v22  ;;  %1762 = vst [vmem:[%s3155_s22 + $0x78] sm:$0xff] %v615_v23 }
  0xdd   : > { %760 = vxpose.xlu1.b32.cont [7/16] %v275_v24, 128  ;;  %v648_v26 = vpop.trf.xlu1  ;;  %728 = vxpose.xlu0.b32.cont [7/16] %v274_v25, 128  ;;  %v616_v27 = vpop.trf.xlu0  ;;  %v277_v24 = vld [vmem:[%s3082_s5 + $0x2d8] sm:$0xff]  ;;  %v276_v25 = vld [vmem:[%s3082_s5 + $0x2d0] sm:$0xff] }
  0xde   : > { %1813 = vst [vmem:[%s3155_s22 + $0x210] sm:$0xff] %v648_v26  ;;  %1765 = vst [vmem:[%s3155_s22 + $0x90] sm:$0xff] %v616_v27 }
  0xe1   : > { %761 = vxpose.xlu1.b32.cont [8/16] %v279_v28, 128  ;;  %v649_v30 = vpop.trf.xlu1  ;;  %729 = vxpose.xlu0.b32.cont [8/16] %v278_v29, 128  ;;  %v617_v31 = vpop.trf.xlu0  ;;  %v281_v28 = vld [vmem:[%s3082_s5 + $0x2f8] sm:$0xff]  ;;  %v280_v29 = vld [vmem:[%s3082_s5 + $0x2f0] sm:$0xff] }
  0xe2   : > { %1816 = vst [vmem:[%s3155_s22 + $0x228] sm:$0xff] %v649_v30  ;;  %1768 = vst [vmem:[%s3155_s22 + $0xa8] sm:$0xff] %v617_v31 }
  0xe5   : > { %762 = vxpose.xlu1.b32.cont [9/16] %v283_v32, 128  ;;  %v650_v34 = vpop.trf.xlu1  ;;  %730 = vxpose.xlu0.b32.cont [9/16] %v282_v33, 128  ;;  %v618_v35 = vpop.trf.xlu0  ;;  %v285_v32 = vld [vmem:[%s3082_s5 + $0x318] sm:$0xff]  ;;  %v284_v33 = vld [vmem:[%s3082_s5 + $0x310] sm:$0xff] }
  0xe6   : > { %1819 = vst [vmem:[%s3155_s22 + $0x240] sm:$0xff] %v650_v34  ;;  %1771 = vst [vmem:[%s3155_s22 + $0xc0] sm:$0xff] %v618_v35 }
  0xe9   : > { %763 = vxpose.xlu1.b32.cont [10/16] %v287_v36, 128  ;;  %v651_v38 = vpop.trf.xlu1  ;;  %731 = vxpose.xlu0.b32.cont [10/16] %v286_v37, 128  ;;  %v619_v39 = vpop.trf.xlu0  ;;  %v289_v36 = vld [vmem:[%s3082_s5 + $0x338] sm:$0xff]  ;;  %v288_v37 = vld [vmem:[%s3082_s5 + $0x330] sm:$0xff] }
  0xea   : > { %1822 = vst [vmem:[%s3155_s22 + $0x258] sm:$0xff] %v651_v38  ;;  %1774 = vst [vmem:[%s3155_s22 + $0xd8] sm:$0xff] %v619_v39 }
  0xed   : > { %764 = vxpose.xlu1.b32.cont [11/16] %v291_v40, 128  ;;  %v652_v42 = vpop.trf.xlu1  ;;  %732 = vxpose.xlu0.b32.cont [11/16] %v290_v41, 128  ;;  %v620_v43 = vpop.trf.xlu0  ;;  %v293_v40 = vld [vmem:[%s3082_s5 + $0x358] sm:$0xff]  ;;  %v292_v41 = vld [vmem:[%s3082_s5 + $0x350] sm:$0xff] }
  0xee   : > { %1825 = vst [vmem:[%s3155_s22 + $0x270] sm:$0xff] %v652_v42  ;;  %1777 = vst [vmem:[%s3155_s22 + $0xf0] sm:$0xff] %v620_v43 }
  0xf1   : > { %765 = vxpose.xlu1.b32.cont [12/16] %v295_v44, 128  ;;  %v653_v46 = vpop.trf.xlu1  ;;  %733 = vxpose.xlu0.b32.cont [12/16] %v294_v45, 128  ;;  %v621_v47 = vpop.trf.xlu0  ;;  %v297_v44 = vld [vmem:[%s3082_s5 + $0x378] sm:$0xff]  ;;  %v296_v45 = vld [vmem:[%s3082_s5 + $0x370] sm:$0xff] }
  0xf2   : > { %1828 = vst [vmem:[%s3155_s22 + $0x288] sm:$0xff] %v653_v46  ;;  %1780 = vst [vmem:[%s3155_s22 + $0x108] sm:$0xff] %v621_v47 }
  0xf5   : > { %766 = vxpose.xlu1.b32.cont [13/16] %v299_v48, 128  ;;  %v654_v50 = vpop.trf.xlu1  ;;  %734 = vxpose.xlu0.b32.cont [13/16] %v298_v49, 128  ;;  %v622_v51 = vpop.trf.xlu0  ;;  %v301_v48 = vld [vmem:[%s3082_s5 + $0x398] sm:$0xff]  ;;  %v300_v49 = vld [vmem:[%s3082_s5 + $0x390] sm:$0xff] }
  0xf6   : > { %1831 = vst [vmem:[%s3155_s22 + $0x2a0] sm:$0xff] %v654_v50  ;;  %1783 = vst [vmem:[%s3155_s22 + $0x120] sm:$0xff] %v622_v51 }
  0xf9   : > { %767 = vxpose.xlu1.b32.cont [14/16] %v303_v52, 128  ;;  %v655_v54 = vpop.trf.xlu1  ;;  %735 = vxpose.xlu0.b32.cont [14/16] %v302_v53, 128  ;;  %v623_v55 = vpop.trf.xlu0  ;;  %v305_v52 = vld [vmem:[%s3082_s5 + $0x3b8] sm:$0xff]  ;;  %v304_v53 = vld [vmem:[%s3082_s5 + $0x3b0] sm:$0xff] }
  0xfa   : > { %1834 = vst [vmem:[%s3155_s22 + $0x2b8] sm:$0xff] %v655_v54  ;;  %1786 = vst [vmem:[%s3155_s22 + $0x138] sm:$0xff] %v623_v55 }
  0xfd   : > { %768 = vxpose.xlu1.b32.cont [15/16] %v307_v56, 128  ;;  %v656_v58 = vpop.trf.xlu1  ;;  %736 = vxpose.xlu0.b32.cont [15/16] %v306_v57, 128  ;;  %v624_v59 = vpop.trf.xlu0  ;;  %v309_v56 = vld [vmem:[%s3082_s5 + $0x3d8] sm:$0xff]  ;;  %v308_v57 = vld [vmem:[%s3082_s5 + $0x3d0] sm:$0xff] }
  0xfe   : > { %1837 = vst [vmem:[%s3155_s22 + $0x2d0] sm:$0xff] %v656_v58  ;;  %1789 = vst [vmem:[%s3155_s22 + $0x150] sm:$0xff] %v624_v59 }
 0x101   : > { %769 = vxpose.xlu1.b32.end [16/16] %v311_v60, 128  ;;  %v657_v62 = vpop.trf.xlu1  ;;  %737 = vxpose.xlu0.b32.end [16/16] %v310_v61, 128  ;;  %v625_v63 = vpop.trf.xlu0  ;;  %v313_v60 = vld [vmem:[%s3082_s5 + $0x3f8] sm:$0xff]  ;;  %v312_v61 = vld [vmem:[%s3082_s5 + $0x3f0] sm:$0xff] }
 0x102   : > { %1840 = vst [vmem:[%s3155_s22 + $0x2e8] sm:$0xff] %v657_v62  ;;  %1792 = vst [vmem:[%s3155_s22 + $0x168] sm:$0xff] %v625_v63 }
 0x105   : > { %818 = vxpose.xlu1.b32.start [1/16] %v253_v0, 128  ;;  %v706_v2 = vpop.trf.xlu1  ;;  %786 = vxpose.xlu0.b32.start [1/16] %v252_v1, 128  ;;  %v674_v3 = vpop.trf.xlu0  ;;  %v315_v0 = vld [vmem:[%s3082_s5 + $0x408] sm:$0xff]  ;;  %v314_v1 = vld [vmem:[%s3082_s5 + $0x400] sm:$0xff] }
 0x106   : > { %1891 = vst [vmem:[%s3155_s22 + $0x480] sm:$0xff] %v706_v2  ;;  %1843 = vst [vmem:[%s3155_s22 + $0x300] sm:$0xff] %v674_v3 }
 0x109   : > { %819 = vxpose.xlu1.b32.cont [2/16] %v257_v4, 128  ;;  %v707_v6 = vpop.trf.xlu1  ;;  %787 = vxpose.xlu0.b32.cont [2/16] %v256_v5, 128  ;;  %v675_v7 = vpop.trf.xlu0  ;;  %v319_v4 = vld [vmem:[%s3082_s5 + $0x428] sm:$0xff]  ;;  %v318_v5 = vld [vmem:[%s3082_s5 + $0x420] sm:$0xff] }
 0x10a   : > { %1894 = vst [vmem:[%s3155_s22 + $0x498] sm:$0xff] %v707_v6  ;;  %1846 = vst [vmem:[%s3155_s22 + $0x318] sm:$0xff] %v675_v7 }
 0x10d   : > { %820 = vxpose.xlu1.b32.cont [3/16] %v261_v8, 128  ;;  %v708_v10 = vpop.trf.xlu1  ;;  %788 = vxpose.xlu0.b32.cont [3/16] %v260_v9, 128  ;;  %v676_v11 = vpop.trf.xlu0 }
 0x10e   : > { %1897 = vst [vmem:[%s3155_s22 + $0x4b0] sm:$0xff] %v708_v10  ;;  %1849 = vst [vmem:[%s3155_s22 + $0x330] sm:$0xff] %v676_v11 }
 0x111   : > { %821 = vxpose.xlu1.b32.cont [4/16] %v265_v12, 128  ;;  %v709_v14 = vpop.trf.xlu1  ;;  %789 = vxpose.xlu0.b32.cont [4/16] %v264_v13, 128  ;;  %v677_v15 = vpop.trf.xlu0 }
 0x112   : > { %1900 = vst [vmem:[%s3155_s22 + $0x4c8] sm:$0xff] %v709_v14  ;;  %1852 = vst [vmem:[%s3155_s22 + $0x348] sm:$0xff] %v677_v15 }
 0x115   : > { %822 = vxpose.xlu1.b32.cont [5/16] %v269_v16, 128  ;;  %v710_v18 = vpop.trf.xlu1  ;;  %790 = vxpose.xlu0.b32.cont [5/16] %v268_v17, 128  ;;  %v678_v19 = vpop.trf.xlu0 }
 0x116   : > { %1903 = vst [vmem:[%s3155_s22 + $0x4e0] sm:$0xff] %v710_v18  ;;  %1855 = vst [vmem:[%s3155_s22 + $0x360] sm:$0xff] %v678_v19 }
 0x119   : > { %823 = vxpose.xlu1.b32.cont [6/16] %v273_v20, 128  ;;  %v711_v22 = vpop.trf.xlu1  ;;  %791 = vxpose.xlu0.b32.cont [6/16] %v272_v21, 128  ;;  %v679_v23 = vpop.trf.xlu0 }
 0x11a   : > { %1906 = vst [vmem:[%s3155_s22 + $0x4f8] sm:$0xff] %v711_v22  ;;  %1858 = vst [vmem:[%s3155_s22 + $0x378] sm:$0xff] %v679_v23 }
 0x11d   : > { %824 = vxpose.xlu1.b32.cont [7/16] %v277_v24, 128  ;;  %v712_v26 = vpop.trf.xlu1  ;;  %792 = vxpose.xlu0.b32.cont [7/16] %v276_v25, 128  ;;  %v680_v27 = vpop.trf.xlu0 }
 0x11e   : > { %1909 = vst [vmem:[%s3155_s22 + $0x510] sm:$0xff] %v712_v26  ;;  %1861 = vst [vmem:[%s3155_s22 + $0x390] sm:$0xff] %v680_v27 }
 0x121   : > { %825 = vxpose.xlu1.b32.cont [8/16] %v281_v28, 128  ;;  %v713_v30 = vpop.trf.xlu1  ;;  %793 = vxpose.xlu0.b32.cont [8/16] %v280_v29, 128  ;;  %v681_v31 = vpop.trf.xlu0 }
 0x122   : > { %1912 = vst [vmem:[%s3155_s22 + $0x528] sm:$0xff] %v713_v30  ;;  %1864 = vst [vmem:[%s3155_s22 + $0x3a8] sm:$0xff] %v681_v31 }
 0x125   : > { %826 = vxpose.xlu1.b32.cont [9/16] %v285_v32, 128  ;;  %v714_v34 = vpop.trf.xlu1  ;;  %794 = vxpose.xlu0.b32.cont [9/16] %v284_v33, 128  ;;  %v682_v35 = vpop.trf.xlu0 }
 0x126   : > { %1915 = vst [vmem:[%s3155_s22 + $0x540] sm:$0xff] %v714_v34  ;;  %1867 = vst [vmem:[%s3155_s22 + $0x3c0] sm:$0xff] %v682_v35  ;;  %v317_v34 = vld [vmem:[%s3082_s5 + $0x418] sm:$0xff]  ;;  %v316_v35 = vld [vmem:[%s3082_s5 + $0x410] sm:$0xff] }
 0x129   : > { %827 = vxpose.xlu1.b32.cont [10/16] %v289_v36, 128  ;;  %v715_v38 = vpop.trf.xlu1  ;;  %795 = vxpose.xlu0.b32.cont [10/16] %v288_v37, 128  ;;  %v683_v39 = vpop.trf.xlu0 }
 0x12a   : > { %1918 = vst [vmem:[%s3155_s22 + $0x558] sm:$0xff] %v715_v38  ;;  %1870 = vst [vmem:[%s3155_s22 + $0x3d8] sm:$0xff] %v683_v39  ;;  %v321_v38 = vld [vmem:[%s3082_s5 + $0x438] sm:$0xff]  ;;  %v320_v39 = vld [vmem:[%s3082_s5 + $0x430] sm:$0xff] }
 0x12d   : > { %828 = vxpose.xlu1.b32.cont [11/16] %v293_v40, 128  ;;  %v716_v42 = vpop.trf.xlu1  ;;  %796 = vxpose.xlu0.b32.cont [11/16] %v292_v41, 128  ;;  %v684_v43 = vpop.trf.xlu0 }
 0x12e   : > { %1921 = vst [vmem:[%s3155_s22 + $0x570] sm:$0xff] %v716_v42  ;;  %1873 = vst [vmem:[%s3155_s22 + $0x3f0] sm:$0xff] %v684_v43 }
 0x131   : > { %829 = vxpose.xlu1.b32.cont [12/16] %v297_v44, 128  ;;  %v717_v46 = vpop.trf.xlu1  ;;  %797 = vxpose.xlu0.b32.cont [12/16] %v296_v45, 128  ;;  %v685_v47 = vpop.trf.xlu0 }
 0x132   : > { %1924 = vst [vmem:[%s3155_s22 + $0x588] sm:$0xff] %v717_v46  ;;  %1876 = vst [vmem:[%s3155_s22 + $0x408] sm:$0xff] %v685_v47 }
 0x135   : > { %830 = vxpose.xlu1.b32.cont [13/16] %v301_v48, 128  ;;  %v718_v50 = vpop.trf.xlu1  ;;  %798 = vxpose.xlu0.b32.cont [13/16] %v300_v49, 128  ;;  %v686_v51 = vpop.trf.xlu0 }
 0x136   : > { %1927 = vst [vmem:[%s3155_s22 + $0x5a0] sm:$0xff] %v718_v50  ;;  %1879 = vst [vmem:[%s3155_s22 + $0x420] sm:$0xff] %v686_v51 }
 0x139   : > { %831 = vxpose.xlu1.b32.cont [14/16] %v305_v52, 128  ;;  %v719_v54 = vpop.trf.xlu1  ;;  %799 = vxpose.xlu0.b32.cont [14/16] %v304_v53, 128  ;;  %v687_v55 = vpop.trf.xlu0 }
 0x13a   : > { %1930 = vst [vmem:[%s3155_s22 + $0x5b8] sm:$0xff] %v719_v54  ;;  %1882 = vst [vmem:[%s3155_s22 + $0x438] sm:$0xff] %v687_v55 }
 0x13d   : > { %832 = vxpose.xlu1.b32.cont [15/16] %v309_v56, 128  ;;  %v720_v58 = vpop.trf.xlu1  ;;  %800 = vxpose.xlu0.b32.cont [15/16] %v308_v57, 128  ;;  %v688_v59 = vpop.trf.xlu0 }
 0x13e   : > { %1933 = vst [vmem:[%s3155_s22 + $0x5d0] sm:$0xff] %v720_v58  ;;  %1885 = vst [vmem:[%s3155_s22 + $0x450] sm:$0xff] %v688_v59 }
 0x141   : > { %833 = vxpose.xlu1.b32.end [16/16] %v313_v60, 128  ;;  %v721_v62 = vpop.trf.xlu1  ;;  %801 = vxpose.xlu0.b32.end [16/16] %v312_v61, 128  ;;  %v689_v63 = vpop.trf.xlu0 }
 0x142   : > { %1936 = vst [vmem:[%s3155_s22 + $0x5e8] sm:$0xff] %v721_v62  ;;  %1888 = vst [vmem:[%s3155_s22 + $0x468] sm:$0xff] %v689_v63 }
 0x145   : > { %882 = vxpose.xlu1.b32.start [1/2] (short) %v315_v0, 128  ;;  %v770_v2 = vpop.trf.xlu1  ;;  %850 = vxpose.xlu0.b32.start [1/2] (short) %v314_v1, 128  ;;  %v738_v3 = vpop.trf.xlu0 }
 0x146   : > { %1796 = vst [vmem:[%s3155_s22 + $0x188] sm:$0xff] %v770_v2  ;;  %1747 = vst [vmem:[%s3155_s22 + $0x8] sm:$0xff] %v738_v3 }
 0x149   : > { %883 = vxpose.xlu1.b32.end [2/2] (short) %v319_v4, 128  ;;  %v771_v6 = vpop.trf.xlu1  ;;  %851 = vxpose.xlu0.b32.end [2/2] (short) %v318_v5, 128  ;;  %v739_v7 = vpop.trf.xlu0  ;;  %v323_v4 = vld [vmem:[%s3082_s5 + $0x448] sm:$0xff]  ;;  %v322_v5 = vld [vmem:[%s3082_s5 + $0x440] sm:$0xff] }
 0x14a   : > { %1799 = vst [vmem:[%s3155_s22 + $0x1a0] sm:$0xff] %v771_v6  ;;  %1751 = vst [vmem:[%s3155_s22 + $0x20] sm:$0xff] %v739_v7 }
 0x14d   : > { %v772_v8 = vpop.trf.xlu1  ;;  %v740_v9 = vpop.trf.xlu0 }
 0x14e   : > { %1802 = vst [vmem:[%s3155_s22 + $0x1b8] sm:$0xff] %v772_v8  ;;  %1754 = vst [vmem:[%s3155_s22 + $0x38] sm:$0xff] %v740_v9  ;;  %v327_v8 = vld [vmem:[%s3082_s5 + $0x468] sm:$0xff]  ;;  %v326_v9 = vld [vmem:[%s3082_s5 + $0x460] sm:$0xff] }
 0x151   : > { %v773_v10 = vpop.trf.xlu1  ;;  %v741_v11 = vpop.trf.xlu0 }
 0x152   : > { %1805 = vst [vmem:[%s3155_s22 + $0x1d0] sm:$0xff] %v773_v10  ;;  %1757 = vst [vmem:[%s3155_s22 + $0x50] sm:$0xff] %v741_v11 }
 0x155   : > { %v774_v12 = vpop.trf.xlu1  ;;  %v742_v13 = vpop.trf.xlu0 }
 0x156   : > { %1808 = vst [vmem:[%s3155_s22 + $0x1e8] sm:$0xff] %v774_v12  ;;  %1760 = vst [vmem:[%s3155_s22 + $0x68] sm:$0xff] %v742_v13  ;;  %v331_v12 = vld [vmem:[%s3082_s5 + $0x488] sm:$0xff]  ;;  %v330_v13 = vld [vmem:[%s3082_s5 + $0x480] sm:$0xff] }
 0x159   : > { %v775_v14 = vpop.trf.xlu1  ;;  %v743_v15 = vpop.trf.xlu0 }
 0x15a   : > { %1811 = vst [vmem:[%s3155_s22 + $0x200] sm:$0xff] %v775_v14  ;;  %1763 = vst [vmem:[%s3155_s22 + $0x80] sm:$0xff] %v743_v15 }
 0x15d   : > { %v776_v16 = vpop.trf.xlu1  ;;  %v744_v17 = vpop.trf.xlu0 }
 0x15e   : > { %1814 = vst [vmem:[%s3155_s22 + $0x218] sm:$0xff] %v776_v16  ;;  %1766 = vst [vmem:[%s3155_s22 + $0x98] sm:$0xff] %v744_v17  ;;  %v335_v16 = vld [vmem:[%s3082_s5 + $0x4a8] sm:$0xff]  ;;  %v334_v17 = vld [vmem:[%s3082_s5 + $0x4a0] sm:$0xff] }
 0x161   : > { %v777_v18 = vpop.trf.xlu1  ;;  %v745_v19 = vpop.trf.xlu0 }
 0x162   : > { %1817 = vst [vmem:[%s3155_s22 + $0x230] sm:$0xff] %v777_v18  ;;  %1769 = vst [vmem:[%s3155_s22 + $0xb0] sm:$0xff] %v745_v19 }
 0x165   : > { %v778_v20 = vpop.trf.xlu1  ;;  %v746_v21 = vpop.trf.xlu0 }
 0x166   : > { %1820 = vst [vmem:[%s3155_s22 + $0x248] sm:$0xff] %v778_v20  ;;  %1772 = vst [vmem:[%s3155_s22 + $0xc8] sm:$0xff] %v746_v21  ;;  %v339_v20 = vld [vmem:[%s3082_s5 + $0x4c8] sm:$0xff]  ;;  %v338_v21 = vld [vmem:[%s3082_s5 + $0x4c0] sm:$0xff] }
 0x169   : > { %v779_v22 = vpop.trf.xlu1  ;;  %v747_v23 = vpop.trf.xlu0 }
 0x16a   : > { %1823 = vst [vmem:[%s3155_s22 + $0x260] sm:$0xff] %v779_v22  ;;  %1775 = vst [vmem:[%s3155_s22 + $0xe0] sm:$0xff] %v747_v23 }
 0x16d   : > { %v780_v24 = vpop.trf.xlu1  ;;  %v748_v25 = vpop.trf.xlu0 }
 0x16e   : > { %1826 = vst [vmem:[%s3155_s22 + $0x278] sm:$0xff] %v780_v24  ;;  %1778 = vst [vmem:[%s3155_s22 + $0xf8] sm:$0xff] %v748_v25  ;;  %v343_v24 = vld [vmem:[%s3082_s5 + $0x4e8] sm:$0xff]  ;;  %v342_v25 = vld [vmem:[%s3082_s5 + $0x4e0] sm:$0xff] }
 0x171   : > { %v781_v26 = vpop.trf.xlu1  ;;  %v749_v27 = vpop.trf.xlu0 }
 0x172   : > { %1829 = vst [vmem:[%s3155_s22 + $0x290] sm:$0xff] %v781_v26  ;;  %1781 = vst [vmem:[%s3155_s22 + $0x110] sm:$0xff] %v749_v27 }
 0x175   : > { %v782_v28 = vpop.trf.xlu1  ;;  %v750_v29 = vpop.trf.xlu0 }
 0x176   : > { %1832 = vst [vmem:[%s3155_s22 + $0x2a8] sm:$0xff] %v782_v28  ;;  %1784 = vst [vmem:[%s3155_s22 + $0x128] sm:$0xff] %v750_v29  ;;  %v347_v28 = vld [vmem:[%s3082_s5 + $0x508] sm:$0xff]  ;;  %v346_v29 = vld [vmem:[%s3082_s5 + $0x500] sm:$0xff] }
 0x179   : > { %v783_v30 = vpop.trf.xlu1  ;;  %v751_v31 = vpop.trf.xlu0 }
 0x17a   : > { %1835 = vst [vmem:[%s3155_s22 + $0x2c0] sm:$0xff] %v783_v30  ;;  %1787 = vst [vmem:[%s3155_s22 + $0x140] sm:$0xff] %v751_v31 }
 0x17d   : > { %v784_v32 = vpop.trf.xlu1  ;;  %v752_v33 = vpop.trf.xlu0 }
 0x17e   : > { %1838 = vst [vmem:[%s3155_s22 + $0x2d8] sm:$0xff] %v784_v32  ;;  %1790 = vst [vmem:[%s3155_s22 + $0x158] sm:$0xff] %v752_v33  ;;  %v351_v32 = vld [vmem:[%s3082_s5 + $0x528] sm:$0xff]  ;;  %v350_v33 = vld [vmem:[%s3082_s5 + $0x520] sm:$0xff] }
 0x181   : > { %v785_v36 = vpop.trf.xlu1  ;;  %v753_v37 = vpop.trf.xlu0 }
 0x182   : > { %1841 = vst [vmem:[%s3155_s22 + $0x2f0] sm:$0xff] %v785_v36  ;;  %1793 = vst [vmem:[%s3155_s22 + $0x170] sm:$0xff] %v753_v37  ;;  %946 = vxpose.xlu1.b32.start [1/2] (short) %v317_v34, 128  ;;  %914 = vxpose.xlu0.b32.start [1/2] (short) %v316_v35, 128  ;;  %v355_v36 = vld [vmem:[%s3082_s5 + $0x548] sm:$0xff]  ;;  %v354_v37 = vld [vmem:[%s3082_s5 + $0x540] sm:$0xff] }
 0x185   : > { %v834_v40 = vpop.trf.xlu1  ;;  %v802_v41 = vpop.trf.xlu0 }
 0x186   : > { %1892 = vst [vmem:[%s3155_s22 + $0x488] sm:$0xff] %v834_v40  ;;  %1844 = vst [vmem:[%s3155_s22 + $0x308] sm:$0xff] %v802_v41  ;;  %947 = vxpose.xlu1.b32.end [2/2] (short) %v321_v38, 128  ;;  %915 = vxpose.xlu0.b32.end [2/2] (short) %v320_v39, 128  ;;  %v359_v40 = vld [vmem:[%s3082_s5 + $0x568] sm:$0xff]  ;;  %v358_v41 = vld [vmem:[%s3082_s5 + $0x560] sm:$0xff] }
 0x189   : > { %v835_v42 = vpop.trf.xlu1  ;;  %v803_v43 = vpop.trf.xlu0 }
 0x18a   : > { %1895 = vst [vmem:[%s3155_s22 + $0x4a0] sm:$0xff] %v835_v42  ;;  %1847 = vst [vmem:[%s3155_s22 + $0x320] sm:$0xff] %v803_v43 }
 0x18d   : > { %v836_v44 = vpop.trf.xlu1  ;;  %v804_v45 = vpop.trf.xlu0 }
 0x18e   : > { %1898 = vst [vmem:[%s3155_s22 + $0x4b8] sm:$0xff] %v836_v44  ;;  %1850 = vst [vmem:[%s3155_s22 + $0x338] sm:$0xff] %v804_v45  ;;  %v363_v44 = vld [vmem:[%s3082_s5 + $0x588] sm:$0xff]  ;;  %v362_v45 = vld [vmem:[%s3082_s5 + $0x580] sm:$0xff] }
 0x191   : > { %v837_v46 = vpop.trf.xlu1  ;;  %v805_v47 = vpop.trf.xlu0 }
 0x192   : > { %1901 = vst [vmem:[%s3155_s22 + $0x4d0] sm:$0xff] %v837_v46  ;;  %1853 = vst [vmem:[%s3155_s22 + $0x350] sm:$0xff] %v805_v47 }
 0x195   : > { %v838_v48 = vpop.trf.xlu1  ;;  %v806_v49 = vpop.trf.xlu0 }
 0x196   : > { %1904 = vst [vmem:[%s3155_s22 + $0x4e8] sm:$0xff] %v838_v48  ;;  %1856 = vst [vmem:[%s3155_s22 + $0x368] sm:$0xff] %v806_v49  ;;  %v367_v48 = vld [vmem:[%s3082_s5 + $0x5a8] sm:$0xff]  ;;  %v366_v49 = vld [vmem:[%s3082_s5 + $0x5a0] sm:$0xff] }
 0x199   : > { %v839_v50 = vpop.trf.xlu1  ;;  %v807_v51 = vpop.trf.xlu0 }
 0x19a   : > { %1907 = vst [vmem:[%s3155_s22 + $0x500] sm:$0xff] %v839_v50  ;;  %1859 = vst [vmem:[%s3155_s22 + $0x380] sm:$0xff] %v807_v51 }
 0x19d   : > { %v840_v52 = vpop.trf.xlu1  ;;  %v808_v53 = vpop.trf.xlu0 }
 0x19e   : > { %1910 = vst [vmem:[%s3155_s22 + $0x518] sm:$0xff] %v840_v52  ;;  %1862 = vst [vmem:[%s3155_s22 + $0x398] sm:$0xff] %v808_v53  ;;  %v371_v52 = vld [vmem:[%s3082_s5 + $0x5c8] sm:$0xff]  ;;  %v370_v53 = vld [vmem:[%s3082_s5 + $0x5c0] sm:$0xff] }
 0x1a1   : > { %v841_v54 = vpop.trf.xlu1  ;;  %v809_v55 = vpop.trf.xlu0 }
 0x1a2   : > { %1913 = vst [vmem:[%s3155_s22 + $0x530] sm:$0xff] %v841_v54  ;;  %1865 = vst [vmem:[%s3155_s22 + $0x3b0] sm:$0xff] %v809_v55 }
 0x1a5   : > { %v842_v56 = vpop.trf.xlu1  ;;  %v810_v57 = vpop.trf.xlu0 }
 0x1a6   : > { %1916 = vst [vmem:[%s3155_s22 + $0x548] sm:$0xff] %v842_v56  ;;  %1868 = vst [vmem:[%s3155_s22 + $0x3c8] sm:$0xff] %v810_v57  ;;  %v375_v56 = vld [vmem:[%s3082_s5 + $0x5e8] sm:$0xff]  ;;  %v374_v57 = vld [vmem:[%s3082_s5 + $0x5e0] sm:$0xff] }
 0x1a9   : > { %v843_v58 = vpop.trf.xlu1  ;;  %v811_v59 = vpop.trf.xlu0 }
 0x1aa   : > { %1919 = vst [vmem:[%s3155_s22 + $0x560] sm:$0xff] %v843_v58  ;;  %1871 = vst [vmem:[%s3155_s22 + $0x3e0] sm:$0xff] %v811_v59 }
 0x1ad   : > { %v844_v60 = vpop.trf.xlu1  ;;  %v812_v61 = vpop.trf.xlu0 }
 0x1ae   : > { %1922 = vst [vmem:[%s3155_s22 + $0x578] sm:$0xff] %v844_v60  ;;  %1874 = vst [vmem:[%s3155_s22 + $0x3f8] sm:$0xff] %v812_v61  ;;  %v379_v60 = vld [vmem:[%s3082_s5 + $0x608] sm:$0xff]  ;;  %v378_v61 = vld [vmem:[%s3082_s5 + $0x600] sm:$0xff] }
 0x1b1   : > { %v845_v62 = vpop.trf.xlu1  ;;  %v813_v63 = vpop.trf.xlu0 }
 0x1b2   : > { %1925 = vst [vmem:[%s3155_s22 + $0x590] sm:$0xff] %v845_v62  ;;  %1877 = vst [vmem:[%s3155_s22 + $0x410] sm:$0xff] %v813_v63 }
 0x1b5   : > { %v846_v0 = vpop.trf.xlu1  ;;  %v814_v1 = vpop.trf.xlu0 }
 0x1b6   : > { %1928 = vst [vmem:[%s3155_s22 + $0x5a8] sm:$0xff] %v846_v0  ;;  %1880 = vst [vmem:[%s3155_s22 + $0x428] sm:$0xff] %v814_v1  ;;  %v383_v0 = vld [vmem:[%s3082_s5 + $0x628] sm:$0xff]  ;;  %v382_v1 = vld [vmem:[%s3082_s5 + $0x620] sm:$0xff] }
 0x1b9   : > { %v847_v2 = vpop.trf.xlu1  ;;  %v815_v3 = vpop.trf.xlu0 }
 0x1ba   : > { %1931 = vst [vmem:[%s3155_s22 + $0x5c0] sm:$0xff] %v847_v2  ;;  %1883 = vst [vmem:[%s3155_s22 + $0x440] sm:$0xff] %v815_v3 }
 0x1bd   : > { %v848_v6 = vpop.trf.xlu1  ;;  %v816_v7 = vpop.trf.xlu0 }
 0x1be   : > { %1934 = vst [vmem:[%s3155_s22 + $0x5d8] sm:$0xff] %v848_v6  ;;  %1886 = vst [vmem:[%s3155_s22 + $0x458] sm:$0xff] %v816_v7 }
 0x1bf   : > { %1010 = vxpose.xlu1.b32.start [1/16] %v323_v4, 128  ;;  %978 = vxpose.xlu0.b32.start [1/16] %v322_v5, 128  ;;  %v325_v4 = vld [vmem:[%s3082_s5 + $0x458] sm:$0xff]  ;;  %v324_v5 = vld [vmem:[%s3082_s5 + $0x450] sm:$0xff] }
 0x1c1   : > { %v849_v10 = vpop.trf.xlu1  ;;  %v817_v11 = vpop.trf.xlu0 }
 0x1c2   : > { %1937 = vst [vmem:[%s3155_s22 + $0x5f0] sm:$0xff] %v849_v10  ;;  %1889 = vst [vmem:[%s3155_s22 + $0x470] sm:$0xff] %v817_v11 }
 0x1c3   : > { %1011 = vxpose.xlu1.b32.cont [2/16] %v327_v8, 128  ;;  %979 = vxpose.xlu0.b32.cont [2/16] %v326_v9, 128  ;;  %v329_v8 = vld [vmem:[%s3082_s5 + $0x478] sm:$0xff]  ;;  %v328_v9 = vld [vmem:[%s3082_s5 + $0x470] sm:$0xff] }
 0x1c5   : > { %v898_v14 = vpop.trf.xlu1  ;;  %v866_v15 = vpop.trf.xlu0 }
 0x1c6   : > { %1797 = vst.msk [vmem:[%s3155_s22 + $0x190] sm:$0xff] %vm1748_vm0, %v898_v14  ;;  %1749 = vst.msk [vmem:[%s3155_s22 + $0x10] sm:$0xff] %vm1748_vm0, %v866_v15 }
 0x1c7   : > { %1012 = vxpose.xlu1.b32.cont [3/16] %v331_v12, 128  ;;  %980 = vxpose.xlu0.b32.cont [3/16] %v330_v13, 128  ;;  %v333_v12 = vld [vmem:[%s3082_s5 + $0x498] sm:$0xff]  ;;  %v332_v13 = vld [vmem:[%s3082_s5 + $0x490] sm:$0xff] }
 0x1c9   : > { %v899_v18 = vpop.trf.xlu1  ;;  %v867_v19 = vpop.trf.xlu0 }
 0x1ca   : > { %1800 = vst.msk [vmem:[%s3155_s22 + $0x1a8] sm:$0xff] %vm1748_vm0, %v899_v18  ;;  %1752 = vst.msk [vmem:[%s3155_s22 + $0x28] sm:$0xff] %vm1748_vm0, %v867_v19 }
 0x1cb   : > { %1013 = vxpose.xlu1.b32.cont [4/16] %v335_v16, 128  ;;  %981 = vxpose.xlu0.b32.cont [4/16] %v334_v17, 128  ;;  %v337_v16 = vld [vmem:[%s3082_s5 + $0x4b8] sm:$0xff]  ;;  %v336_v17 = vld [vmem:[%s3082_s5 + $0x4b0] sm:$0xff] }
 0x1cd   : > { %v900_v22 = vpop.trf.xlu1  ;;  %v868_v23 = vpop.trf.xlu0 }
 0x1ce   : > { %1803 = vst.msk [vmem:[%s3155_s22 + $0x1c0] sm:$0xff] %vm1748_vm0, %v900_v22  ;;  %1755 = vst.msk [vmem:[%s3155_s22 + $0x40] sm:$0xff] %vm1748_vm0, %v868_v23 }
 0x1cf   : > { %1014 = vxpose.xlu1.b32.cont [5/16] %v339_v20, 128  ;;  %982 = vxpose.xlu0.b32.cont [5/16] %v338_v21, 128  ;;  %v341_v20 = vld [vmem:[%s3082_s5 + $0x4d8] sm:$0xff]  ;;  %v340_v21 = vld [vmem:[%s3082_s5 + $0x4d0] sm:$0xff] }
 0x1d1   : > { %v901_v26 = vpop.trf.xlu1  ;;  %v869_v27 = vpop.trf.xlu0 }
 0x1d2   : > { %1806 = vst.msk [vmem:[%s3155_s22 + $0x1d8] sm:$0xff] %vm1748_vm0, %v901_v26  ;;  %1758 = vst.msk [vmem:[%s3155_s22 + $0x58] sm:$0xff] %vm1748_vm0, %v869_v27 }
 0x1d3   : > { %1015 = vxpose.xlu1.b32.cont [6/16] %v343_v24, 128  ;;  %983 = vxpose.xlu0.b32.cont [6/16] %v342_v25, 128  ;;  %v345_v24 = vld [vmem:[%s3082_s5 + $0x4f8] sm:$0xff]  ;;  %v344_v25 = vld [vmem:[%s3082_s5 + $0x4f0] sm:$0xff] }
 0x1d5   : > { %v902_v30 = vpop.trf.xlu1  ;;  %v870_v31 = vpop.trf.xlu0 }
 0x1d6   : > { %1809 = vst.msk [vmem:[%s3155_s22 + $0x1f0] sm:$0xff] %vm1748_vm0, %v902_v30  ;;  %1761 = vst.msk [vmem:[%s3155_s22 + $0x70] sm:$0xff] %vm1748_vm0, %v870_v31 }
 0x1d7   : > { %1016 = vxpose.xlu1.b32.cont [7/16] %v347_v28, 128  ;;  %984 = vxpose.xlu0.b32.cont [7/16] %v346_v29, 128  ;;  %v349_v28 = vld [vmem:[%s3082_s5 + $0x518] sm:$0xff]  ;;  %v348_v29 = vld [vmem:[%s3082_s5 + $0x510] sm:$0xff] }
 0x1d9   : > { %v903_v34 = vpop.trf.xlu1  ;;  %v871_v35 = vpop.trf.xlu0 }
 0x1da   : > { %1812 = vst.msk [vmem:[%s3155_s22 + $0x208] sm:$0xff] %vm1748_vm0, %v903_v34  ;;  %1764 = vst.msk [vmem:[%s3155_s22 + $0x88] sm:$0xff] %vm1748_vm0, %v871_v35 }
 0x1db   : > { %1017 = vxpose.xlu1.b32.cont [8/16] %v351_v32, 128  ;;  %985 = vxpose.xlu0.b32.cont [8/16] %v350_v33, 128  ;;  %v353_v32 = vld [vmem:[%s3082_s5 + $0x538] sm:$0xff]  ;;  %v352_v33 = vld [vmem:[%s3082_s5 + $0x530] sm:$0xff] }
 0x1dd   : > { %v904_v38 = vpop.trf.xlu1  ;;  %v872_v39 = vpop.trf.xlu0 }
 0x1de   : > { %1815 = vst.msk [vmem:[%s3155_s22 + $0x220] sm:$0xff] %vm1748_vm0, %v904_v38  ;;  %1767 = vst.msk [vmem:[%s3155_s22 + $0xa0] sm:$0xff] %vm1748_vm0, %v872_v39 }
 0x1df   : > { %1018 = vxpose.xlu1.b32.cont [9/16] %v355_v36, 128  ;;  %986 = vxpose.xlu0.b32.cont [9/16] %v354_v37, 128  ;;  %v357_v36 = vld [vmem:[%s3082_s5 + $0x558] sm:$0xff]  ;;  %v356_v37 = vld [vmem:[%s3082_s5 + $0x550] sm:$0xff] }
 0x1e1   : > { %v905_v42 = vpop.trf.xlu1  ;;  %v873_v43 = vpop.trf.xlu0 }
 0x1e2   : > { %1818 = vst.msk [vmem:[%s3155_s22 + $0x238] sm:$0xff] %vm1748_vm0, %v905_v42  ;;  %1770 = vst.msk [vmem:[%s3155_s22 + $0xb8] sm:$0xff] %vm1748_vm0, %v873_v43 }
 0x1e3   : > { %1019 = vxpose.xlu1.b32.cont [10/16] %v359_v40, 128  ;;  %987 = vxpose.xlu0.b32.cont [10/16] %v358_v41, 128  ;;  %v361_v40 = vld [vmem:[%s3082_s5 + $0x578] sm:$0xff]  ;;  %v360_v41 = vld [vmem:[%s3082_s5 + $0x570] sm:$0xff] }
 0x1e5   : > { %v906_v46 = vpop.trf.xlu1  ;;  %v874_v47 = vpop.trf.xlu0 }
 0x1e6   : > { %1821 = vst.msk [vmem:[%s3155_s22 + $0x250] sm:$0xff] %vm1748_vm0, %v906_v46  ;;  %1773 = vst.msk [vmem:[%s3155_s22 + $0xd0] sm:$0xff] %vm1748_vm0, %v874_v47 }
 0x1e7   : > { %1020 = vxpose.xlu1.b32.cont [11/16] %v363_v44, 128  ;;  %988 = vxpose.xlu0.b32.cont [11/16] %v362_v45, 128  ;;  %v365_v44 = vld [vmem:[%s3082_s5 + $0x598] sm:$0xff]  ;;  %v364_v45 = vld [vmem:[%s3082_s5 + $0x590] sm:$0xff] }
 0x1e9   : > { %v907_v50 = vpop.trf.xlu1  ;;  %v875_v51 = vpop.trf.xlu0 }
 0x1ea   : > { %1824 = vst.msk [vmem:[%s3155_s22 + $0x268] sm:$0xff] %vm1748_vm0, %v907_v50  ;;  %1776 = vst.msk [vmem:[%s3155_s22 + $0xe8] sm:$0xff] %vm1748_vm0, %v875_v51 }
 0x1eb   : > { %1021 = vxpose.xlu1.b32.cont [12/16] %v367_v48, 128  ;;  %989 = vxpose.xlu0.b32.cont [12/16] %v366_v49, 128  ;;  %v369_v48 = vld [vmem:[%s3082_s5 + $0x5b8] sm:$0xff]  ;;  %v368_v49 = vld [vmem:[%s3082_s5 + $0x5b0] sm:$0xff] }
 0x1ed   : > { %v908_v54 = vpop.trf.xlu1  ;;  %v876_v55 = vpop.trf.xlu0 }
 0x1ee   : > { %1827 = vst.msk [vmem:[%s3155_s22 + $0x280] sm:$0xff] %vm1748_vm0, %v908_v54  ;;  %1779 = vst.msk [vmem:[%s3155_s22 + $0x100] sm:$0xff] %vm1748_vm0, %v876_v55 }
 0x1ef   : > { %1022 = vxpose.xlu1.b32.cont [13/16] %v371_v52, 128  ;;  %990 = vxpose.xlu0.b32.cont [13/16] %v370_v53, 128  ;;  %v373_v52 = vld [vmem:[%s3082_s5 + $0x5d8] sm:$0xff]  ;;  %v372_v53 = vld [vmem:[%s3082_s5 + $0x5d0] sm:$0xff] }
 0x1f1   : > { %v909_v58 = vpop.trf.xlu1  ;;  %v877_v59 = vpop.trf.xlu0 }
 0x1f2   : > { %1830 = vst.msk [vmem:[%s3155_s22 + $0x298] sm:$0xff] %vm1748_vm0, %v909_v58  ;;  %1782 = vst.msk [vmem:[%s3155_s22 + $0x118] sm:$0xff] %vm1748_vm0, %v877_v59 }
 0x1f3   : > { %1023 = vxpose.xlu1.b32.cont [14/16] %v375_v56, 128  ;;  %991 = vxpose.xlu0.b32.cont [14/16] %v374_v57, 128  ;;  %v377_v56 = vld [vmem:[%s3082_s5 + $0x5f8] sm:$0xff]  ;;  %v376_v57 = vld [vmem:[%s3082_s5 + $0x5f0] sm:$0xff] }
 0x1f5   : > { %v910_v62 = vpop.trf.xlu1  ;;  %v878_v63 = vpop.trf.xlu0 }
 0x1f6   : > { %1833 = vst.msk [vmem:[%s3155_s22 + $0x2b0] sm:$0xff] %vm1748_vm0, %v910_v62  ;;  %1785 = vst.msk [vmem:[%s3155_s22 + $0x130] sm:$0xff] %vm1748_vm0, %v878_v63 }
 0x1f7   : > { %1024 = vxpose.xlu1.b32.cont [15/16] %v379_v60, 128  ;;  %992 = vxpose.xlu0.b32.cont [15/16] %v378_v61, 128  ;;  %v381_v60 = vld [vmem:[%s3082_s5 + $0x618] sm:$0xff]  ;;  %v380_v61 = vld [vmem:[%s3082_s5 + $0x610] sm:$0xff] }
 0x1f9   : > { %v911_v2 = vpop.trf.xlu1  ;;  %v879_v3 = vpop.trf.xlu0 }
 0x1fa   : > { %1836 = vst.msk [vmem:[%s3155_s22 + $0x2c8] sm:$0xff] %vm1748_vm0, %v911_v2  ;;  %1788 = vst.msk [vmem:[%s3155_s22 + $0x148] sm:$0xff] %vm1748_vm0, %v879_v3 }
 0x1fb   : > { %1025 = vxpose.xlu1.b32.end [16/16] %v383_v0, 128  ;;  %993 = vxpose.xlu0.b32.end [16/16] %v382_v1, 128  ;;  %v385_v0 = vld [vmem:[%s3082_s5 + $0x638] sm:$0xff]  ;;  %v384_v1 = vld [vmem:[%s3082_s5 + $0x630] sm:$0xff] }
 0x1fd   : > { %v912_v6 = vpop.trf.xlu1  ;;  %v880_v7 = vpop.trf.xlu0 }
 0x1fe   : > { %1839 = vst.msk [vmem:[%s3155_s22 + $0x2e0] sm:$0xff] %vm1748_vm0, %v912_v6  ;;  %1791 = vst.msk [vmem:[%s3155_s22 + $0x160] sm:$0xff] %vm1748_vm0, %v880_v7 }
 0x1ff   : > { %1074 = vxpose.xlu1.b32.start [1/16] %v325_v4, 128  ;;  %1042 = vxpose.xlu0.b32.start [1/16] %v324_v5, 128  ;;  %v387_v4 = vld [vmem:[%s3082_s5 + $0x648] sm:$0xff]  ;;  %v386_v5 = vld [vmem:[%s3082_s5 + $0x640] sm:$0xff] }
 0x201   : > { %v913_v10 = vpop.trf.xlu1  ;;  %v881_v11 = vpop.trf.xlu0 }
 0x202   : > { %1842 = vst.msk [vmem:[%s3155_s22 + $0x2f8] sm:$0xff] %vm1748_vm0, %v913_v10  ;;  %1794 = vst.msk [vmem:[%s3155_s22 + $0x178] sm:$0xff] %vm1748_vm0, %v881_v11 }
 0x203   : > { %1075 = vxpose.xlu1.b32.cont [2/16] %v329_v8, 128  ;;  %1043 = vxpose.xlu0.b32.cont [2/16] %v328_v9, 128  ;;  %v391_v8 = vld [vmem:[%s3082_s5 + $0x668] sm:$0xff]  ;;  %v390_v9 = vld [vmem:[%s3082_s5 + $0x660] sm:$0xff] }
 0x205   : > { %v962_v14 = vpop.trf.xlu1  ;;  %v930_v15 = vpop.trf.xlu0 }
 0x206   : > { %1893 = vst.msk [vmem:[%s3155_s22 + $0x490] sm:$0xff] %vm1748_vm0, %v962_v14  ;;  %1845 = vst.msk [vmem:[%s3155_s22 + $0x310] sm:$0xff] %vm1748_vm0, %v930_v15 }
 0x207   : > { %1076 = vxpose.xlu1.b32.cont [3/16] %v333_v12, 128  ;;  %1044 = vxpose.xlu0.b32.cont [3/16] %v332_v13, 128  ;;  %v395_v12 = vld [vmem:[%s3082_s5 + $0x688] sm:$0xff]  ;;  %v394_v13 = vld [vmem:[%s3082_s5 + $0x680] sm:$0xff] }
 0x209   : > { %v963_v18 = vpop.trf.xlu1  ;;  %v931_v19 = vpop.trf.xlu0 }
 0x20a   : > { %1896 = vst.msk [vmem:[%s3155_s22 + $0x4a8] sm:$0xff] %vm1748_vm0, %v963_v18  ;;  %1848 = vst.msk [vmem:[%s3155_s22 + $0x328] sm:$0xff] %vm1748_vm0, %v931_v19 }
 0x20b   : > { %1077 = vxpose.xlu1.b32.cont [4/16] %v337_v16, 128  ;;  %1045 = vxpose.xlu0.b32.cont [4/16] %v336_v17, 128  ;;  %v399_v16 = vld [vmem:[%s3082_s5 + $0x6a8] sm:$0xff]  ;;  %v398_v17 = vld [vmem:[%s3082_s5 + $0x6a0] sm:$0xff] }
 0x20d   : > { %v964_v22 = vpop.trf.xlu1  ;;  %v932_v23 = vpop.trf.xlu0 }
 0x20e   : > { %1899 = vst.msk [vmem:[%s3155_s22 + $0x4c0] sm:$0xff] %vm1748_vm0, %v964_v22  ;;  %1851 = vst.msk [vmem:[%s3155_s22 + $0x340] sm:$0xff] %vm1748_vm0, %v932_v23 }
 0x20f   : > { %1078 = vxpose.xlu1.b32.cont [5/16] %v341_v20, 128  ;;  %1046 = vxpose.xlu0.b32.cont [5/16] %v340_v21, 128  ;;  %v403_v20 = vld [vmem:[%s3082_s5 + $0x6c8] sm:$0xff]  ;;  %v402_v21 = vld [vmem:[%s3082_s5 + $0x6c0] sm:$0xff] }
 0x211   : > { %v965_v26 = vpop.trf.xlu1  ;;  %v933_v27 = vpop.trf.xlu0 }
 0x212   : > { %1902 = vst.msk [vmem:[%s3155_s22 + $0x4d8] sm:$0xff] %vm1748_vm0, %v965_v26  ;;  %1854 = vst.msk [vmem:[%s3155_s22 + $0x358] sm:$0xff] %vm1748_vm0, %v933_v27 }
 0x213   : > { %1079 = vxpose.xlu1.b32.cont [6/16] %v345_v24, 128  ;;  %1047 = vxpose.xlu0.b32.cont [6/16] %v344_v25, 128  ;;  %v407_v24 = vld [vmem:[%s3082_s5 + $0x6e8] sm:$0xff]  ;;  %v406_v25 = vld [vmem:[%s3082_s5 + $0x6e0] sm:$0xff] }
 0x215   : > { %v966_v30 = vpop.trf.xlu1  ;;  %v934_v31 = vpop.trf.xlu0 }
 0x216   : > { %1905 = vst.msk [vmem:[%s3155_s22 + $0x4f0] sm:$0xff] %vm1748_vm0, %v966_v30  ;;  %1857 = vst.msk [vmem:[%s3155_s22 + $0x370] sm:$0xff] %vm1748_vm0, %v934_v31 }
 0x217   : > { %1080 = vxpose.xlu1.b32.cont [7/16] %v349_v28, 128  ;;  %1048 = vxpose.xlu0.b32.cont [7/16] %v348_v29, 128  ;;  %v411_v28 = vld [vmem:[%s3082_s5 + $0x708] sm:$0xff]  ;;  %v410_v29 = vld [vmem:[%s3082_s5 + $0x700] sm:$0xff] }
 0x219   : > { %v967_v34 = vpop.trf.xlu1  ;;  %v935_v35 = vpop.trf.xlu0 }
 0x21a   : > { %1908 = vst.msk [vmem:[%s3155_s22 + $0x508] sm:$0xff] %vm1748_vm0, %v967_v34  ;;  %1860 = vst.msk [vmem:[%s3155_s22 + $0x388] sm:$0xff] %vm1748_vm0, %v935_v35 }
 0x21b   : > { %1081 = vxpose.xlu1.b32.cont [8/16] %v353_v32, 128  ;;  %1049 = vxpose.xlu0.b32.cont [8/16] %v352_v33, 128  ;;  %v415_v32 = vld [vmem:[%s3082_s5 + $0x728] sm:$0xff]  ;;  %v414_v33 = vld [vmem:[%s3082_s5 + $0x720] sm:$0xff] }
 0x21d   : > { %v968_v38 = vpop.trf.xlu1  ;;  %v936_v39 = vpop.trf.xlu0 }
 0x21e   : > { %1911 = vst.msk [vmem:[%s3155_s22 + $0x520] sm:$0xff] %vm1748_vm0, %v968_v38  ;;  %1863 = vst.msk [vmem:[%s3155_s22 + $0x3a0] sm:$0xff] %vm1748_vm0, %v936_v39 }
 0x21f   : > { %1082 = vxpose.xlu1.b32.cont [9/16] %v357_v36, 128  ;;  %1050 = vxpose.xlu0.b32.cont [9/16] %v356_v37, 128  ;;  %v419_v36 = vld [vmem:[%s3082_s5 + $0x748] sm:$0xff]  ;;  %v418_v37 = vld [vmem:[%s3082_s5 + $0x740] sm:$0xff] }
 0x221   : > { %v969_v42 = vpop.trf.xlu1  ;;  %v937_v43 = vpop.trf.xlu0 }
 0x222   : > { %1914 = vst.msk [vmem:[%s3155_s22 + $0x538] sm:$0xff] %vm1748_vm0, %v969_v42  ;;  %1866 = vst.msk [vmem:[%s3155_s22 + $0x3b8] sm:$0xff] %vm1748_vm0, %v937_v43 }
 0x223   : > { %1083 = vxpose.xlu1.b32.cont [10/16] %v361_v40, 128  ;;  %1051 = vxpose.xlu0.b32.cont [10/16] %v360_v41, 128  ;;  %v423_v40 = vld [vmem:[%s3082_s5 + $0x768] sm:$0xff]  ;;  %v422_v41 = vld [vmem:[%s3082_s5 + $0x760] sm:$0xff] }
 0x225   : > { %v970_v46 = vpop.trf.xlu1  ;;  %v938_v47 = vpop.trf.xlu0 }
 0x226   : > { %1917 = vst.msk [vmem:[%s3155_s22 + $0x550] sm:$0xff] %vm1748_vm0, %v970_v46  ;;  %1869 = vst.msk [vmem:[%s3155_s22 + $0x3d0] sm:$0xff] %vm1748_vm0, %v938_v47 }
 0x227   : > { %1084 = vxpose.xlu1.b32.cont [11/16] %v365_v44, 128  ;;  %1052 = vxpose.xlu0.b32.cont [11/16] %v364_v45, 128  ;;  %v427_v44 = vld [vmem:[%s3082_s5 + $0x788] sm:$0xff]  ;;  %v426_v45 = vld [vmem:[%s3082_s5 + $0x780] sm:$0xff] }
 0x229   : > { %v971_v50 = vpop.trf.xlu1  ;;  %v939_v51 = vpop.trf.xlu0 }
 0x22a   : > { %1920 = vst.msk [vmem:[%s3155_s22 + $0x568] sm:$0xff] %vm1748_vm0, %v971_v50  ;;  %1872 = vst.msk [vmem:[%s3155_s22 + $0x3e8] sm:$0xff] %vm1748_vm0, %v939_v51 }
 0x22b   : > { %1085 = vxpose.xlu1.b32.cont [12/16] %v369_v48, 128  ;;  %1053 = vxpose.xlu0.b32.cont [12/16] %v368_v49, 128  ;;  %v431_v48 = vld [vmem:[%s3082_s5 + $0x7a8] sm:$0xff]  ;;  %v430_v49 = vld [vmem:[%s3082_s5 + $0x7a0] sm:$0xff] }
 0x22d   : > { %v972_v54 = vpop.trf.xlu1  ;;  %v940_v55 = vpop.trf.xlu0 }
 0x22e   : > { %1923 = vst.msk [vmem:[%s3155_s22 + $0x580] sm:$0xff] %vm1748_vm0, %v972_v54  ;;  %1875 = vst.msk [vmem:[%s3155_s22 + $0x400] sm:$0xff] %vm1748_vm0, %v940_v55 }
 0x22f   : > { %1086 = vxpose.xlu1.b32.cont [13/16] %v373_v52, 128  ;;  %1054 = vxpose.xlu0.b32.cont [13/16] %v372_v53, 128  ;;  %v435_v52 = vld [vmem:[%s3082_s5 + $0x7c8] sm:$0xff]  ;;  %v434_v53 = vld [vmem:[%s3082_s5 + $0x7c0] sm:$0xff] }
 0x231   : > { %v973_v58 = vpop.trf.xlu1  ;;  %v941_v59 = vpop.trf.xlu0 }
 0x232   : > { %1926 = vst.msk [vmem:[%s3155_s22 + $0x598] sm:$0xff] %vm1748_vm0, %v973_v58  ;;  %1878 = vst.msk [vmem:[%s3155_s22 + $0x418] sm:$0xff] %vm1748_vm0, %v941_v59 }
 0x233   : > { %1087 = vxpose.xlu1.b32.cont [14/16] %v377_v56, 128  ;;  %1055 = vxpose.xlu0.b32.cont [14/16] %v376_v57, 128  ;;  %v439_v56 = vld [vmem:[%s3082_s5 + $0x7e8] sm:$0xff]  ;;  %v438_v57 = vld [vmem:[%s3082_s5 + $0x7e0] sm:$0xff] }
 0x235   : > { %v974_v62 = vpop.trf.xlu1  ;;  %v942_v63 = vpop.trf.xlu0 }
 0x236   : > { %1929 = vst.msk [vmem:[%s3155_s22 + $0x5b0] sm:$0xff] %vm1748_vm0, %v974_v62  ;;  %1881 = vst.msk [vmem:[%s3155_s22 + $0x430] sm:$0xff] %vm1748_vm0, %v942_v63 }
 0x237   : > { %1088 = vxpose.xlu1.b32.cont [15/16] %v381_v60, 128  ;;  %1056 = vxpose.xlu0.b32.cont [15/16] %v380_v61, 128  ;;  %v443_v60 = vld [vmem:[%s3082_s5 + $0x808] sm:$0xff]  ;;  %v442_v61 = vld [vmem:[%s3082_s5 + $0x800] sm:$0xff] }
 0x239   : > { %v975_v2 = vpop.trf.xlu1  ;;  %v943_v3 = vpop.trf.xlu0 }
 0x23a   : > { %1932 = vst.msk [vmem:[%s3155_s22 + $0x5c8] sm:$0xff] %vm1748_vm0, %v975_v2  ;;  %1884 = vst.msk [vmem:[%s3155_s22 + $0x448] sm:$0xff] %vm1748_vm0, %v943_v3 }
 0x23b   : > { %1089 = vxpose.xlu1.b32.end [16/16] %v385_v0, 128  ;;  %1057 = vxpose.xlu0.b32.end [16/16] %v384_v1, 128  ;;  %v447_v0 = vld [vmem:[%s3082_s5 + $0x828] sm:$0xff]  ;;  %v446_v1 = vld [vmem:[%s3082_s5 + $0x820] sm:$0xff] }
 0x23d   : > { %v976_v6 = vpop.trf.xlu1  ;;  %v944_v7 = vpop.trf.xlu0 }
 0x23e   : > { %1935 = vst.msk [vmem:[%s3155_s22 + $0x5e0] sm:$0xff] %vm1748_vm0, %v976_v6  ;;  %1887 = vst.msk [vmem:[%s3155_s22 + $0x460] sm:$0xff] %vm1748_vm0, %v944_v7 }
 0x23f   : > { %1138 = vxpose.xlu1.b32.start [1/16] %v387_v4, 128  ;;  %1106 = vxpose.xlu0.b32.start [1/16] %v386_v5, 128  ;;  %v389_v4 = vld [vmem:[%s3082_s5 + $0x658] sm:$0xff]  ;;  %v388_v5 = vld [vmem:[%s3082_s5 + $0x650] sm:$0xff] }
 0x241   : > { %v977_v10 = vpop.trf.xlu1  ;;  %v945_v11 = vpop.trf.xlu0 }
 0x242   : > { %1938 = vst.msk [vmem:[%s3155_s22 + $0x5f8] sm:$0xff] %vm1748_vm0, %v977_v10  ;;  %1890 = vst.msk [vmem:[%s3155_s22 + $0x478] sm:$0xff] %vm1748_vm0, %v945_v11 }
 0x243   : > { %1139 = vxpose.xlu1.b32.cont [2/16] %v391_v8, 128  ;;  %1107 = vxpose.xlu0.b32.cont [2/16] %v390_v9, 128  ;;  %v393_v8 = vld [vmem:[%s3082_s5 + $0x678] sm:$0xff]  ;;  %v392_v9 = vld [vmem:[%s3082_s5 + $0x670] sm:$0xff] }
 0x245   : > { %v1026_v14 = vpop.trf.xlu1  ;;  %v994_v15 = vpop.trf.xlu0 }
 0x246   : > { %1987 = vst [vmem:[%s3155_s22 + $0x780] sm:$0xff] %v1026_v14  ;;  %1939 = vst [vmem:[%s3155_s22 + $0x600] sm:$0xff] %v994_v15 }
 0x247   : > { %1140 = vxpose.xlu1.b32.cont [3/16] %v395_v12, 128  ;;  %1108 = vxpose.xlu0.b32.cont [3/16] %v394_v13, 128  ;;  %v397_v12 = vld [vmem:[%s3082_s5 + $0x698] sm:$0xff]  ;;  %v396_v13 = vld [vmem:[%s3082_s5 + $0x690] sm:$0xff] }
 0x249   : > { %v1027_v18 = vpop.trf.xlu1  ;;  %v995_v19 = vpop.trf.xlu0 }
 0x24a   : > { %1990 = vst [vmem:[%s3155_s22 + $0x798] sm:$0xff] %v1027_v18  ;;  %1942 = vst [vmem:[%s3155_s22 + $0x618] sm:$0xff] %v995_v19 }
 0x24b   : > { %1141 = vxpose.xlu1.b32.cont [4/16] %v399_v16, 128  ;;  %1109 = vxpose.xlu0.b32.cont [4/16] %v398_v17, 128  ;;  %v401_v16 = vld [vmem:[%s3082_s5 + $0x6b8] sm:$0xff]  ;;  %v400_v17 = vld [vmem:[%s3082_s5 + $0x6b0] sm:$0xff] }
 0x24d   : > { %v1028_v22 = vpop.trf.xlu1  ;;  %v996_v23 = vpop.trf.xlu0 }
 0x24e   : > { %1993 = vst [vmem:[%s3155_s22 + $0x7b0] sm:$0xff] %v1028_v22  ;;  %1945 = vst [vmem:[%s3155_s22 + $0x630] sm:$0xff] %v996_v23 }
 0x24f   : > { %1142 = vxpose.xlu1.b32.cont [5/16] %v403_v20, 128  ;;  %1110 = vxpose.xlu0.b32.cont [5/16] %v402_v21, 128  ;;  %v405_v20 = vld [vmem:[%s3082_s5 + $0x6d8] sm:$0xff]  ;;  %v404_v21 = vld [vmem:[%s3082_s5 + $0x6d0] sm:$0xff] }
 0x251   : > { %v1029_v26 = vpop.trf.xlu1  ;;  %v997_v27 = vpop.trf.xlu0 }
 0x252   : > { %1996 = vst [vmem:[%s3155_s22 + $0x7c8] sm:$0xff] %v1029_v26  ;;  %1948 = vst [vmem:[%s3155_s22 + $0x648] sm:$0xff] %v997_v27 }
 0x253   : > { %1143 = vxpose.xlu1.b32.cont [6/16] %v407_v24, 128  ;;  %1111 = vxpose.xlu0.b32.cont [6/16] %v406_v25, 128  ;;  %v409_v24 = vld [vmem:[%s3082_s5 + $0x6f8] sm:$0xff]  ;;  %v408_v25 = vld [vmem:[%s3082_s5 + $0x6f0] sm:$0xff] }
 0x255   : > { %v1030_v30 = vpop.trf.xlu1  ;;  %v998_v31 = vpop.trf.xlu0 }
 0x256   : > { %1999 = vst [vmem:[%s3155_s22 + $0x7e0] sm:$0xff] %v1030_v30  ;;  %1951 = vst [vmem:[%s3155_s22 + $0x660] sm:$0xff] %v998_v31 }
 0x257   : > { %1144 = vxpose.xlu1.b32.cont [7/16] %v411_v28, 128  ;;  %1112 = vxpose.xlu0.b32.cont [7/16] %v410_v29, 128  ;;  %v413_v28 = vld [vmem:[%s3082_s5 + $0x718] sm:$0xff]  ;;  %v412_v29 = vld [vmem:[%s3082_s5 + $0x710] sm:$0xff] }
 0x259   : > { %v1031_v34 = vpop.trf.xlu1  ;;  %v999_v35 = vpop.trf.xlu0 }
 0x25a   : > { %2002 = vst [vmem:[%s3155_s22 + $0x7f8] sm:$0xff] %v1031_v34  ;;  %1954 = vst [vmem:[%s3155_s22 + $0x678] sm:$0xff] %v999_v35 }
 0x25b   : > { %1145 = vxpose.xlu1.b32.cont [8/16] %v415_v32, 128  ;;  %1113 = vxpose.xlu0.b32.cont [8/16] %v414_v33, 128  ;;  %v417_v32 = vld [vmem:[%s3082_s5 + $0x738] sm:$0xff]  ;;  %v416_v33 = vld [vmem:[%s3082_s5 + $0x730] sm:$0xff] }
 0x25d   : > { %v1032_v38 = vpop.trf.xlu1  ;;  %v1000_v39 = vpop.trf.xlu0 }
 0x25e   : > { %2005 = vst [vmem:[%s3155_s22 + $0x810] sm:$0xff] %v1032_v38  ;;  %1957 = vst [vmem:[%s3155_s22 + $0x690] sm:$0xff] %v1000_v39 }
 0x25f   : > { %1146 = vxpose.xlu1.b32.cont [9/16] %v419_v36, 128  ;;  %1114 = vxpose.xlu0.b32.cont [9/16] %v418_v37, 128  ;;  %v421_v36 = vld [vmem:[%s3082_s5 + $0x758] sm:$0xff]  ;;  %v420_v37 = vld [vmem:[%s3082_s5 + $0x750] sm:$0xff] }
 0x261   : > { %v1033_v42 = vpop.trf.xlu1  ;;  %v1001_v43 = vpop.trf.xlu0 }
 0x262   : > { %2008 = vst [vmem:[%s3155_s22 + $0x828] sm:$0xff] %v1033_v42  ;;  %1960 = vst [vmem:[%s3155_s22 + $0x6a8] sm:$0xff] %v1001_v43 }
 0x263   : > { %1147 = vxpose.xlu1.b32.cont [10/16] %v423_v40, 128  ;;  %1115 = vxpose.xlu0.b32.cont [10/16] %v422_v41, 128  ;;  %v425_v40 = vld [vmem:[%s3082_s5 + $0x778] sm:$0xff]  ;;  %v424_v41 = vld [vmem:[%s3082_s5 + $0x770] sm:$0xff] }
 0x265   : > { %v1034_v46 = vpop.trf.xlu1  ;;  %v1002_v47 = vpop.trf.xlu0 }
 0x266   : > { %2011 = vst [vmem:[%s3155_s22 + $0x840] sm:$0xff] %v1034_v46  ;;  %1963 = vst [vmem:[%s3155_s22 + $0x6c0] sm:$0xff] %v1002_v47 }
 0x267   : > { %1148 = vxpose.xlu1.b32.cont [11/16] %v427_v44, 128  ;;  %1116 = vxpose.xlu0.b32.cont [11/16] %v426_v45, 128  ;;  %v429_v44 = vld [vmem:[%s3082_s5 + $0x798] sm:$0xff]  ;;  %v428_v45 = vld [vmem:[%s3082_s5 + $0x790] sm:$0xff] }
 0x269   : > { %v1035_v50 = vpop.trf.xlu1  ;;  %v1003_v51 = vpop.trf.xlu0 }
 0x26a   : > { %2014 = vst [vmem:[%s3155_s22 + $0x858] sm:$0xff] %v1035_v50  ;;  %1966 = vst [vmem:[%s3155_s22 + $0x6d8] sm:$0xff] %v1003_v51 }
 0x26b   : > { %1149 = vxpose.xlu1.b32.cont [12/16] %v431_v48, 128  ;;  %1117 = vxpose.xlu0.b32.cont [12/16] %v430_v49, 128  ;;  %v433_v48 = vld [vmem:[%s3082_s5 + $0x7b8] sm:$0xff]  ;;  %v432_v49 = vld [vmem:[%s3082_s5 + $0x7b0] sm:$0xff] }
 0x26d   : > { %v1036_v54 = vpop.trf.xlu1  ;;  %v1004_v55 = vpop.trf.xlu0 }
 0x26e   : > { %2017 = vst [vmem:[%s3155_s22 + $0x870] sm:$0xff] %v1036_v54  ;;  %1969 = vst [vmem:[%s3155_s22 + $0x6f0] sm:$0xff] %v1004_v55 }
 0x26f   : > { %1150 = vxpose.xlu1.b32.cont [13/16] %v435_v52, 128  ;;  %1118 = vxpose.xlu0.b32.cont [13/16] %v434_v53, 128  ;;  %v437_v52 = vld [vmem:[%s3082_s5 + $0x7d8] sm:$0xff]  ;;  %v436_v53 = vld [vmem:[%s3082_s5 + $0x7d0] sm:$0xff] }
 0x271   : > { %v1037_v58 = vpop.trf.xlu1  ;;  %v1005_v59 = vpop.trf.xlu0 }
 0x272   : > { %2020 = vst [vmem:[%s3155_s22 + $0x888] sm:$0xff] %v1037_v58  ;;  %1972 = vst [vmem:[%s3155_s22 + $0x708] sm:$0xff] %v1005_v59 }
 0x273   : > { %1151 = vxpose.xlu1.b32.cont [14/16] %v439_v56, 128  ;;  %1119 = vxpose.xlu0.b32.cont [14/16] %v438_v57, 128  ;;  %v441_v56 = vld [vmem:[%s3082_s5 + $0x7f8] sm:$0xff]  ;;  %v440_v57 = vld [vmem:[%s3082_s5 + $0x7f0] sm:$0xff] }
 0x275   : > { %v1038_v62 = vpop.trf.xlu1  ;;  %v1006_v63 = vpop.trf.xlu0 }
 0x276   : > { %2023 = vst [vmem:[%s3155_s22 + $0x8a0] sm:$0xff] %v1038_v62  ;;  %1975 = vst [vmem:[%s3155_s22 + $0x720] sm:$0xff] %v1006_v63 }
 0x277   : > { %1152 = vxpose.xlu1.b32.cont [15/16] %v443_v60, 128  ;;  %1120 = vxpose.xlu0.b32.cont [15/16] %v442_v61, 128  ;;  %v445_v60 = vld [vmem:[%s3082_s5 + $0x818] sm:$0xff]  ;;  %v444_v61 = vld [vmem:[%s3082_s5 + $0x810] sm:$0xff] }
 0x279   : > { %v1039_v2 = vpop.trf.xlu1  ;;  %v1007_v3 = vpop.trf.xlu0 }
 0x27a   : > { %2026 = vst [vmem:[%s3155_s22 + $0x8b8] sm:$0xff] %v1039_v2  ;;  %1978 = vst [vmem:[%s3155_s22 + $0x738] sm:$0xff] %v1007_v3 }
 0x27b   : > { %1153 = vxpose.xlu1.b32.end [16/16] %v447_v0, 128  ;;  %1121 = vxpose.xlu0.b32.end [16/16] %v446_v1, 128  ;;  %v449_v0 = vld [vmem:[%s3082_s5 + $0x838] sm:$0xff]  ;;  %v448_v1 = vld [vmem:[%s3082_s5 + $0x830] sm:$0xff] }
 0x27d   : > { %v1040_v6 = vpop.trf.xlu1  ;;  %v1008_v7 = vpop.trf.xlu0 }
 0x27e   : > { %2029 = vst [vmem:[%s3155_s22 + $0x8d0] sm:$0xff] %v1040_v6  ;;  %1981 = vst [vmem:[%s3155_s22 + $0x750] sm:$0xff] %v1008_v7 }
 0x27f   : > { %1202 = vxpose.xlu1.b32.start [1/16] %v389_v4, 128  ;;  %1170 = vxpose.xlu0.b32.start [1/16] %v388_v5, 128  ;;  %v451_v4 = vld [vmem:[%s3082_s5 + $0x848] sm:$0xff]  ;;  %v450_v5 = vld [vmem:[%s3082_s5 + $0x840] sm:$0xff] }
 0x281   : > { %v1041_v10 = vpop.trf.xlu1  ;;  %v1009_v11 = vpop.trf.xlu0 }
 0x282   : > { %2032 = vst [vmem:[%s3155_s22 + $0x8e8] sm:$0xff] %v1041_v10  ;;  %1984 = vst [vmem:[%s3155_s22 + $0x768] sm:$0xff] %v1009_v11 }
 0x283   : > { %1203 = vxpose.xlu1.b32.cont [2/16] %v393_v8, 128  ;;  %1171 = vxpose.xlu0.b32.cont [2/16] %v392_v9, 128  ;;  %v455_v8 = vld [vmem:[%s3082_s5 + $0x868] sm:$0xff]  ;;  %v454_v9 = vld [vmem:[%s3082_s5 + $0x860] sm:$0xff] }
 0x285   : > { %v1090_v14 = vpop.trf.xlu1  ;;  %v1058_v15 = vpop.trf.xlu0 }
 0x286   : > { %2083 = vst [vmem:[%s3155_s22 + $0xa80] sm:$0xff] %v1090_v14  ;;  %2035 = vst [vmem:[%s3155_s22 + $0x900] sm:$0xff] %v1058_v15 }
 0x287   : > { %1204 = vxpose.xlu1.b32.cont [3/16] %v397_v12, 128  ;;  %1172 = vxpose.xlu0.b32.cont [3/16] %v396_v13, 128 }
 0x289   : > { %v1091_v18 = vpop.trf.xlu1  ;;  %v1059_v19 = vpop.trf.xlu0 }
 0x28a   : > { %2086 = vst [vmem:[%s3155_s22 + $0xa98] sm:$0xff] %v1091_v18  ;;  %2038 = vst [vmem:[%s3155_s22 + $0x918] sm:$0xff] %v1059_v19 }
 0x28b   : > { %1205 = vxpose.xlu1.b32.cont [4/16] %v401_v16, 128  ;;  %1173 = vxpose.xlu0.b32.cont [4/16] %v400_v17, 128 }
 0x28d   : > { %v1092_v22 = vpop.trf.xlu1  ;;  %v1060_v23 = vpop.trf.xlu0 }
 0x28e   : > { %2089 = vst [vmem:[%s3155_s22 + $0xab0] sm:$0xff] %v1092_v22  ;;  %2041 = vst [vmem:[%s3155_s22 + $0x930] sm:$0xff] %v1060_v23 }
 0x28f   : > { %1206 = vxpose.xlu1.b32.cont [5/16] %v405_v20, 128  ;;  %1174 = vxpose.xlu0.b32.cont [5/16] %v404_v21, 128 }
 0x291   : > { %v1093_v26 = vpop.trf.xlu1  ;;  %v1061_v27 = vpop.trf.xlu0 }
 0x292   : > { %2092 = vst [vmem:[%s3155_s22 + $0xac8] sm:$0xff] %v1093_v26  ;;  %2044 = vst [vmem:[%s3155_s22 + $0x948] sm:$0xff] %v1061_v27 }
 0x293   : > { %1207 = vxpose.xlu1.b32.cont [6/16] %v409_v24, 128  ;;  %1175 = vxpose.xlu0.b32.cont [6/16] %v408_v25, 128 }
 0x295   : > { %v1094_v30 = vpop.trf.xlu1  ;;  %v1062_v31 = vpop.trf.xlu0 }
 0x296   : > { %2095 = vst [vmem:[%s3155_s22 + $0xae0] sm:$0xff] %v1094_v30  ;;  %2047 = vst [vmem:[%s3155_s22 + $0x960] sm:$0xff] %v1062_v31 }
 0x297   : > { %1208 = vxpose.xlu1.b32.cont [7/16] %v413_v28, 128  ;;  %1176 = vxpose.xlu0.b32.cont [7/16] %v412_v29, 128 }
 0x299   : > { %v1095_v34 = vpop.trf.xlu1  ;;  %v1063_v35 = vpop.trf.xlu0 }
 0x29a   : > { %2098 = vst [vmem:[%s3155_s22 + $0xaf8] sm:$0xff] %v1095_v34  ;;  %2050 = vst [vmem:[%s3155_s22 + $0x978] sm:$0xff] %v1063_v35 }
 0x29b   : > { %1209 = vxpose.xlu1.b32.cont [8/16] %v417_v32, 128  ;;  %1177 = vxpose.xlu0.b32.cont [8/16] %v416_v33, 128 }
 0x29d   : > { %v1096_v38 = vpop.trf.xlu1  ;;  %v1064_v39 = vpop.trf.xlu0 }
 0x29e   : > { %2101 = vst [vmem:[%s3155_s22 + $0xb10] sm:$0xff] %v1096_v38  ;;  %2053 = vst [vmem:[%s3155_s22 + $0x990] sm:$0xff] %v1064_v39 }
 0x29f   : > { %1210 = vxpose.xlu1.b32.cont [9/16] %v421_v36, 128  ;;  %1178 = vxpose.xlu0.b32.cont [9/16] %v420_v37, 128 }
 0x2a1   : > { %v1097_v42 = vpop.trf.xlu1  ;;  %v1065_v43 = vpop.trf.xlu0 }
 0x2a2   : > { %2104 = vst [vmem:[%s3155_s22 + $0xb28] sm:$0xff] %v1097_v42  ;;  %2056 = vst [vmem:[%s3155_s22 + $0x9a8] sm:$0xff] %v1065_v43 }
 0x2a3   : > { %1211 = vxpose.xlu1.b32.cont [10/16] %v425_v40, 128  ;;  %1179 = vxpose.xlu0.b32.cont [10/16] %v424_v41, 128  ;;  %v453_v40 = vld [vmem:[%s3082_s5 + $0x858] sm:$0xff]  ;;  %v452_v41 = vld [vmem:[%s3082_s5 + $0x850] sm:$0xff] }
 0x2a5   : > { %v1098_v46 = vpop.trf.xlu1  ;;  %v1066_v47 = vpop.trf.xlu0 }
 0x2a6   : > { %2107 = vst [vmem:[%s3155_s22 + $0xb40] sm:$0xff] %v1098_v46  ;;  %2059 = vst [vmem:[%s3155_s22 + $0x9c0] sm:$0xff] %v1066_v47 }
 0x2a7   : > { %1212 = vxpose.xlu1.b32.cont [11/16] %v429_v44, 128  ;;  %1180 = vxpose.xlu0.b32.cont [11/16] %v428_v45, 128  ;;  %v457_v44 = vld [vmem:[%s3082_s5 + $0x878] sm:$0xff]  ;;  %v456_v45 = vld [vmem:[%s3082_s5 + $0x870] sm:$0xff] }
 0x2a9   : > { %v1099_v50 = vpop.trf.xlu1  ;;  %v1067_v51 = vpop.trf.xlu0 }
 0x2aa   : > { %2110 = vst [vmem:[%s3155_s22 + $0xb58] sm:$0xff] %v1099_v50  ;;  %2062 = vst [vmem:[%s3155_s22 + $0x9d8] sm:$0xff] %v1067_v51 }
 0x2ab   : > { %1213 = vxpose.xlu1.b32.cont [12/16] %v433_v48, 128  ;;  %1181 = vxpose.xlu0.b32.cont [12/16] %v432_v49, 128 }
 0x2ad   : > { %v1100_v54 = vpop.trf.xlu1  ;;  %v1068_v55 = vpop.trf.xlu0 }
 0x2ae   : > { %2113 = vst [vmem:[%s3155_s22 + $0xb70] sm:$0xff] %v1100_v54  ;;  %2065 = vst [vmem:[%s3155_s22 + $0x9f0] sm:$0xff] %v1068_v55 }
 0x2af   : > { %1214 = vxpose.xlu1.b32.cont [13/16] %v437_v52, 128  ;;  %1182 = vxpose.xlu0.b32.cont [13/16] %v436_v53, 128 }
 0x2b1   : > { %v1101_v58 = vpop.trf.xlu1  ;;  %v1069_v59 = vpop.trf.xlu0 }
 0x2b2   : > { %2116 = vst [vmem:[%s3155_s22 + $0xb88] sm:$0xff] %v1101_v58  ;;  %2068 = vst [vmem:[%s3155_s22 + $0xa08] sm:$0xff] %v1069_v59 }
 0x2b3   : > { %1215 = vxpose.xlu1.b32.cont [14/16] %v441_v56, 128  ;;  %1183 = vxpose.xlu0.b32.cont [14/16] %v440_v57, 128 }
 0x2b5   : > { %v1102_v62 = vpop.trf.xlu1  ;;  %v1070_v63 = vpop.trf.xlu0 }
 0x2b6   : > { %2119 = vst [vmem:[%s3155_s22 + $0xba0] sm:$0xff] %v1102_v62  ;;  %2071 = vst [vmem:[%s3155_s22 + $0xa20] sm:$0xff] %v1070_v63 }
 0x2b7   : > { %1216 = vxpose.xlu1.b32.cont [15/16] %v445_v60, 128  ;;  %1184 = vxpose.xlu0.b32.cont [15/16] %v444_v61, 128 }
 0x2b9   : > { %v1103_v2 = vpop.trf.xlu1  ;;  %v1071_v3 = vpop.trf.xlu0 }
 0x2ba   : > { %2122 = vst [vmem:[%s3155_s22 + $0xbb8] sm:$0xff] %v1103_v2  ;;  %2074 = vst [vmem:[%s3155_s22 + $0xa38] sm:$0xff] %v1071_v3 }
 0x2bb   : > { %1217 = vxpose.xlu1.b32.end [16/16] %v449_v0, 128  ;;  %1185 = vxpose.xlu0.b32.end [16/16] %v448_v1, 128 }
 0x2bd   : > { %v1104_v6 = vpop.trf.xlu1  ;;  %v1072_v7 = vpop.trf.xlu0 }
 0x2be   : > { %2125 = vst [vmem:[%s3155_s22 + $0xbd0] sm:$0xff] %v1104_v6  ;;  %2077 = vst [vmem:[%s3155_s22 + $0xa50] sm:$0xff] %v1072_v7 }
 0x2bf   : > { %1266 = vxpose.xlu1.b32.start [1/2] (short) %v451_v4, 128  ;;  %1234 = vxpose.xlu0.b32.start [1/2] (short) %v450_v5, 128 }
 0x2c1   : > { %v1105_v10 = vpop.trf.xlu1  ;;  %v1073_v11 = vpop.trf.xlu0 }
 0x2c2   : > { %2128 = vst [vmem:[%s3155_s22 + $0xbe8] sm:$0xff] %v1105_v10  ;;  %2080 = vst [vmem:[%s3155_s22 + $0xa68] sm:$0xff] %v1073_v11 }
 0x2c3   : > { %1267 = vxpose.xlu1.b32.end [2/2] (short) %v455_v8, 128  ;;  %1235 = vxpose.xlu0.b32.end [2/2] (short) %v454_v9, 128 }
 0x2c5   : > { %v1154_v12 = vpop.trf.xlu1  ;;  %v1122_v13 = vpop.trf.xlu0 }
 0x2c6   : > { %1988 = vst [vmem:[%s3155_s22 + $0x788] sm:$0xff] %v1154_v12  ;;  %1940 = vst [vmem:[%s3155_s22 + $0x608] sm:$0xff] %v1122_v13  ;;  %v459_v12 = vld [vmem:[%s3082_s5 + $0x888] sm:$0xff]  ;;  %v458_v13 = vld [vmem:[%s3082_s5 + $0x880] sm:$0xff] }
 0x2c9   : > { %v1155_v14 = vpop.trf.xlu1  ;;  %v1123_v15 = vpop.trf.xlu0 }
 0x2ca   : > { %1991 = vst [vmem:[%s3155_s22 + $0x7a0] sm:$0xff] %v1155_v14  ;;  %1943 = vst [vmem:[%s3155_s22 + $0x620] sm:$0xff] %v1123_v15 }
 0x2cd   : > { %v1156_v16 = vpop.trf.xlu1  ;;  %v1124_v17 = vpop.trf.xlu0 }
 0x2ce   : > { %1994 = vst [vmem:[%s3155_s22 + $0x7b8] sm:$0xff] %v1156_v16  ;;  %1946 = vst [vmem:[%s3155_s22 + $0x638] sm:$0xff] %v1124_v17  ;;  %v463_v16 = vld [vmem:[%s3082_s5 + $0x8a8] sm:$0xff]  ;;  %v462_v17 = vld [vmem:[%s3082_s5 + $0x8a0] sm:$0xff] }
 0x2d1   : > { %v1157_v18 = vpop.trf.xlu1  ;;  %v1125_v19 = vpop.trf.xlu0 }
 0x2d2   : > { %1997 = vst [vmem:[%s3155_s22 + $0x7d0] sm:$0xff] %v1157_v18  ;;  %1949 = vst [vmem:[%s3155_s22 + $0x650] sm:$0xff] %v1125_v19 }
 0x2d5   : > { %v1158_v20 = vpop.trf.xlu1  ;;  %v1126_v21 = vpop.trf.xlu0 }
 0x2d6   : > { %2000 = vst [vmem:[%s3155_s22 + $0x7e8] sm:$0xff] %v1158_v20  ;;  %1952 = vst [vmem:[%s3155_s22 + $0x668] sm:$0xff] %v1126_v21  ;;  %v467_v20 = vld [vmem:[%s3082_s5 + $0x8c8] sm:$0xff]  ;;  %v466_v21 = vld [vmem:[%s3082_s5 + $0x8c0] sm:$0xff] }
 0x2d9   : > { %v1159_v22 = vpop.trf.xlu1  ;;  %v1127_v23 = vpop.trf.xlu0 }
 0x2da   : > { %2003 = vst [vmem:[%s3155_s22 + $0x800] sm:$0xff] %v1159_v22  ;;  %1955 = vst [vmem:[%s3155_s22 + $0x680] sm:$0xff] %v1127_v23 }
 0x2dd   : > { %v1160_v24 = vpop.trf.xlu1  ;;  %v1128_v25 = vpop.trf.xlu0 }
 0x2de   : > { %2006 = vst [vmem:[%s3155_s22 + $0x818] sm:$0xff] %v1160_v24  ;;  %1958 = vst [vmem:[%s3155_s22 + $0x698] sm:$0xff] %v1128_v25  ;;  %v471_v24 = vld [vmem:[%s3082_s5 + $0x8e8] sm:$0xff]  ;;  %v470_v25 = vld [vmem:[%s3082_s5 + $0x8e0] sm:$0xff] }
 0x2e1   : > { %v1161_v26 = vpop.trf.xlu1  ;;  %v1129_v27 = vpop.trf.xlu0 }
 0x2e2   : > { %2009 = vst [vmem:[%s3155_s22 + $0x830] sm:$0xff] %v1161_v26  ;;  %1961 = vst [vmem:[%s3155_s22 + $0x6b0] sm:$0xff] %v1129_v27 }
 0x2e5   : > { %v1162_v28 = vpop.trf.xlu1  ;;  %v1130_v29 = vpop.trf.xlu0 }
 0x2e6   : > { %2012 = vst [vmem:[%s3155_s22 + $0x848] sm:$0xff] %v1162_v28  ;;  %1964 = vst [vmem:[%s3155_s22 + $0x6c8] sm:$0xff] %v1130_v29  ;;  %v475_v28 = vld [vmem:[%s3082_s5 + $0x908] sm:$0xff]  ;;  %v474_v29 = vld [vmem:[%s3082_s5 + $0x900] sm:$0xff] }
 0x2e9   : > { %v1163_v30 = vpop.trf.xlu1  ;;  %v1131_v31 = vpop.trf.xlu0 }
 0x2ea   : > { %2015 = vst [vmem:[%s3155_s22 + $0x860] sm:$0xff] %v1163_v30  ;;  %1967 = vst [vmem:[%s3155_s22 + $0x6e0] sm:$0xff] %v1131_v31 }
 0x2ed   : > { %v1164_v32 = vpop.trf.xlu1  ;;  %v1132_v33 = vpop.trf.xlu0 }
 0x2ee   : > { %2018 = vst [vmem:[%s3155_s22 + $0x878] sm:$0xff] %v1164_v32  ;;  %1970 = vst [vmem:[%s3155_s22 + $0x6f8] sm:$0xff] %v1132_v33  ;;  %v479_v32 = vld [vmem:[%s3082_s5 + $0x928] sm:$0xff]  ;;  %v478_v33 = vld [vmem:[%s3082_s5 + $0x920] sm:$0xff] }
 0x2f1   : > { %v1165_v34 = vpop.trf.xlu1  ;;  %v1133_v35 = vpop.trf.xlu0 }
 0x2f2   : > { %2021 = vst [vmem:[%s3155_s22 + $0x890] sm:$0xff] %v1165_v34  ;;  %1973 = vst [vmem:[%s3155_s22 + $0x710] sm:$0xff] %v1133_v35 }
 0x2f5   : > { %v1166_v36 = vpop.trf.xlu1  ;;  %v1134_v37 = vpop.trf.xlu0 }
 0x2f6   : > { %2024 = vst [vmem:[%s3155_s22 + $0x8a8] sm:$0xff] %v1166_v36  ;;  %1976 = vst [vmem:[%s3155_s22 + $0x728] sm:$0xff] %v1134_v37  ;;  %v483_v36 = vld [vmem:[%s3082_s5 + $0x948] sm:$0xff]  ;;  %v482_v37 = vld [vmem:[%s3082_s5 + $0x940] sm:$0xff] }
 0x2f9   : > { %v1167_v38 = vpop.trf.xlu1  ;;  %v1135_v39 = vpop.trf.xlu0 }
 0x2fa   : > { %2027 = vst [vmem:[%s3155_s22 + $0x8c0] sm:$0xff] %v1167_v38  ;;  %1979 = vst [vmem:[%s3155_s22 + $0x740] sm:$0xff] %v1135_v39 }
 0x2fd   : > { %v1168_v42 = vpop.trf.xlu1  ;;  %v1136_v43 = vpop.trf.xlu0  ;;  %1330 = vxpose.xlu1.b32.start [1/2] (short) %v453_v40, 128  ;;  %1298 = vxpose.xlu0.b32.start [1/2] (short) %v452_v41, 128  ;;  %v487_v40 = vld [vmem:[%s3082_s5 + $0x968] sm:$0xff]  ;;  %v486_v41 = vld [vmem:[%s3082_s5 + $0x960] sm:$0xff] }
 0x2fe   : > { %2030 = vst [vmem:[%s3155_s22 + $0x8d8] sm:$0xff] %v1168_v42  ;;  %1982 = vst [vmem:[%s3155_s22 + $0x758] sm:$0xff] %v1136_v43 }
 0x301   : > { %v1169_v46 = vpop.trf.xlu1  ;;  %v1137_v47 = vpop.trf.xlu0  ;;  %1331 = vxpose.xlu1.b32.end [2/2] (short) %v457_v44, 128  ;;  %1299 = vxpose.xlu0.b32.end [2/2] (short) %v456_v45, 128  ;;  %v491_v44 = vld [vmem:[%s3082_s5 + $0x988] sm:$0xff]  ;;  %v490_v45 = vld [vmem:[%s3082_s5 + $0x980] sm:$0xff] }
 0x302   : > { %2033 = vst [vmem:[%s3155_s22 + $0x8f0] sm:$0xff] %v1169_v46  ;;  %1985 = vst [vmem:[%s3155_s22 + $0x770] sm:$0xff] %v1137_v47 }
 0x305   : > { %v1218_v48 = vpop.trf.xlu1  ;;  %v1186_v49 = vpop.trf.xlu0 }
 0x306   : > { %2084 = vst [vmem:[%s3155_s22 + $0xa88] sm:$0xff] %v1218_v48  ;;  %2036 = vst [vmem:[%s3155_s22 + $0x908] sm:$0xff] %v1186_v49  ;;  %v495_v48 = vld [vmem:[%s3082_s5 + $0x9a8] sm:$0xff]  ;;  %v494_v49 = vld [vmem:[%s3082_s5 + $0x9a0] sm:$0xff] }
 0x309   : > { %v1219_v50 = vpop.trf.xlu1  ;;  %v1187_v51 = vpop.trf.xlu0 }
 0x30a   : > { %2087 = vst [vmem:[%s3155_s22 + $0xaa0] sm:$0xff] %v1219_v50  ;;  %2039 = vst [vmem:[%s3155_s22 + $0x920] sm:$0xff] %v1187_v51 }
 0x30d   : > { %v1220_v52 = vpop.trf.xlu1  ;;  %v1188_v53 = vpop.trf.xlu0 }
 0x30e   : > { %2090 = vst [vmem:[%s3155_s22 + $0xab8] sm:$0xff] %v1220_v52  ;;  %2042 = vst [vmem:[%s3155_s22 + $0x938] sm:$0xff] %v1188_v53  ;;  %v499_v52 = vld [vmem:[%s3082_s5 + $0x9c8] sm:$0xff]  ;;  %v498_v53 = vld [vmem:[%s3082_s5 + $0x9c0] sm:$0xff] }
 0x311   : > { %v1221_v54 = vpop.trf.xlu1  ;;  %v1189_v55 = vpop.trf.xlu0 }
 0x312   : > { %2093 = vst [vmem:[%s3155_s22 + $0xad0] sm:$0xff] %v1221_v54  ;;  %2045 = vst [vmem:[%s3155_s22 + $0x950] sm:$0xff] %v1189_v55 }
 0x315   : > { %v1222_v56 = vpop.trf.xlu1  ;;  %v1190_v57 = vpop.trf.xlu0 }
 0x316   : > { %2096 = vst [vmem:[%s3155_s22 + $0xae8] sm:$0xff] %v1222_v56  ;;  %2048 = vst [vmem:[%s3155_s22 + $0x968] sm:$0xff] %v1190_v57  ;;  %v503_v56 = vld [vmem:[%s3082_s5 + $0x9e8] sm:$0xff]  ;;  %v502_v57 = vld [vmem:[%s3082_s5 + $0x9e0] sm:$0xff] }
 0x319   : > { %v1223_v58 = vpop.trf.xlu1  ;;  %v1191_v59 = vpop.trf.xlu0 }
 0x31a   : > { %2099 = vst [vmem:[%s3155_s22 + $0xb00] sm:$0xff] %v1223_v58  ;;  %2051 = vst [vmem:[%s3155_s22 + $0x980] sm:$0xff] %v1191_v59 }
 0x31d   : > { %v1224_v60 = vpop.trf.xlu1  ;;  %v1192_v61 = vpop.trf.xlu0 }
 0x31e   : > { %2102 = vst [vmem:[%s3155_s22 + $0xb18] sm:$0xff] %v1224_v60  ;;  %2054 = vst [vmem:[%s3155_s22 + $0x998] sm:$0xff] %v1192_v61  ;;  %v507_v60 = vld [vmem:[%s3082_s5 + $0xa08] sm:$0xff]  ;;  %v506_v61 = vld [vmem:[%s3082_s5 + $0xa00] sm:$0xff] }
 0x321   : > { %v1225_v62 = vpop.trf.xlu1  ;;  %v1193_v63 = vpop.trf.xlu0 }
 0x322   : > { %2105 = vst [vmem:[%s3155_s22 + $0xb30] sm:$0xff] %v1225_v62  ;;  %2057 = vst [vmem:[%s3155_s22 + $0x9b0] sm:$0xff] %v1193_v63 }
 0x325   : > { %v1226_v0 = vpop.trf.xlu1  ;;  %v1194_v1 = vpop.trf.xlu0 }
 0x326   : > { %2108 = vst [vmem:[%s3155_s22 + $0xb48] sm:$0xff] %v1226_v0  ;;  %2060 = vst [vmem:[%s3155_s22 + $0x9c8] sm:$0xff] %v1194_v1  ;;  %v511_v0 = vld [vmem:[%s3082_s5 + $0xa28] sm:$0xff]  ;;  %v510_v1 = vld [vmem:[%s3082_s5 + $0xa20] sm:$0xff] }
 0x329   : > { %v1227_v2 = vpop.trf.xlu1  ;;  %v1195_v3 = vpop.trf.xlu0 }
 0x32a   : > { %2111 = vst [vmem:[%s3155_s22 + $0xb60] sm:$0xff] %v1227_v2  ;;  %2063 = vst [vmem:[%s3155_s22 + $0x9e0] sm:$0xff] %v1195_v3 }
 0x32d   : > { %v1228_v4 = vpop.trf.xlu1  ;;  %v1196_v5 = vpop.trf.xlu0 }
 0x32e   : > { %2114 = vst [vmem:[%s3155_s22 + $0xb78] sm:$0xff] %v1228_v4  ;;  %2066 = vst [vmem:[%s3155_s22 + $0x9f8] sm:$0xff] %v1196_v5  ;;  %v515_v4 = vld [vmem:[%s3082_s5 + $0xa48] sm:$0xff]  ;;  %v514_v5 = vld [vmem:[%s3082_s5 + $0xa40] sm:$0xff] }
 0x331   : > { %v1229_v6 = vpop.trf.xlu1  ;;  %v1197_v7 = vpop.trf.xlu0 }
 0x332   : > { %2117 = vst [vmem:[%s3155_s22 + $0xb90] sm:$0xff] %v1229_v6  ;;  %2069 = vst [vmem:[%s3155_s22 + $0xa10] sm:$0xff] %v1197_v7 }
 0x335   : > { %v1230_v8 = vpop.trf.xlu1  ;;  %v1198_v9 = vpop.trf.xlu0 }
 0x336   : > { %2120 = vst [vmem:[%s3155_s22 + $0xba8] sm:$0xff] %v1230_v8  ;;  %2072 = vst [vmem:[%s3155_s22 + $0xa28] sm:$0xff] %v1198_v9  ;;  %v519_v8 = vld [vmem:[%s3082_s5 + $0xa68] sm:$0xff]  ;;  %v518_v9 = vld [vmem:[%s3082_s5 + $0xa60] sm:$0xff] }
 0x339   : > { %v1231_v10 = vpop.trf.xlu1  ;;  %v1199_v11 = vpop.trf.xlu0 }
 0x33a   : > { %2123 = vst [vmem:[%s3155_s22 + $0xbc0] sm:$0xff] %v1231_v10  ;;  %2075 = vst [vmem:[%s3155_s22 + $0xa40] sm:$0xff] %v1199_v11 }
 0x33d   : > { %v1232_v14 = vpop.trf.xlu1  ;;  %v1200_v15 = vpop.trf.xlu0  ;;  %1394 = vxpose.xlu1.b32.start [1/16] %v459_v12, 128  ;;  %1362 = vxpose.xlu0.b32.start [1/16] %v458_v13, 128  ;;  %v461_v12 = vld [vmem:[%s3082_s5 + $0x898] sm:$0xff]  ;;  %v460_v13 = vld [vmem:[%s3082_s5 + $0x890] sm:$0xff] }
 0x33e   : > { %2126 = vst [vmem:[%s3155_s22 + $0xbd8] sm:$0xff] %v1232_v14  ;;  %2078 = vst [vmem:[%s3155_s22 + $0xa58] sm:$0xff] %v1200_v15 }
 0x341   : > { %v1233_v18 = vpop.trf.xlu1  ;;  %v1201_v19 = vpop.trf.xlu0  ;;  %1395 = vxpose.xlu1.b32.cont [2/16] %v463_v16, 128  ;;  %1363 = vxpose.xlu0.b32.cont [2/16] %v462_v17, 128  ;;  %v465_v16 = vld [vmem:[%s3082_s5 + $0x8b8] sm:$0xff]  ;;  %v464_v17 = vld [vmem:[%s3082_s5 + $0x8b0] sm:$0xff] }
 0x342   : > { %2129 = vst [vmem:[%s3155_s22 + $0xbf0] sm:$0xff] %v1233_v18  ;;  %2081 = vst [vmem:[%s3155_s22 + $0xa70] sm:$0xff] %v1201_v19 }
 0x345   : > { %v1282_v22 = vpop.trf.xlu1  ;;  %v1250_v23 = vpop.trf.xlu0  ;;  %1396 = vxpose.xlu1.b32.cont [3/16] %v467_v20, 128  ;;  %1364 = vxpose.xlu0.b32.cont [3/16] %v466_v21, 128  ;;  %v469_v20 = vld [vmem:[%s3082_s5 + $0x8d8] sm:$0xff]  ;;  %v468_v21 = vld [vmem:[%s3082_s5 + $0x8d0] sm:$0xff] }
 0x346   : > { %1989 = vst.msk [vmem:[%s3155_s22 + $0x790] sm:$0xff] %vm1748_vm0, %v1282_v22  ;;  %1941 = vst.msk [vmem:[%s3155_s22 + $0x610] sm:$0xff] %vm1748_vm0, %v1250_v23 }
 0x349   : > { %v1283_v26 = vpop.trf.xlu1  ;;  %v1251_v27 = vpop.trf.xlu0  ;;  %1397 = vxpose.xlu1.b32.cont [4/16] %v471_v24, 128  ;;  %1365 = vxpose.xlu0.b32.cont [4/16] %v470_v25, 128  ;;  %v473_v24 = vld [vmem:[%s3082_s5 + $0x8f8] sm:$0xff]  ;;  %v472_v25 = vld [vmem:[%s3082_s5 + $0x8f0] sm:$0xff] }
 0x34a   : > { %1992 = vst.msk [vmem:[%s3155_s22 + $0x7a8] sm:$0xff] %vm1748_vm0, %v1283_v26  ;;  %1944 = vst.msk [vmem:[%s3155_s22 + $0x628] sm:$0xff] %vm1748_vm0, %v1251_v27 }
 0x34d   : > { %v1284_v30 = vpop.trf.xlu1  ;;  %v1252_v31 = vpop.trf.xlu0  ;;  %1398 = vxpose.xlu1.b32.cont [5/16] %v475_v28, 128  ;;  %1366 = vxpose.xlu0.b32.cont [5/16] %v474_v29, 128  ;;  %v477_v28 = vld [vmem:[%s3082_s5 + $0x918] sm:$0xff]  ;;  %v476_v29 = vld [vmem:[%s3082_s5 + $0x910] sm:$0xff] }
 0x34e   : > { %1995 = vst.msk [vmem:[%s3155_s22 + $0x7c0] sm:$0xff] %vm1748_vm0, %v1284_v30  ;;  %1947 = vst.msk [vmem:[%s3155_s22 + $0x640] sm:$0xff] %vm1748_vm0, %v1252_v31 }
 0x351   : > { %v1285_v34 = vpop.trf.xlu1  ;;  %v1253_v35 = vpop.trf.xlu0  ;;  %1399 = vxpose.xlu1.b32.cont [6/16] %v479_v32, 128  ;;  %1367 = vxpose.xlu0.b32.cont [6/16] %v478_v33, 128  ;;  %v481_v32 = vld [vmem:[%s3082_s5 + $0x938] sm:$0xff]  ;;  %v480_v33 = vld [vmem:[%s3082_s5 + $0x930] sm:$0xff] }
 0x352   : > { %1998 = vst.msk [vmem:[%s3155_s22 + $0x7d8] sm:$0xff] %vm1748_vm0, %v1285_v34  ;;  %1950 = vst.msk [vmem:[%s3155_s22 + $0x658] sm:$0xff] %vm1748_vm0, %v1253_v35 }
 0x355   : > { %v1286_v38 = vpop.trf.xlu1  ;;  %v1254_v39 = vpop.trf.xlu0  ;;  %1400 = vxpose.xlu1.b32.cont [7/16] %v483_v36, 128  ;;  %1368 = vxpose.xlu0.b32.cont [7/16] %v482_v37, 128  ;;  %v485_v36 = vld [vmem:[%s3082_s5 + $0x958] sm:$0xff]  ;;  %v484_v37 = vld [vmem:[%s3082_s5 + $0x950] sm:$0xff] }
 0x356   : > { %2001 = vst.msk [vmem:[%s3155_s22 + $0x7f0] sm:$0xff] %vm1748_vm0, %v1286_v38  ;;  %1953 = vst.msk [vmem:[%s3155_s22 + $0x670] sm:$0xff] %vm1748_vm0, %v1254_v39 }
 0x359   : > { %v1287_v42 = vpop.trf.xlu1  ;;  %v1255_v43 = vpop.trf.xlu0  ;;  %1401 = vxpose.xlu1.b32.cont [8/16] %v487_v40, 128  ;;  %1369 = vxpose.xlu0.b32.cont [8/16] %v486_v41, 128  ;;  %v489_v40 = vld [vmem:[%s3082_s5 + $0x978] sm:$0xff]  ;;  %v488_v41 = vld [vmem:[%s3082_s5 + $0x970] sm:$0xff] }
 0x35a   : > { %2004 = vst.msk [vmem:[%s3155_s22 + $0x808] sm:$0xff] %vm1748_vm0, %v1287_v42  ;;  %1956 = vst.msk [vmem:[%s3155_s22 + $0x688] sm:$0xff] %vm1748_vm0, %v1255_v43 }
 0x35d   : > { %v1288_v46 = vpop.trf.xlu1  ;;  %v1256_v47 = vpop.trf.xlu0  ;;  %1402 = vxpose.xlu1.b32.cont [9/16] %v491_v44, 128  ;;  %1370 = vxpose.xlu0.b32.cont [9/16] %v490_v45, 128  ;;  %v493_v44 = vld [vmem:[%s3082_s5 + $0x998] sm:$0xff]  ;;  %v492_v45 = vld [vmem:[%s3082_s5 + $0x990] sm:$0xff] }
 0x35e   : > { %2007 = vst.msk [vmem:[%s3155_s22 + $0x820] sm:$0xff] %vm1748_vm0, %v1288_v46  ;;  %1959 = vst.msk [vmem:[%s3155_s22 + $0x6a0] sm:$0xff] %vm1748_vm0, %v1256_v47 }
 0x361   : > { %v1289_v50 = vpop.trf.xlu1  ;;  %v1257_v51 = vpop.trf.xlu0  ;;  %1403 = vxpose.xlu1.b32.cont [10/16] %v495_v48, 128  ;;  %1371 = vxpose.xlu0.b32.cont [10/16] %v494_v49, 128  ;;  %v497_v48 = vld [vmem:[%s3082_s5 + $0x9b8] sm:$0xff]  ;;  %v496_v49 = vld [vmem:[%s3082_s5 + $0x9b0] sm:$0xff] }
 0x362   : > { %2010 = vst.msk [vmem:[%s3155_s22 + $0x838] sm:$0xff] %vm1748_vm0, %v1289_v50  ;;  %1962 = vst.msk [vmem:[%s3155_s22 + $0x6b8] sm:$0xff] %vm1748_vm0, %v1257_v51 }
 0x365   : > { %v1290_v54 = vpop.trf.xlu1  ;;  %v1258_v55 = vpop.trf.xlu0  ;;  %1404 = vxpose.xlu1.b32.cont [11/16] %v499_v52, 128  ;;  %1372 = vxpose.xlu0.b32.cont [11/16] %v498_v53, 128  ;;  %v501_v52 = vld [vmem:[%s3082_s5 + $0x9d8] sm:$0xff]  ;;  %v500_v53 = vld [vmem:[%s3082_s5 + $0x9d0] sm:$0xff] }
 0x366   : > { %2013 = vst.msk [vmem:[%s3155_s22 + $0x850] sm:$0xff] %vm1748_vm0, %v1290_v54  ;;  %1965 = vst.msk [vmem:[%s3155_s22 + $0x6d0] sm:$0xff] %vm1748_vm0, %v1258_v55 }
 0x369   : > { %v1291_v58 = vpop.trf.xlu1  ;;  %v1259_v59 = vpop.trf.xlu0  ;;  %1405 = vxpose.xlu1.b32.cont [12/16] %v503_v56, 128  ;;  %1373 = vxpose.xlu0.b32.cont [12/16] %v502_v57, 128  ;;  %v505_v56 = vld [vmem:[%s3082_s5 + $0x9f8] sm:$0xff]  ;;  %v504_v57 = vld [vmem:[%s3082_s5 + $0x9f0] sm:$0xff] }
 0x36a   : > { %2016 = vst.msk [vmem:[%s3155_s22 + $0x868] sm:$0xff] %vm1748_vm0, %v1291_v58  ;;  %1968 = vst.msk [vmem:[%s3155_s22 + $0x6e8] sm:$0xff] %vm1748_vm0, %v1259_v59 }
 0x36d   : > { %v1292_v62 = vpop.trf.xlu1  ;;  %v1260_v63 = vpop.trf.xlu0  ;;  %1406 = vxpose.xlu1.b32.cont [13/16] %v507_v60, 128  ;;  %1374 = vxpose.xlu0.b32.cont [13/16] %v506_v61, 128  ;;  %v509_v60 = vld [vmem:[%s3082_s5 + $0xa18] sm:$0xff]  ;;  %v508_v61 = vld [vmem:[%s3082_s5 + $0xa10] sm:$0xff] }
 0x36e   : > { %2019 = vst.msk [vmem:[%s3155_s22 + $0x880] sm:$0xff] %vm1748_vm0, %v1292_v62  ;;  %1971 = vst.msk [vmem:[%s3155_s22 + $0x700] sm:$0xff] %vm1748_vm0, %v1260_v63 }
 0x371   : > { %v1293_v2 = vpop.trf.xlu1  ;;  %v1261_v3 = vpop.trf.xlu0  ;;  %1407 = vxpose.xlu1.b32.cont [14/16] %v511_v0, 128  ;;  %1375 = vxpose.xlu0.b32.cont [14/16] %v510_v1, 128  ;;  %v513_v0 = vld [vmem:[%s3082_s5 + $0xa38] sm:$0xff]  ;;  %v512_v1 = vld [vmem:[%s3082_s5 + $0xa30] sm:$0xff] }
 0x372   : > { %2022 = vst.msk [vmem:[%s3155_s22 + $0x898] sm:$0xff] %vm1748_vm0, %v1293_v2  ;;  %1974 = vst.msk [vmem:[%s3155_s22 + $0x718] sm:$0xff] %vm1748_vm0, %v1261_v3 }
 0x375   : > { %v1294_v6 = vpop.trf.xlu1  ;;  %v1262_v7 = vpop.trf.xlu0  ;;  %1408 = vxpose.xlu1.b32.cont [15/16] %v515_v4, 128  ;;  %1376 = vxpose.xlu0.b32.cont [15/16] %v514_v5, 128  ;;  %v517_v4 = vld [vmem:[%s3082_s5 + $0xa58] sm:$0xff]  ;;  %v516_v5 = vld [vmem:[%s3082_s5 + $0xa50] sm:$0xff] }
 0x376   : > { %2025 = vst.msk [vmem:[%s3155_s22 + $0x8b0] sm:$0xff] %vm1748_vm0, %v1294_v6  ;;  %1977 = vst.msk [vmem:[%s3155_s22 + $0x730] sm:$0xff] %vm1748_vm0, %v1262_v7 }
 0x379   : > { %v1295_v10 = vpop.trf.xlu1  ;;  %v1263_v11 = vpop.trf.xlu0  ;;  %1409 = vxpose.xlu1.b32.end [16/16] %v519_v8, 128  ;;  %1377 = vxpose.xlu0.b32.end [16/16] %v518_v9, 128  ;;  %v521_v8 = vld [vmem:[%s3082_s5 + $0xa78] sm:$0xff]  ;;  %v520_v9 = vld [vmem:[%s3082_s5 + $0xa70] sm:$0xff] }
 0x37a   : > { %2028 = vst.msk [vmem:[%s3155_s22 + $0x8c8] sm:$0xff] %vm1748_vm0, %v1295_v10  ;;  %1980 = vst.msk [vmem:[%s3155_s22 + $0x748] sm:$0xff] %vm1748_vm0, %v1263_v11 }
 0x37d   : > { %v1296_v14 = vpop.trf.xlu1  ;;  %v1264_v15 = vpop.trf.xlu0  ;;  %1458 = vxpose.xlu1.b32.start [1/16] %v461_v12, 128  ;;  %1426 = vxpose.xlu0.b32.start [1/16] %v460_v13, 128  ;;  %v523_v12 = vld [vmem:[%s3082_s5 + $0xa88] sm:$0xff]  ;;  %v522_v13 = vld [vmem:[%s3082_s5 + $0xa80] sm:$0xff] }
 0x37e   : > { %2031 = vst.msk [vmem:[%s3155_s22 + $0x8e0] sm:$0xff] %vm1748_vm0, %v1296_v14  ;;  %1983 = vst.msk [vmem:[%s3155_s22 + $0x760] sm:$0xff] %vm1748_vm0, %v1264_v15 }
 0x381   : > { %v1297_v18 = vpop.trf.xlu1  ;;  %v1265_v19 = vpop.trf.xlu0  ;;  %1459 = vxpose.xlu1.b32.cont [2/16] %v465_v16, 128  ;;  %1427 = vxpose.xlu0.b32.cont [2/16] %v464_v17, 128  ;;  %v527_v16 = vld [vmem:[%s3082_s5 + $0xaa8] sm:$0xff]  ;;  %v526_v17 = vld [vmem:[%s3082_s5 + $0xaa0] sm:$0xff] }
 0x382   : > { %2034 = vst.msk [vmem:[%s3155_s22 + $0x8f8] sm:$0xff] %vm1748_vm0, %v1297_v18  ;;  %1986 = vst.msk [vmem:[%s3155_s22 + $0x778] sm:$0xff] %vm1748_vm0, %v1265_v19 }
 0x385   : > { %v1346_v22 = vpop.trf.xlu1  ;;  %v1314_v23 = vpop.trf.xlu0  ;;  %1460 = vxpose.xlu1.b32.cont [3/16] %v469_v20, 128  ;;  %1428 = vxpose.xlu0.b32.cont [3/16] %v468_v21, 128  ;;  %v531_v20 = vld [vmem:[%s3082_s5 + $0xac8] sm:$0xff]  ;;  %v530_v21 = vld [vmem:[%s3082_s5 + $0xac0] sm:$0xff] }
 0x386   : > { %2085 = vst.msk [vmem:[%s3155_s22 + $0xa90] sm:$0xff] %vm1748_vm0, %v1346_v22  ;;  %2037 = vst.msk [vmem:[%s3155_s22 + $0x910] sm:$0xff] %vm1748_vm0, %v1314_v23 }
 0x389   : > { %v1347_v26 = vpop.trf.xlu1  ;;  %v1315_v27 = vpop.trf.xlu0  ;;  %1461 = vxpose.xlu1.b32.cont [4/16] %v473_v24, 128  ;;  %1429 = vxpose.xlu0.b32.cont [4/16] %v472_v25, 128  ;;  %v535_v24 = vld [vmem:[%s3082_s5 + $0xae8] sm:$0xff]  ;;  %v534_v25 = vld [vmem:[%s3082_s5 + $0xae0] sm:$0xff] }
 0x38a   : > { %2088 = vst.msk [vmem:[%s3155_s22 + $0xaa8] sm:$0xff] %vm1748_vm0, %v1347_v26  ;;  %2040 = vst.msk [vmem:[%s3155_s22 + $0x928] sm:$0xff] %vm1748_vm0, %v1315_v27 }
 0x38d   : > { %v1348_v30 = vpop.trf.xlu1  ;;  %v1316_v31 = vpop.trf.xlu0  ;;  %1462 = vxpose.xlu1.b32.cont [5/16] %v477_v28, 128  ;;  %1430 = vxpose.xlu0.b32.cont [5/16] %v476_v29, 128  ;;  %v539_v28 = vld [vmem:[%s3082_s5 + $0xb08] sm:$0xff]  ;;  %v538_v29 = vld [vmem:[%s3082_s5 + $0xb00] sm:$0xff] }
 0x38e   : > { %2091 = vst.msk [vmem:[%s3155_s22 + $0xac0] sm:$0xff] %vm1748_vm0, %v1348_v30  ;;  %2043 = vst.msk [vmem:[%s3155_s22 + $0x940] sm:$0xff] %vm1748_vm0, %v1316_v31 }
 0x391   : > { %v1349_v34 = vpop.trf.xlu1  ;;  %v1317_v35 = vpop.trf.xlu0  ;;  %1463 = vxpose.xlu1.b32.cont [6/16] %v481_v32, 128  ;;  %1431 = vxpose.xlu0.b32.cont [6/16] %v480_v33, 128  ;;  %v543_v32 = vld [vmem:[%s3082_s5 + $0xb28] sm:$0xff]  ;;  %v542_v33 = vld [vmem:[%s3082_s5 + $0xb20] sm:$0xff] }
 0x392   : > { %2094 = vst.msk [vmem:[%s3155_s22 + $0xad8] sm:$0xff] %vm1748_vm0, %v1349_v34  ;;  %2046 = vst.msk [vmem:[%s3155_s22 + $0x958] sm:$0xff] %vm1748_vm0, %v1317_v35 }
 0x395   : > { %v1350_v38 = vpop.trf.xlu1  ;;  %v1318_v39 = vpop.trf.xlu0  ;;  %1464 = vxpose.xlu1.b32.cont [7/16] %v485_v36, 128  ;;  %1432 = vxpose.xlu0.b32.cont [7/16] %v484_v37, 128  ;;  %v547_v36 = vld [vmem:[%s3082_s5 + $0xb48] sm:$0xff]  ;;  %v546_v37 = vld [vmem:[%s3082_s5 + $0xb40] sm:$0xff] }
 0x396   : > { %2097 = vst.msk [vmem:[%s3155_s22 + $0xaf0] sm:$0xff] %vm1748_vm0, %v1350_v38  ;;  %2049 = vst.msk [vmem:[%s3155_s22 + $0x970] sm:$0xff] %vm1748_vm0, %v1318_v39 }
 0x399   : > { %v1351_v42 = vpop.trf.xlu1  ;;  %v1319_v43 = vpop.trf.xlu0  ;;  %1465 = vxpose.xlu1.b32.cont [8/16] %v489_v40, 128  ;;  %1433 = vxpose.xlu0.b32.cont [8/16] %v488_v41, 128  ;;  %v551_v40 = vld [vmem:[%s3082_s5 + $0xb68] sm:$0xff]  ;;  %v550_v41 = vld [vmem:[%s3082_s5 + $0xb60] sm:$0xff] }
 0x39a   : > { %2100 = vst.msk [vmem:[%s3155_s22 + $0xb08] sm:$0xff] %vm1748_vm0, %v1351_v42  ;;  %2052 = vst.msk [vmem:[%s3155_s22 + $0x988] sm:$0xff] %vm1748_vm0, %v1319_v43 }
 0x39d   : > { %v1352_v46 = vpop.trf.xlu1  ;;  %v1320_v47 = vpop.trf.xlu0  ;;  %1466 = vxpose.xlu1.b32.cont [9/16] %v493_v44, 128  ;;  %1434 = vxpose.xlu0.b32.cont [9/16] %v492_v45, 128  ;;  %v555_v44 = vld [vmem:[%s3082_s5 + $0xb88] sm:$0xff]  ;;  %v554_v45 = vld [vmem:[%s3082_s5 + $0xb80] sm:$0xff] }
 0x39e   : > { %2103 = vst.msk [vmem:[%s3155_s22 + $0xb20] sm:$0xff] %vm1748_vm0, %v1352_v46  ;;  %2055 = vst.msk [vmem:[%s3155_s22 + $0x9a0] sm:$0xff] %vm1748_vm0, %v1320_v47 }
 0x3a1   : > { %v1353_v50 = vpop.trf.xlu1  ;;  %v1321_v51 = vpop.trf.xlu0  ;;  %1467 = vxpose.xlu1.b32.cont [10/16] %v497_v48, 128  ;;  %1435 = vxpose.xlu0.b32.cont [10/16] %v496_v49, 128  ;;  %v559_v48 = vld [vmem:[%s3082_s5 + $0xba8] sm:$0xff]  ;;  %v558_v49 = vld [vmem:[%s3082_s5 + $0xba0] sm:$0xff] }
 0x3a2   : > { %2106 = vst.msk [vmem:[%s3155_s22 + $0xb38] sm:$0xff] %vm1748_vm0, %v1353_v50  ;;  %2058 = vst.msk [vmem:[%s3155_s22 + $0x9b8] sm:$0xff] %vm1748_vm0, %v1321_v51 }
 0x3a5   : > { %v1354_v54 = vpop.trf.xlu1  ;;  %v1322_v55 = vpop.trf.xlu0  ;;  %1468 = vxpose.xlu1.b32.cont [11/16] %v501_v52, 128  ;;  %1436 = vxpose.xlu0.b32.cont [11/16] %v500_v53, 128  ;;  %v563_v52 = vld [vmem:[%s3082_s5 + $0xbc8] sm:$0xff]  ;;  %v562_v53 = vld [vmem:[%s3082_s5 + $0xbc0] sm:$0xff] }
 0x3a6   : > { %2109 = vst.msk [vmem:[%s3155_s22 + $0xb50] sm:$0xff] %vm1748_vm0, %v1354_v54  ;;  %2061 = vst.msk [vmem:[%s3155_s22 + $0x9d0] sm:$0xff] %vm1748_vm0, %v1322_v55 }
 0x3a9   : > { %v1355_v58 = vpop.trf.xlu1  ;;  %v1323_v59 = vpop.trf.xlu0  ;;  %1469 = vxpose.xlu1.b32.cont [12/16] %v505_v56, 128  ;;  %1437 = vxpose.xlu0.b32.cont [12/16] %v504_v57, 128  ;;  %v567_v56 = vld [vmem:[%s3082_s5 + $0xbe8] sm:$0xff]  ;;  %v566_v57 = vld [vmem:[%s3082_s5 + $0xbe0] sm:$0xff] }
 0x3aa   : > { %2112 = vst.msk [vmem:[%s3155_s22 + $0xb68] sm:$0xff] %vm1748_vm0, %v1355_v58  ;;  %2064 = vst.msk [vmem:[%s3155_s22 + $0x9e8] sm:$0xff] %vm1748_vm0, %v1323_v59 }
 0x3ad   : > { %v1356_v62 = vpop.trf.xlu1  ;;  %v1324_v63 = vpop.trf.xlu0  ;;  %1470 = vxpose.xlu1.b32.cont [13/16] %v509_v60, 128  ;;  %1438 = vxpose.xlu0.b32.cont [13/16] %v508_v61, 128  ;;  %v571_v60 = vld [vmem:[%s3082_s5 + $0xc08] sm:$0xff]  ;;  %v570_v61 = vld [vmem:[%s3082_s5 + $0xc00] sm:$0xff] }
 0x3ae   : > { %2115 = vst.msk [vmem:[%s3155_s22 + $0xb80] sm:$0xff] %vm1748_vm0, %v1356_v62  ;;  %2067 = vst.msk [vmem:[%s3155_s22 + $0xa00] sm:$0xff] %vm1748_vm0, %v1324_v63 }
 0x3b1   : > { %v1357_v2 = vpop.trf.xlu1  ;;  %v1325_v3 = vpop.trf.xlu0  ;;  %1471 = vxpose.xlu1.b32.cont [14/16] %v513_v0, 128  ;;  %1439 = vxpose.xlu0.b32.cont [14/16] %v512_v1, 128  ;;  %v575_v0 = vld [vmem:[%s3082_s5 + $0xc28] sm:$0xff]  ;;  %v574_v1 = vld [vmem:[%s3082_s5 + $0xc20] sm:$0xff] }
 0x3b2   : > { %2118 = vst.msk [vmem:[%s3155_s22 + $0xb98] sm:$0xff] %vm1748_vm0, %v1357_v2  ;;  %2070 = vst.msk [vmem:[%s3155_s22 + $0xa18] sm:$0xff] %vm1748_vm0, %v1325_v3 }
 0x3b5   : > { %v1358_v6 = vpop.trf.xlu1  ;;  %v1326_v7 = vpop.trf.xlu0  ;;  %1472 = vxpose.xlu1.b32.cont [15/16] %v517_v4, 128  ;;  %1440 = vxpose.xlu0.b32.cont [15/16] %v516_v5, 128  ;;  %v579_v4 = vld [vmem:[%s3082_s5 + $0xc48] sm:$0xff]  ;;  %v578_v5 = vld [vmem:[%s3082_s5 + $0xc40] sm:$0xff] }
 0x3b6   : > { %2121 = vst.msk [vmem:[%s3155_s22 + $0xbb0] sm:$0xff] %vm1748_vm0, %v1358_v6  ;;  %2073 = vst.msk [vmem:[%s3155_s22 + $0xa30] sm:$0xff] %vm1748_vm0, %v1326_v7 }
 0x3b9   : > { %v1359_v10 = vpop.trf.xlu1  ;;  %v1327_v11 = vpop.trf.xlu0  ;;  %1473 = vxpose.xlu1.b32.end [16/16] %v521_v8, 128  ;;  %1441 = vxpose.xlu0.b32.end [16/16] %v520_v9, 128  ;;  %v583_v8 = vld [vmem:[%s3082_s5 + $0xc68] sm:$0xff]  ;;  %v582_v9 = vld [vmem:[%s3082_s5 + $0xc60] sm:$0xff] }
 0x3ba   : > { %2124 = vst.msk [vmem:[%s3155_s22 + $0xbc8] sm:$0xff] %vm1748_vm0, %v1359_v10  ;;  %2076 = vst.msk [vmem:[%s3155_s22 + $0xa48] sm:$0xff] %vm1748_vm0, %v1327_v11 }
 0x3bd   : > { %v1360_v14 = vpop.trf.xlu1  ;;  %v1328_v15 = vpop.trf.xlu0  ;;  %1522 = vxpose.xlu1.b32.start [1/16] %v523_v12, 128  ;;  %1490 = vxpose.xlu0.b32.start [1/16] %v522_v13, 128  ;;  %v525_v12 = vld [vmem:[%s3082_s5 + $0xa98] sm:$0xff]  ;;  %v524_v13 = vld [vmem:[%s3082_s5 + $0xa90] sm:$0xff] }
 0x3be   : > { %2127 = vst.msk [vmem:[%s3155_s22 + $0xbe0] sm:$0xff] %vm1748_vm0, %v1360_v14  ;;  %2079 = vst.msk [vmem:[%s3155_s22 + $0xa60] sm:$0xff] %vm1748_vm0, %v1328_v15 }
 0x3c1   : > { %v1361_v18 = vpop.trf.xlu1  ;;  %v1329_v19 = vpop.trf.xlu0  ;;  %1523 = vxpose.xlu1.b32.cont [2/16] %v527_v16, 128  ;;  %1491 = vxpose.xlu0.b32.cont [2/16] %v526_v17, 128  ;;  %v529_v16 = vld [vmem:[%s3082_s5 + $0xab8] sm:$0xff]  ;;  %v528_v17 = vld [vmem:[%s3082_s5 + $0xab0] sm:$0xff] }
 0x3c2   : > { %2130 = vst.msk [vmem:[%s3155_s22 + $0xbf8] sm:$0xff] %vm1748_vm0, %v1361_v18  ;;  %2082 = vst.msk [vmem:[%s3155_s22 + $0xa78] sm:$0xff] %vm1748_vm0, %v1329_v19 }
 0x3c5   : > { %v1410_v22 = vpop.trf.xlu1  ;;  %v1378_v23 = vpop.trf.xlu0  ;;  %1524 = vxpose.xlu1.b32.cont [3/16] %v531_v20, 128  ;;  %1492 = vxpose.xlu0.b32.cont [3/16] %v530_v21, 128  ;;  %v533_v20 = vld [vmem:[%s3082_s5 + $0xad8] sm:$0xff]  ;;  %v532_v21 = vld [vmem:[%s3082_s5 + $0xad0] sm:$0xff] }
 0x3c6   : > { %2179 = vst [vmem:[%s3155_s22 + $0xd80] sm:$0xff] %v1410_v22  ;;  %2131 = vst [vmem:[%s3155_s22 + $0xc00] sm:$0xff] %v1378_v23 }
 0x3c9   : > { %v1411_v26 = vpop.trf.xlu1  ;;  %v1379_v27 = vpop.trf.xlu0  ;;  %1525 = vxpose.xlu1.b32.cont [4/16] %v535_v24, 128  ;;  %1493 = vxpose.xlu0.b32.cont [4/16] %v534_v25, 128  ;;  %v537_v24 = vld [vmem:[%s3082_s5 + $0xaf8] sm:$0xff]  ;;  %v536_v25 = vld [vmem:[%s3082_s5 + $0xaf0] sm:$0xff] }
 0x3ca   : > { %2182 = vst [vmem:[%s3155_s22 + $0xd98] sm:$0xff] %v1411_v26  ;;  %2134 = vst [vmem:[%s3155_s22 + $0xc18] sm:$0xff] %v1379_v27 }
 0x3cd   : > { %v1412_v30 = vpop.trf.xlu1  ;;  %v1380_v31 = vpop.trf.xlu0  ;;  %1526 = vxpose.xlu1.b32.cont [5/16] %v539_v28, 128  ;;  %1494 = vxpose.xlu0.b32.cont [5/16] %v538_v29, 128  ;;  %v541_v28 = vld [vmem:[%s3082_s5 + $0xb18] sm:$0xff]  ;;  %v540_v29 = vld [vmem:[%s3082_s5 + $0xb10] sm:$0xff] }
 0x3ce   : > { %2185 = vst [vmem:[%s3155_s22 + $0xdb0] sm:$0xff] %v1412_v30  ;;  %2137 = vst [vmem:[%s3155_s22 + $0xc30] sm:$0xff] %v1380_v31 }
 0x3d1   : > { %v1413_v34 = vpop.trf.xlu1  ;;  %v1381_v35 = vpop.trf.xlu0  ;;  %1527 = vxpose.xlu1.b32.cont [6/16] %v543_v32, 128  ;;  %1495 = vxpose.xlu0.b32.cont [6/16] %v542_v33, 128  ;;  %v545_v32 = vld [vmem:[%s3082_s5 + $0xb38] sm:$0xff]  ;;  %v544_v33 = vld [vmem:[%s3082_s5 + $0xb30] sm:$0xff] }
 0x3d2   : > { %2188 = vst [vmem:[%s3155_s22 + $0xdc8] sm:$0xff] %v1413_v34  ;;  %2140 = vst [vmem:[%s3155_s22 + $0xc48] sm:$0xff] %v1381_v35 }
 0x3d5   : > { %v1414_v38 = vpop.trf.xlu1  ;;  %v1382_v39 = vpop.trf.xlu0  ;;  %1528 = vxpose.xlu1.b32.cont [7/16] %v547_v36, 128  ;;  %1496 = vxpose.xlu0.b32.cont [7/16] %v546_v37, 128  ;;  %v549_v36 = vld [vmem:[%s3082_s5 + $0xb58] sm:$0xff]  ;;  %v548_v37 = vld [vmem:[%s3082_s5 + $0xb50] sm:$0xff] }
 0x3d6   : > { %2191 = vst [vmem:[%s3155_s22 + $0xde0] sm:$0xff] %v1414_v38  ;;  %2143 = vst [vmem:[%s3155_s22 + $0xc60] sm:$0xff] %v1382_v39 }
 0x3d9   : > { %v1415_v42 = vpop.trf.xlu1  ;;  %v1383_v43 = vpop.trf.xlu0  ;;  %1529 = vxpose.xlu1.b32.cont [8/16] %v551_v40, 128  ;;  %1497 = vxpose.xlu0.b32.cont [8/16] %v550_v41, 128  ;;  %v553_v40 = vld [vmem:[%s3082_s5 + $0xb78] sm:$0xff]  ;;  %v552_v41 = vld [vmem:[%s3082_s5 + $0xb70] sm:$0xff] }
 0x3da   : > { %2194 = vst [vmem:[%s3155_s22 + $0xdf8] sm:$0xff] %v1415_v42  ;;  %2146 = vst [vmem:[%s3155_s22 + $0xc78] sm:$0xff] %v1383_v43 }
 0x3dd   : > { %v1416_v46 = vpop.trf.xlu1  ;;  %v1384_v47 = vpop.trf.xlu0  ;;  %1530 = vxpose.xlu1.b32.cont [9/16] %v555_v44, 128  ;;  %1498 = vxpose.xlu0.b32.cont [9/16] %v554_v45, 128  ;;  %v557_v44 = vld [vmem:[%s3082_s5 + $0xb98] sm:$0xff]  ;;  %v556_v45 = vld [vmem:[%s3082_s5 + $0xb90] sm:$0xff] }
 0x3de   : > { %2197 = vst [vmem:[%s3155_s22 + $0xe10] sm:$0xff] %v1416_v46  ;;  %2149 = vst [vmem:[%s3155_s22 + $0xc90] sm:$0xff] %v1384_v47 }
 0x3e1   : > { %v1417_v50 = vpop.trf.xlu1  ;;  %v1385_v51 = vpop.trf.xlu0  ;;  %1531 = vxpose.xlu1.b32.cont [10/16] %v559_v48, 128  ;;  %1499 = vxpose.xlu0.b32.cont [10/16] %v558_v49, 128  ;;  %v561_v48 = vld [vmem:[%s3082_s5 + $0xbb8] sm:$0xff]  ;;  %v560_v49 = vld [vmem:[%s3082_s5 + $0xbb0] sm:$0xff] }
 0x3e2   : > { %2200 = vst [vmem:[%s3155_s22 + $0xe28] sm:$0xff] %v1417_v50  ;;  %2152 = vst [vmem:[%s3155_s22 + $0xca8] sm:$0xff] %v1385_v51 }
 0x3e5   : > { %v1418_v54 = vpop.trf.xlu1  ;;  %v1386_v55 = vpop.trf.xlu0  ;;  %1532 = vxpose.xlu1.b32.cont [11/16] %v563_v52, 128  ;;  %1500 = vxpose.xlu0.b32.cont [11/16] %v562_v53, 128  ;;  %v565_v52 = vld [vmem:[%s3082_s5 + $0xbd8] sm:$0xff]  ;;  %v564_v53 = vld [vmem:[%s3082_s5 + $0xbd0] sm:$0xff] }
 0x3e6   : > { %2203 = vst [vmem:[%s3155_s22 + $0xe40] sm:$0xff] %v1418_v54  ;;  %2155 = vst [vmem:[%s3155_s22 + $0xcc0] sm:$0xff] %v1386_v55 }
 0x3e9   : > { %v1419_v58 = vpop.trf.xlu1  ;;  %v1387_v59 = vpop.trf.xlu0  ;;  %1533 = vxpose.xlu1.b32.cont [12/16] %v567_v56, 128  ;;  %1501 = vxpose.xlu0.b32.cont [12/16] %v566_v57, 128  ;;  %v569_v56 = vld [vmem:[%s3082_s5 + $0xbf8] sm:$0xff]  ;;  %v568_v57 = vld [vmem:[%s3082_s5 + $0xbf0] sm:$0xff] }
 0x3ea   : > { %2206 = vst [vmem:[%s3155_s22 + $0xe58] sm:$0xff] %v1419_v58  ;;  %2158 = vst [vmem:[%s3155_s22 + $0xcd8] sm:$0xff] %v1387_v59 }
 0x3ed   : > { %v1420_v62 = vpop.trf.xlu1  ;;  %v1388_v63 = vpop.trf.xlu0  ;;  %1534 = vxpose.xlu1.b32.cont [13/16] %v571_v60, 128  ;;  %1502 = vxpose.xlu0.b32.cont [13/16] %v570_v61, 128  ;;  %v573_v60 = vld [vmem:[%s3082_s5 + $0xc18] sm:$0xff]  ;;  %v572_v61 = vld [vmem:[%s3082_s5 + $0xc10] sm:$0xff] }
 0x3ee   : > { %2209 = vst [vmem:[%s3155_s22 + $0xe70] sm:$0xff] %v1420_v62  ;;  %2161 = vst [vmem:[%s3155_s22 + $0xcf0] sm:$0xff] %v1388_v63 }
 0x3f1   : > { %v1421_v2 = vpop.trf.xlu1  ;;  %v1389_v3 = vpop.trf.xlu0  ;;  %1535 = vxpose.xlu1.b32.cont [14/16] %v575_v0, 128  ;;  %1503 = vxpose.xlu0.b32.cont [14/16] %v574_v1, 128  ;;  %v577_v0 = vld [vmem:[%s3082_s5 + $0xc38] sm:$0xff]  ;;  %v576_v1 = vld [vmem:[%s3082_s5 + $0xc30] sm:$0xff] }
 0x3f2   : > { %2212 = vst [vmem:[%s3155_s22 + $0xe88] sm:$0xff] %v1421_v2  ;;  %2164 = vst [vmem:[%s3155_s22 + $0xd08] sm:$0xff] %v1389_v3 }
 0x3f5   : > { %v1422_v6 = vpop.trf.xlu1  ;;  %v1390_v7 = vpop.trf.xlu0  ;;  %1536 = vxpose.xlu1.b32.cont [15/16] %v579_v4, 128  ;;  %1504 = vxpose.xlu0.b32.cont [15/16] %v578_v5, 128  ;;  %v581_v4 = vld [vmem:[%s3082_s5 + $0xc58] sm:$0xff]  ;;  %v580_v5 = vld [vmem:[%s3082_s5 + $0xc50] sm:$0xff] }
 0x3f6   : > { %2215 = vst [vmem:[%s3155_s22 + $0xea0] sm:$0xff] %v1422_v6  ;;  %2167 = vst [vmem:[%s3155_s22 + $0xd20] sm:$0xff] %v1390_v7 }
 0x3f9   : > { %v1423_v10 = vpop.trf.xlu1  ;;  %v1391_v11 = vpop.trf.xlu0  ;;  %1537 = vxpose.xlu1.b32.end [16/16] %v583_v8, 128  ;;  %1505 = vxpose.xlu0.b32.end [16/16] %v582_v9, 128  ;;  %v585_v8 = vld [vmem:[%s3082_s5 + $0xc78] sm:$0xff]  ;;  %v584_v9 = vld [vmem:[%s3082_s5 + $0xc70] sm:$0xff] }
 0x3fa   : > { %2218 = vst [vmem:[%s3155_s22 + $0xeb8] sm:$0xff] %v1423_v10  ;;  %2170 = vst [vmem:[%s3155_s22 + $0xd38] sm:$0xff] %v1391_v11 }
 0x3fd   : > { %v1424_v14 = vpop.trf.xlu1  ;;  %v1392_v15 = vpop.trf.xlu0  ;;  %1586 = vxpose.xlu1.b32.start [1/16] %v525_v12, 128  ;;  %1554 = vxpose.xlu0.b32.start [1/16] %v524_v13, 128  ;;  %v587_v12 = vld [vmem:[%s3082_s5 + $0xc88] sm:$0xff]  ;;  %v586_v13 = vld [vmem:[%s3082_s5 + $0xc80] sm:$0xff] }
 0x3fe   : > { %2221 = vst [vmem:[%s3155_s22 + $0xed0] sm:$0xff] %v1424_v14  ;;  %2173 = vst [vmem:[%s3155_s22 + $0xd50] sm:$0xff] %v1392_v15 }
 0x401   : > { %v1425_v18 = vpop.trf.xlu1  ;;  %v1393_v19 = vpop.trf.xlu0  ;;  %1587 = vxpose.xlu1.b32.cont [2/16] %v529_v16, 128  ;;  %1555 = vxpose.xlu0.b32.cont [2/16] %v528_v17, 128  ;;  %v591_v16 = vld [vmem:[%s3082_s5 + $0xca8] sm:$0xff]  ;;  %v590_v17 = vld [vmem:[%s3082_s5 + $0xca0] sm:$0xff] }
 0x402   : > { %2224 = vst [vmem:[%s3155_s22 + $0xee8] sm:$0xff] %v1425_v18  ;;  %2176 = vst [vmem:[%s3155_s22 + $0xd68] sm:$0xff] %v1393_v19 }
 0x405   : > { %v1474_v22 = vpop.trf.xlu1  ;;  %v1442_v23 = vpop.trf.xlu0  ;;  %1588 = vxpose.xlu1.b32.cont [3/16] %v533_v20, 128  ;;  %1556 = vxpose.xlu0.b32.cont [3/16] %v532_v21, 128 }
 0x406   : > { %2275 = vst [vmem:[%s3155_s22 + $0x1080] sm:$0xff] %v1474_v22  ;;  %2227 = vst [vmem:[%s3155_s22 + $0xf00] sm:$0xff] %v1442_v23 }
 0x409   : > { %v1475_v26 = vpop.trf.xlu1  ;;  %v1443_v27 = vpop.trf.xlu0  ;;  %1589 = vxpose.xlu1.b32.cont [4/16] %v537_v24, 128  ;;  %1557 = vxpose.xlu0.b32.cont [4/16] %v536_v25, 128 }
 0x40a   : > { %2278 = vst [vmem:[%s3155_s22 + $0x1098] sm:$0xff] %v1475_v26  ;;  %2230 = vst [vmem:[%s3155_s22 + $0xf18] sm:$0xff] %v1443_v27 }
 0x40d   : > { %v1476_v30 = vpop.trf.xlu1  ;;  %v1444_v31 = vpop.trf.xlu0  ;;  %1590 = vxpose.xlu1.b32.cont [5/16] %v541_v28, 128  ;;  %1558 = vxpose.xlu0.b32.cont [5/16] %v540_v29, 128 }
 0x40e   : > { %2281 = vst [vmem:[%s3155_s22 + $0x10b0] sm:$0xff] %v1476_v30  ;;  %2233 = vst [vmem:[%s3155_s22 + $0xf30] sm:$0xff] %v1444_v31 }
 0x411   : > { %v1477_v34 = vpop.trf.xlu1  ;;  %v1445_v35 = vpop.trf.xlu0  ;;  %1591 = vxpose.xlu1.b32.cont [6/16] %v545_v32, 128  ;;  %1559 = vxpose.xlu0.b32.cont [6/16] %v544_v33, 128 }
 0x412   : > { %2284 = vst [vmem:[%s3155_s22 + $0x10c8] sm:$0xff] %v1477_v34  ;;  %2236 = vst [vmem:[%s3155_s22 + $0xf48] sm:$0xff] %v1445_v35 }
 0x415   : > { %v1478_v38 = vpop.trf.xlu1  ;;  %v1446_v39 = vpop.trf.xlu0  ;;  %1592 = vxpose.xlu1.b32.cont [7/16] %v549_v36, 128  ;;  %1560 = vxpose.xlu0.b32.cont [7/16] %v548_v37, 128 }
 0x416   : > { %2287 = vst [vmem:[%s3155_s22 + $0x10e0] sm:$0xff] %v1478_v38  ;;  %2239 = vst [vmem:[%s3155_s22 + $0xf60] sm:$0xff] %v1446_v39 }
 0x419   : > { %v1479_v42 = vpop.trf.xlu1  ;;  %v1447_v43 = vpop.trf.xlu0  ;;  %1593 = vxpose.xlu1.b32.cont [8/16] %v553_v40, 128  ;;  %1561 = vxpose.xlu0.b32.cont [8/16] %v552_v41, 128 }
 0x41a   : > { %2290 = vst [vmem:[%s3155_s22 + $0x10f8] sm:$0xff] %v1479_v42  ;;  %2242 = vst [vmem:[%s3155_s22 + $0xf78] sm:$0xff] %v1447_v43 }
 0x41d   : > { %v1480_v46 = vpop.trf.xlu1  ;;  %v1448_v47 = vpop.trf.xlu0  ;;  %1594 = vxpose.xlu1.b32.cont [9/16] %v557_v44, 128  ;;  %1562 = vxpose.xlu0.b32.cont [9/16] %v556_v45, 128 }
 0x41e   : > { %2293 = vst [vmem:[%s3155_s22 + $0x1110] sm:$0xff] %v1480_v46  ;;  %2245 = vst [vmem:[%s3155_s22 + $0xf90] sm:$0xff] %v1448_v47 }
 0x421   : > { %v1481_v50 = vpop.trf.xlu1  ;;  %v1449_v51 = vpop.trf.xlu0  ;;  %1595 = vxpose.xlu1.b32.cont [10/16] %v561_v48, 128  ;;  %1563 = vxpose.xlu0.b32.cont [10/16] %v560_v49, 128  ;;  %v589_v48 = vld [vmem:[%s3082_s5 + $0xc98] sm:$0xff]  ;;  %v588_v49 = vld [vmem:[%s3082_s5 + $0xc90] sm:$0xff] }
 0x422   : > { %2296 = vst [vmem:[%s3155_s22 + $0x1128] sm:$0xff] %v1481_v50  ;;  %2248 = vst [vmem:[%s3155_s22 + $0xfa8] sm:$0xff] %v1449_v51 }
 0x425   : > { %v1482_v54 = vpop.trf.xlu1  ;;  %v1450_v55 = vpop.trf.xlu0  ;;  %1596 = vxpose.xlu1.b32.cont [11/16] %v565_v52, 128  ;;  %1564 = vxpose.xlu0.b32.cont [11/16] %v564_v53, 128  ;;  %v593_v52 = vld [vmem:[%s3082_s5 + $0xcb8] sm:$0xff]  ;;  %v592_v53 = vld [vmem:[%s3082_s5 + $0xcb0] sm:$0xff] }
 0x426   : > { %2299 = vst [vmem:[%s3155_s22 + $0x1140] sm:$0xff] %v1482_v54  ;;  %2251 = vst [vmem:[%s3155_s22 + $0xfc0] sm:$0xff] %v1450_v55 }
 0x429   : > { %v1483_v58 = vpop.trf.xlu1  ;;  %v1451_v59 = vpop.trf.xlu0  ;;  %1597 = vxpose.xlu1.b32.cont [12/16] %v569_v56, 128  ;;  %1565 = vxpose.xlu0.b32.cont [12/16] %v568_v57, 128 }
 0x42a   : > { %2302 = vst [vmem:[%s3155_s22 + $0x1158] sm:$0xff] %v1483_v58  ;;  %2254 = vst [vmem:[%s3155_s22 + $0xfd8] sm:$0xff] %v1451_v59 }
 0x42d   : > { %v1484_v62 = vpop.trf.xlu1  ;;  %v1452_v63 = vpop.trf.xlu0  ;;  %1598 = vxpose.xlu1.b32.cont [13/16] %v573_v60, 128  ;;  %1566 = vxpose.xlu0.b32.cont [13/16] %v572_v61, 128 }
 0x42e   : > { %2305 = vst [vmem:[%s3155_s22 + $0x1170] sm:$0xff] %v1484_v62  ;;  %2257 = vst [vmem:[%s3155_s22 + $0xff0] sm:$0xff] %v1452_v63 }
 0x431   : > { %v1485_v2 = vpop.trf.xlu1  ;;  %v1453_v3 = vpop.trf.xlu0  ;;  %1599 = vxpose.xlu1.b32.cont [14/16] %v577_v0, 128  ;;  %1567 = vxpose.xlu0.b32.cont [14/16] %v576_v1, 128 }
 0x432   : > { %2308 = vst [vmem:[%s3155_s22 + $0x1188] sm:$0xff] %v1485_v2  ;;  %2260 = vst [vmem:[%s3155_s22 + $0x1008] sm:$0xff] %v1453_v3 }
 0x435   : > { %v1486_v6 = vpop.trf.xlu1  ;;  %v1454_v7 = vpop.trf.xlu0  ;;  %1600 = vxpose.xlu1.b32.cont [15/16] %v581_v4, 128  ;;  %1568 = vxpose.xlu0.b32.cont [15/16] %v580_v5, 128 }
 0x436   : > { %2311 = vst [vmem:[%s3155_s22 + $0x11a0] sm:$0xff] %v1486_v6  ;;  %2263 = vst [vmem:[%s3155_s22 + $0x1020] sm:$0xff] %v1454_v7 }
 0x439   : > { %v1487_v10 = vpop.trf.xlu1  ;;  %v1455_v11 = vpop.trf.xlu0  ;;  %1601 = vxpose.xlu1.b32.end [16/16] %v585_v8, 128  ;;  %1569 = vxpose.xlu0.b32.end [16/16] %v584_v9, 128 }
 0x43a   : > { %2314 = vst [vmem:[%s3155_s22 + $0x11b8] sm:$0xff] %v1487_v10  ;;  %2266 = vst [vmem:[%s3155_s22 + $0x1038] sm:$0xff] %v1455_v11 }
 0x43d   : > { %v1488_v14 = vpop.trf.xlu1  ;;  %v1456_v15 = vpop.trf.xlu0  ;;  %1650 = vxpose.xlu1.b32.start [1/2] (short) %v587_v12, 128  ;;  %1618 = vxpose.xlu0.b32.start [1/2] (short) %v586_v13, 128 }
 0x43e   : > { %2317 = vst [vmem:[%s3155_s22 + $0x11d0] sm:$0xff] %v1488_v14  ;;  %2269 = vst [vmem:[%s3155_s22 + $0x1050] sm:$0xff] %v1456_v15 }
 0x441   : > { %v1489_v18 = vpop.trf.xlu1  ;;  %v1457_v19 = vpop.trf.xlu0  ;;  %1651 = vxpose.xlu1.b32.end [2/2] (short) %v591_v16, 128  ;;  %1619 = vxpose.xlu0.b32.end [2/2] (short) %v590_v17, 128 }
 0x442   : > { %2320 = vst [vmem:[%s3155_s22 + $0x11e8] sm:$0xff] %v1489_v18  ;;  %2272 = vst [vmem:[%s3155_s22 + $0x1068] sm:$0xff] %v1457_v19 }
 0x445   : > { %v1538_v20 = vpop.trf.xlu1  ;;  %v1506_v21 = vpop.trf.xlu0 }
 0x446   : > { %2180 = vst [vmem:[%s3155_s22 + $0xd88] sm:$0xff] %v1538_v20  ;;  %2132 = vst [vmem:[%s3155_s22 + $0xc08] sm:$0xff] %v1506_v21 }
 0x449   : > { %v1539_v22 = vpop.trf.xlu1  ;;  %v1507_v23 = vpop.trf.xlu0 }
 0x44a   : > { %2183 = vst [vmem:[%s3155_s22 + $0xda0] sm:$0xff] %v1539_v22  ;;  %2135 = vst [vmem:[%s3155_s22 + $0xc20] sm:$0xff] %v1507_v23 }
 0x44d   : > { %v1540_v24 = vpop.trf.xlu1  ;;  %v1508_v25 = vpop.trf.xlu0 }
 0x44e   : > { %2186 = vst [vmem:[%s3155_s22 + $0xdb8] sm:$0xff] %v1540_v24  ;;  %2138 = vst [vmem:[%s3155_s22 + $0xc38] sm:$0xff] %v1508_v25 }
 0x451   : > { %v1541_v26 = vpop.trf.xlu1  ;;  %v1509_v27 = vpop.trf.xlu0 }
 0x452   : > { %2189 = vst [vmem:[%s3155_s22 + $0xdd0] sm:$0xff] %v1541_v26  ;;  %2141 = vst [vmem:[%s3155_s22 + $0xc50] sm:$0xff] %v1509_v27 }
 0x455   : > { %v1542_v28 = vpop.trf.xlu1  ;;  %v1510_v29 = vpop.trf.xlu0 }
 0x456   : > { %2192 = vst [vmem:[%s3155_s22 + $0xde8] sm:$0xff] %v1542_v28  ;;  %2144 = vst [vmem:[%s3155_s22 + $0xc68] sm:$0xff] %v1510_v29 }
 0x459   : > { %v1543_v30 = vpop.trf.xlu1  ;;  %v1511_v31 = vpop.trf.xlu0 }
 0x45a   : > { %2195 = vst [vmem:[%s3155_s22 + $0xe00] sm:$0xff] %v1543_v30  ;;  %2147 = vst [vmem:[%s3155_s22 + $0xc80] sm:$0xff] %v1511_v31 }
 0x45d   : > { %v1544_v32 = vpop.trf.xlu1  ;;  %v1512_v33 = vpop.trf.xlu0 }
 0x45e   : > { %2198 = vst [vmem:[%s3155_s22 + $0xe18] sm:$0xff] %v1544_v32  ;;  %2150 = vst [vmem:[%s3155_s22 + $0xc98] sm:$0xff] %v1512_v33 }
 0x461   : > { %v1545_v34 = vpop.trf.xlu1  ;;  %v1513_v35 = vpop.trf.xlu0 }
 0x462   : > { %2201 = vst [vmem:[%s3155_s22 + $0xe30] sm:$0xff] %v1545_v34  ;;  %2153 = vst [vmem:[%s3155_s22 + $0xcb0] sm:$0xff] %v1513_v35 }
 0x465   : > { %v1546_v36 = vpop.trf.xlu1  ;;  %v1514_v37 = vpop.trf.xlu0 }
 0x466   : > { %2204 = vst [vmem:[%s3155_s22 + $0xe48] sm:$0xff] %v1546_v36  ;;  %2156 = vst [vmem:[%s3155_s22 + $0xcc8] sm:$0xff] %v1514_v37 }
 0x469   : > { %v1547_v38 = vpop.trf.xlu1  ;;  %v1515_v39 = vpop.trf.xlu0 }
 0x46a   : > { %2207 = vst [vmem:[%s3155_s22 + $0xe60] sm:$0xff] %v1547_v38  ;;  %2159 = vst [vmem:[%s3155_s22 + $0xce0] sm:$0xff] %v1515_v39 }
 0x46d   : > { %v1548_v40 = vpop.trf.xlu1  ;;  %v1516_v41 = vpop.trf.xlu0 }
 0x46e   : > { %2210 = vst [vmem:[%s3155_s22 + $0xe78] sm:$0xff] %v1548_v40  ;;  %2162 = vst [vmem:[%s3155_s22 + $0xcf8] sm:$0xff] %v1516_v41 }
 0x471   : > { %v1549_v42 = vpop.trf.xlu1  ;;  %v1517_v43 = vpop.trf.xlu0 }
 0x472   : > { %2213 = vst [vmem:[%s3155_s22 + $0xe90] sm:$0xff] %v1549_v42  ;;  %2165 = vst [vmem:[%s3155_s22 + $0xd10] sm:$0xff] %v1517_v43 }
 0x475   : > { %v1550_v44 = vpop.trf.xlu1  ;;  %v1518_v45 = vpop.trf.xlu0 }
 0x476   : > { %2216 = vst [vmem:[%s3155_s22 + $0xea8] sm:$0xff] %v1550_v44  ;;  %2168 = vst [vmem:[%s3155_s22 + $0xd28] sm:$0xff] %v1518_v45 }
 0x479   : > { %v1551_v46 = vpop.trf.xlu1  ;;  %v1519_v47 = vpop.trf.xlu0 }
 0x47a   : > { %2219 = vst [vmem:[%s3155_s22 + $0xec0] sm:$0xff] %v1551_v46  ;;  %2171 = vst [vmem:[%s3155_s22 + $0xd40] sm:$0xff] %v1519_v47 }
 0x47d   : > { %v1552_v50 = vpop.trf.xlu1  ;;  %v1520_v51 = vpop.trf.xlu0  ;;  %1714 = vxpose.xlu1.b32.start [1/2] (short) %v589_v48, 128  ;;  %1682 = vxpose.xlu0.b32.start [1/2] (short) %v588_v49, 128 }
 0x47e   : > { %2222 = vst [vmem:[%s3155_s22 + $0xed8] sm:$0xff] %v1552_v50  ;;  %2174 = vst [vmem:[%s3155_s22 + $0xd58] sm:$0xff] %v1520_v51 }
 0x481   : > { %v1553_v54 = vpop.trf.xlu1  ;;  %v1521_v55 = vpop.trf.xlu0  ;;  %1715 = vxpose.xlu1.b32.end [2/2] (short) %v593_v52, 128  ;;  %1683 = vxpose.xlu0.b32.end [2/2] (short) %v592_v53, 128 }
 0x482   : > { %2225 = vst [vmem:[%s3155_s22 + $0xef0] sm:$0xff] %v1553_v54  ;;  %2177 = vst [vmem:[%s3155_s22 + $0xd70] sm:$0xff] %v1521_v55 }
 0x485   : > { %v1602_v56 = vpop.trf.xlu1  ;;  %v1570_v57 = vpop.trf.xlu0 }
 0x486   : > { %2276 = vst [vmem:[%s3155_s22 + $0x1088] sm:$0xff] %v1602_v56  ;;  %2228 = vst [vmem:[%s3155_s22 + $0xf08] sm:$0xff] %v1570_v57 }
 0x489   : > { %v1603_v58 = vpop.trf.xlu1  ;;  %v1571_v59 = vpop.trf.xlu0 }
 0x48a   : > { %2279 = vst [vmem:[%s3155_s22 + $0x10a0] sm:$0xff] %v1603_v58  ;;  %2231 = vst [vmem:[%s3155_s22 + $0xf20] sm:$0xff] %v1571_v59 }
 0x48d   : > { %v1604_v60 = vpop.trf.xlu1  ;;  %v1572_v61 = vpop.trf.xlu0 }
 0x48e   : > { %2282 = vst [vmem:[%s3155_s22 + $0x10b8] sm:$0xff] %v1604_v60  ;;  %2234 = vst [vmem:[%s3155_s22 + $0xf38] sm:$0xff] %v1572_v61 }
 0x491   : > { %v1605_v62 = vpop.trf.xlu1  ;;  %v1573_v63 = vpop.trf.xlu0 }
 0x492   : > { %2285 = vst [vmem:[%s3155_s22 + $0x10d0] sm:$0xff] %v1605_v62  ;;  %2237 = vst [vmem:[%s3155_s22 + $0xf50] sm:$0xff] %v1573_v63 }
 0x495   : > { %v1606_v0 = vpop.trf.xlu1  ;;  %v1574_v1 = vpop.trf.xlu0 }
 0x496   : > { %2288 = vst [vmem:[%s3155_s22 + $0x10e8] sm:$0xff] %v1606_v0  ;;  %2240 = vst [vmem:[%s3155_s22 + $0xf68] sm:$0xff] %v1574_v1 }
 0x499   : > { %v1607_v2 = vpop.trf.xlu1  ;;  %v1575_v3 = vpop.trf.xlu0 }
 0x49a   : > { %2291 = vst [vmem:[%s3155_s22 + $0x1100] sm:$0xff] %v1607_v2  ;;  %2243 = vst [vmem:[%s3155_s22 + $0xf80] sm:$0xff] %v1575_v3 }
 0x49d   : > { %v1608_v4 = vpop.trf.xlu1  ;;  %v1576_v5 = vpop.trf.xlu0 }
 0x49e   : > { %2294 = vst [vmem:[%s3155_s22 + $0x1118] sm:$0xff] %v1608_v4  ;;  %2246 = vst [vmem:[%s3155_s22 + $0xf98] sm:$0xff] %v1576_v5 }
 0x4a1   : > { %v1609_v6 = vpop.trf.xlu1  ;;  %v1577_v7 = vpop.trf.xlu0 }
 0x4a2   : > { %2297 = vst [vmem:[%s3155_s22 + $0x1130] sm:$0xff] %v1609_v6  ;;  %2249 = vst [vmem:[%s3155_s22 + $0xfb0] sm:$0xff] %v1577_v7 }
 0x4a5   : > { %v1610_v8 = vpop.trf.xlu1  ;;  %v1578_v9 = vpop.trf.xlu0 }
 0x4a6   : > { %2300 = vst [vmem:[%s3155_s22 + $0x1148] sm:$0xff] %v1610_v8  ;;  %2252 = vst [vmem:[%s3155_s22 + $0xfc8] sm:$0xff] %v1578_v9 }
 0x4a9   : > { %v1611_v10 = vpop.trf.xlu1  ;;  %v1579_v11 = vpop.trf.xlu0 }
 0x4aa   : > { %2303 = vst [vmem:[%s3155_s22 + $0x1160] sm:$0xff] %v1611_v10  ;;  %2255 = vst [vmem:[%s3155_s22 + $0xfe0] sm:$0xff] %v1579_v11 }
 0x4ad   : > { %v1612_v12 = vpop.trf.xlu1  ;;  %v1580_v13 = vpop.trf.xlu0 }
 0x4ae   : > { %2306 = vst [vmem:[%s3155_s22 + $0x1178] sm:$0xff] %v1612_v12  ;;  %2258 = vst [vmem:[%s3155_s22 + $0xff8] sm:$0xff] %v1580_v13 }
 0x4b1   : > { %v1613_v14 = vpop.trf.xlu1  ;;  %v1581_v15 = vpop.trf.xlu0 }
 0x4b2   : > { %2309 = vst [vmem:[%s3155_s22 + $0x1190] sm:$0xff] %v1613_v14  ;;  %2261 = vst [vmem:[%s3155_s22 + $0x1010] sm:$0xff] %v1581_v15 }
 0x4b5   : > { %v1614_v16 = vpop.trf.xlu1  ;;  %v1582_v17 = vpop.trf.xlu0 }
 0x4b6   : > { %2312 = vst [vmem:[%s3155_s22 + $0x11a8] sm:$0xff] %v1614_v16  ;;  %2264 = vst [vmem:[%s3155_s22 + $0x1028] sm:$0xff] %v1582_v17 }
 0x4b9   : > { %v1615_v18 = vpop.trf.xlu1  ;;  %v1583_v19 = vpop.trf.xlu0 }
 0x4ba   : > { %2315 = vst [vmem:[%s3155_s22 + $0x11c0] sm:$0xff] %v1615_v18  ;;  %2267 = vst [vmem:[%s3155_s22 + $0x1040] sm:$0xff] %v1583_v19 }
 0x4bd   : > { %v1616_v20 = vpop.trf.xlu1  ;;  %v1584_v21 = vpop.trf.xlu0 }
 0x4be   : > { %2318 = vst [vmem:[%s3155_s22 + $0x11d8] sm:$0xff] %v1616_v20  ;;  %2270 = vst [vmem:[%s3155_s22 + $0x1058] sm:$0xff] %v1584_v21 }
 0x4c1   : > { %v1617_v22 = vpop.trf.xlu1  ;;  %v1585_v23 = vpop.trf.xlu0 }
 0x4c2   : > { %2321 = vst [vmem:[%s3155_s22 + $0x11f0] sm:$0xff] %v1617_v22  ;;  %2273 = vst [vmem:[%s3155_s22 + $0x1070] sm:$0xff] %v1585_v23 }
 0x4c5   : > { %v1666_v24 = vpop.trf.xlu1  ;;  %v1634_v25 = vpop.trf.xlu0 }
 0x4c6   : > { %2181 = vst.msk [vmem:[%s3155_s22 + $0xd90] sm:$0xff] %vm1748_vm0, %v1666_v24  ;;  %2133 = vst.msk [vmem:[%s3155_s22 + $0xc10] sm:$0xff] %vm1748_vm0, %v1634_v25 }
 0x4c9   : > { %v1667_v26 = vpop.trf.xlu1  ;;  %v1635_v27 = vpop.trf.xlu0 }
 0x4ca   : > { %2184 = vst.msk [vmem:[%s3155_s22 + $0xda8] sm:$0xff] %vm1748_vm0, %v1667_v26  ;;  %2136 = vst.msk [vmem:[%s3155_s22 + $0xc28] sm:$0xff] %vm1748_vm0, %v1635_v27 }
 0x4cd   : > { %v1668_v28 = vpop.trf.xlu1  ;;  %v1636_v29 = vpop.trf.xlu0 }
 0x4ce   : > { %2187 = vst.msk [vmem:[%s3155_s22 + $0xdc0] sm:$0xff] %vm1748_vm0, %v1668_v28  ;;  %2139 = vst.msk [vmem:[%s3155_s22 + $0xc40] sm:$0xff] %vm1748_vm0, %v1636_v29 }
 0x4d1   : > { %v1669_v30 = vpop.trf.xlu1  ;;  %v1637_v31 = vpop.trf.xlu0 }
 0x4d2   : > { %2190 = vst.msk [vmem:[%s3155_s22 + $0xdd8] sm:$0xff] %vm1748_vm0, %v1669_v30  ;;  %2142 = vst.msk [vmem:[%s3155_s22 + $0xc58] sm:$0xff] %vm1748_vm0, %v1637_v31 }
 0x4d5   : > { %v1670_v32 = vpop.trf.xlu1  ;;  %v1638_v33 = vpop.trf.xlu0 }
 0x4d6   : > { %2193 = vst.msk [vmem:[%s3155_s22 + $0xdf0] sm:$0xff] %vm1748_vm0, %v1670_v32  ;;  %2145 = vst.msk [vmem:[%s3155_s22 + $0xc70] sm:$0xff] %vm1748_vm0, %v1638_v33 }
 0x4d9   : > { %v1671_v34 = vpop.trf.xlu1  ;;  %v1639_v35 = vpop.trf.xlu0 }
 0x4da   : > { %2196 = vst.msk [vmem:[%s3155_s22 + $0xe08] sm:$0xff] %vm1748_vm0, %v1671_v34  ;;  %2148 = vst.msk [vmem:[%s3155_s22 + $0xc88] sm:$0xff] %vm1748_vm0, %v1639_v35 }
 0x4dd   : > { %v1672_v36 = vpop.trf.xlu1  ;;  %v1640_v37 = vpop.trf.xlu0 }
 0x4de   : > { %2199 = vst.msk [vmem:[%s3155_s22 + $0xe20] sm:$0xff] %vm1748_vm0, %v1672_v36  ;;  %2151 = vst.msk [vmem:[%s3155_s22 + $0xca0] sm:$0xff] %vm1748_vm0, %v1640_v37 }
 0x4e1   : > { %v1673_v38 = vpop.trf.xlu1  ;;  %v1641_v39 = vpop.trf.xlu0 }
 0x4e2   : > { %2202 = vst.msk [vmem:[%s3155_s22 + $0xe38] sm:$0xff] %vm1748_vm0, %v1673_v38  ;;  %2154 = vst.msk [vmem:[%s3155_s22 + $0xcb8] sm:$0xff] %vm1748_vm0, %v1641_v39 }
 0x4e5   : > { %v1674_v40 = vpop.trf.xlu1  ;;  %v1642_v41 = vpop.trf.xlu0 }
 0x4e6   : > { %2205 = vst.msk [vmem:[%s3155_s22 + $0xe50] sm:$0xff] %vm1748_vm0, %v1674_v40  ;;  %2157 = vst.msk [vmem:[%s3155_s22 + $0xcd0] sm:$0xff] %vm1748_vm0, %v1642_v41 }
 0x4e9   : > { %v1675_v42 = vpop.trf.xlu1  ;;  %v1643_v43 = vpop.trf.xlu0 }
 0x4ea   : > { %2208 = vst.msk [vmem:[%s3155_s22 + $0xe68] sm:$0xff] %vm1748_vm0, %v1675_v42  ;;  %2160 = vst.msk [vmem:[%s3155_s22 + $0xce8] sm:$0xff] %vm1748_vm0, %v1643_v43 }
 0x4ed   : > { %v1676_v44 = vpop.trf.xlu1  ;;  %v1644_v45 = vpop.trf.xlu0 }
 0x4ee   : > { %2211 = vst.msk [vmem:[%s3155_s22 + $0xe80] sm:$0xff] %vm1748_vm0, %v1676_v44  ;;  %2163 = vst.msk [vmem:[%s3155_s22 + $0xd00] sm:$0xff] %vm1748_vm0, %v1644_v45 }
 0x4f1   : > { %v1677_v46 = vpop.trf.xlu1  ;;  %v1645_v47 = vpop.trf.xlu0 }
 0x4f2   : > { %2214 = vst.msk [vmem:[%s3155_s22 + $0xe98] sm:$0xff] %vm1748_vm0, %v1677_v46  ;;  %2166 = vst.msk [vmem:[%s3155_s22 + $0xd18] sm:$0xff] %vm1748_vm0, %v1645_v47 }
 0x4f5   : > { %v1678_v48 = vpop.trf.xlu1  ;;  %v1646_v49 = vpop.trf.xlu0 }
 0x4f6   : > { %2217 = vst.msk [vmem:[%s3155_s22 + $0xeb0] sm:$0xff] %vm1748_vm0, %v1678_v48  ;;  %2169 = vst.msk [vmem:[%s3155_s22 + $0xd30] sm:$0xff] %vm1748_vm0, %v1646_v49 }
 0x4f9   : > { %v1679_v50 = vpop.trf.xlu1  ;;  %v1647_v51 = vpop.trf.xlu0 }
 0x4fa   : > { %2220 = vst.msk [vmem:[%s3155_s22 + $0xec8] sm:$0xff] %vm1748_vm0, %v1679_v50  ;;  %2172 = vst.msk [vmem:[%s3155_s22 + $0xd48] sm:$0xff] %vm1748_vm0, %v1647_v51 }
 0x4fd   : > { %v1680_v52 = vpop.trf.xlu1  ;;  %v1648_v53 = vpop.trf.xlu0 }
 0x4fe   : > { %2223 = vst.msk [vmem:[%s3155_s22 + $0xee0] sm:$0xff] %vm1748_vm0, %v1680_v52  ;;  %2175 = vst.msk [vmem:[%s3155_s22 + $0xd60] sm:$0xff] %vm1748_vm0, %v1648_v53 }
 0x501   : > { %v1681_v54 = vpop.trf.xlu1  ;;  %v1649_v55 = vpop.trf.xlu0 }
 0x502   : > { %2226 = vst.msk [vmem:[%s3155_s22 + $0xef8] sm:$0xff] %vm1748_vm0, %v1681_v54  ;;  %2178 = vst.msk [vmem:[%s3155_s22 + $0xd78] sm:$0xff] %vm1748_vm0, %v1649_v55 }
 0x505   : > { %v1730_v56 = vpop.trf.xlu1  ;;  %v1698_v57 = vpop.trf.xlu0 }
 0x506   : > { %2277 = vst.msk [vmem:[%s3155_s22 + $0x1090] sm:$0xff] %vm1748_vm0, %v1730_v56  ;;  %2229 = vst.msk [vmem:[%s3155_s22 + $0xf10] sm:$0xff] %vm1748_vm0, %v1698_v57 }
 0x509   : > { %v1731_v58 = vpop.trf.xlu1  ;;  %v1699_v59 = vpop.trf.xlu0 }
 0x50a   : > { %2280 = vst.msk [vmem:[%s3155_s22 + $0x10a8] sm:$0xff] %vm1748_vm0, %v1731_v58  ;;  %2232 = vst.msk [vmem:[%s3155_s22 + $0xf28] sm:$0xff] %vm1748_vm0, %v1699_v59 }
 0x50d   : > { %v1732_v60 = vpop.trf.xlu1  ;;  %v1700_v61 = vpop.trf.xlu0 }
 0x50e   : > { %2283 = vst.msk [vmem:[%s3155_s22 + $0x10c0] sm:$0xff] %vm1748_vm0, %v1732_v60  ;;  %2235 = vst.msk [vmem:[%s3155_s22 + $0xf40] sm:$0xff] %vm1748_vm0, %v1700_v61 }
 0x511   : > { %v1733_v62 = vpop.trf.xlu1  ;;  %v1701_v63 = vpop.trf.xlu0 }
 0x512   : > { %2286 = vst.msk [vmem:[%s3155_s22 + $0x10d8] sm:$0xff] %vm1748_vm0, %v1733_v62  ;;  %2238 = vst.msk [vmem:[%s3155_s22 + $0xf58] sm:$0xff] %vm1748_vm0, %v1701_v63 }
 0x515   : > { %v1734_v0 = vpop.trf.xlu1  ;;  %v1702_v1 = vpop.trf.xlu0 }
 0x516   : > { %2289 = vst.msk [vmem:[%s3155_s22 + $0x10f0] sm:$0xff] %vm1748_vm0, %v1734_v0  ;;  %2241 = vst.msk [vmem:[%s3155_s22 + $0xf70] sm:$0xff] %vm1748_vm0, %v1702_v1 }
 0x519   : > { %v1735_v2 = vpop.trf.xlu1  ;;  %v1703_v3 = vpop.trf.xlu0 }
 0x51a   : > { %2292 = vst.msk [vmem:[%s3155_s22 + $0x1108] sm:$0xff] %vm1748_vm0, %v1735_v2  ;;  %2244 = vst.msk [vmem:[%s3155_s22 + $0xf88] sm:$0xff] %vm1748_vm0, %v1703_v3 }
 0x51d   : > { %v1736_v4 = vpop.trf.xlu1  ;;  %v1704_v5 = vpop.trf.xlu0 }
 0x51e   : > { %2295 = vst.msk [vmem:[%s3155_s22 + $0x1120] sm:$0xff] %vm1748_vm0, %v1736_v4  ;;  %2247 = vst.msk [vmem:[%s3155_s22 + $0xfa0] sm:$0xff] %vm1748_vm0, %v1704_v5 }
 0x521   : > { %v1737_v6 = vpop.trf.xlu1  ;;  %v1705_v7 = vpop.trf.xlu0 }
 0x522   : > { %2298 = vst.msk [vmem:[%s3155_s22 + $0x1138] sm:$0xff] %vm1748_vm0, %v1737_v6  ;;  %2250 = vst.msk [vmem:[%s3155_s22 + $0xfb8] sm:$0xff] %vm1748_vm0, %v1705_v7 }
 0x525   : > { %v1738_v8 = vpop.trf.xlu1  ;;  %v1706_v9 = vpop.trf.xlu0 }
 0x526   : > { %2301 = vst.msk [vmem:[%s3155_s22 + $0x1150] sm:$0xff] %vm1748_vm0, %v1738_v8  ;;  %2253 = vst.msk [vmem:[%s3155_s22 + $0xfd0] sm:$0xff] %vm1748_vm0, %v1706_v9 }
 0x529   : > { %v1739_v10 = vpop.trf.xlu1  ;;  %v1707_v11 = vpop.trf.xlu0 }
 0x52a   : > { %2304 = vst.msk [vmem:[%s3155_s22 + $0x1168] sm:$0xff] %vm1748_vm0, %v1739_v10  ;;  %2256 = vst.msk [vmem:[%s3155_s22 + $0xfe8] sm:$0xff] %vm1748_vm0, %v1707_v11 }
 0x52d   : > { %v1740_v12 = vpop.trf.xlu1  ;;  %v1708_v13 = vpop.trf.xlu0 }
 0x52e   : > { %2307 = vst.msk [vmem:[%s3155_s22 + $0x1180] sm:$0xff] %vm1748_vm0, %v1740_v12  ;;  %2259 = vst.msk [vmem:[%s3155_s22 + $0x1000] sm:$0xff] %vm1748_vm0, %v1708_v13 }
 0x531   : > { %v1741_v14 = vpop.trf.xlu1  ;;  %v1709_v15 = vpop.trf.xlu0 }
 0x532   : > { %2310 = vst.msk [vmem:[%s3155_s22 + $0x1198] sm:$0xff] %vm1748_vm0, %v1741_v14  ;;  %2262 = vst.msk [vmem:[%s3155_s22 + $0x1018] sm:$0xff] %vm1748_vm0, %v1709_v15 }
 0x535   : > { %v1742_v16 = vpop.trf.xlu1  ;;  %v1710_v17 = vpop.trf.xlu0 }
 0x536   : > { %2313 = vst.msk [vmem:[%s3155_s22 + $0x11b0] sm:$0xff] %vm1748_vm0, %v1742_v16  ;;  %2265 = vst.msk [vmem:[%s3155_s22 + $0x1030] sm:$0xff] %vm1748_vm0, %v1710_v17 }
 0x539   : > { %v1743_v18 = vpop.trf.xlu1  ;;  %v1711_v19 = vpop.trf.xlu0 }
 0x53a   : > { %2316 = vst.msk [vmem:[%s3155_s22 + $0x11c8] sm:$0xff] %vm1748_vm0, %v1743_v18  ;;  %2268 = vst.msk [vmem:[%s3155_s22 + $0x1048] sm:$0xff] %vm1748_vm0, %v1711_v19 }
 0x53c   : > { %2329 = sbr.rel (!%p3022_p9) target bundleno = 1423 (0x58f), region = 32 }
 0x53d   : > { %v1744_v20 = vpop.trf.xlu1  ;;  %v1712_v21 = vpop.trf.xlu0 }
 0x53e   : > { %2319 = vst.msk [vmem:[%s3155_s22 + $0x11e0] sm:$0xff] %vm1748_vm0, %v1744_v20  ;;  %2271 = vst.msk [vmem:[%s3155_s22 + $0x1060] sm:$0xff] %vm1748_vm0, %v1712_v21 }
 0x541   : > { %v1745_v22 = vpop.trf.xlu1  ;;  %v1713_v23 = vpop.trf.xlu0 }
 0x542   : > { %2322 = vst.msk [vmem:[%s3155_s22 + $0x11f8] sm:$0xff] %vm1748_vm0, %v1745_v22  ;;  %2274 = vst.msk [vmem:[%s3155_s22 + $0x1078] sm:$0xff] %vm1748_vm0, %v1713_v23 }
 0x543   : > { %s4550_s30 = smov (!%p2334_p8, %s2333_s30), 64 }
 0x544   : > { %s2686_s12 = smul.u32 1152, %s4550_s30 }
 0x546   : > { %p2690_p12 = scmp.eq.s32.totalorder %s2686_s12, 0 }
 0x547   : > { %s4280_s18 = sshrl.u32 (!%p2690_p12), %s4550_s30, 3 }
 0x548   : > { %2347 = sbr.rel (%p2690_p12) target bundleno = 1423 (0x58f), region = 36  ;;  %p2691_p9 = scmp.le.s32.totalorder (!%p2690_p12), %s4280_s18, 0 }
 0x54f   : > { %2616 = sbr.rel (%p2691_p9) target bundleno = 1403 (0x57b), region = 90  ;;  %s4532_s9 = smov (!%p2691_p9), %s4274_s6 }
 0x550   : > { %s4533_s14 = smov (!%p2691_p9), %s3155_s22  ;;  %s4289_s15 = smov (!%p2691_p9), 0  }
 0x551   : > { %s4291_s19 = smov (!%p2691_p9), 0  }
 0x556 LB: >> { %v2360_v24 = vld [vmem:[%s2937_s14] sm:$0xff]  ;;  %v2362_v25 = vld [vmem:[%s2937_s14 + $0x18] sm:$0xff]  ;;  %v2364_v26 = vld [vmem:[%s2937_s14 + $0x30] sm:$0xff]  ;;  %s2504_s20 = sadd.s32 1, %s2941_s15  ;;  %s2354_s19 = sadd.s32 1, %s2945_s19   ;;  %s2945_s19 = sphi %s4291_s19, %s2354_s19   ;;  %s2941_s15 = sphi %s4289_s15, %s4536_s15   ;;  %s2937_s14 = sphi %s4533_s14, %s4535_s14   ;;  %s2933_s9 = sphi %s4532_s9, %s4534_s9  }
 0x557   : >> { %2361 = vst [vmem:[%s2933_s9] sm:$0xff] %v2360_v24  ;;  %2363 = vst [vmem:[%s2933_s9 + $0x18] sm:$0xff] %v2362_v25  ;;  %v2366_v27 = vld [vmem:[%s2937_s14 + $0x48] sm:$0xff]  ;;  %v2368_v28 = vld [vmem:[%s2937_s14 + $0x60] sm:$0xff]  ;;  %p2505_p7 = scmp.ge.s32.totalorder %s2504_s20, %s4280_s18  ;;  %p2353_p10 = scmp.ge.s32.totalorder %s2354_s19, %s4280_s18 }
 0x558   : >> { %2365 = vst [vmem:[%s2933_s9 + $0x30] sm:$0xff] %v2364_v26  ;;  %v2370_v29 = vld [vmem:[%s2937_s14 + $0x78] sm:$0xff]  ;;  %2367 = vst [vmem:[%s2933_s9 + $0x48] sm:$0xff] %v2366_v27  ;;  %v2372_v30 = vld [vmem:[%s2937_s14 + $0x90] sm:$0xff] }
 0x559   : >> { %2369 = vst [vmem:[%s2933_s9 + $0x60] sm:$0xff] %v2368_v28  ;;  %2371 = vst [vmem:[%s2933_s9 + $0x78] sm:$0xff] %v2370_v29  ;;  %v2374_v31 = vld [vmem:[%s2937_s14 + $0xa8] sm:$0xff]  ;;  %v2378_v33 = vld [vmem:[%s2937_s14 + $0x20] sm:$0xff]  ;;  %s4552_s20 = smov (%p2505_p7, %s2504_s20), 0 }
 0x55a   : >> { %v2376_v32 = vld [vmem:[%s2937_s14 + $0x8] sm:$0xff]  ;;  %2373 = vst [vmem:[%s2933_s9 + $0x90] sm:$0xff] %v2372_v30  ;;  %2375 = vst [vmem:[%s2933_s9 + $0xa8] sm:$0xff] %v2374_v31  ;;  %v2380_v34 = vld [vmem:[%s2937_s14 + $0x38] sm:$0xff]  ;;  %s2507_s21 = smul.u32 192, %s4552_s20  ;;  %s4536_s15 = smov %s4552_s20 }
 0x55b   : >> { %2377 = vst [vmem:[%s2933_s9 + $0x8] sm:$0xff] %v2376_v32  ;;  %v2382_v35 = vld [vmem:[%s2937_s14 + $0x50] sm:$0xff]  ;;  %2379 = vst [vmem:[%s2933_s9 + $0x20] sm:$0xff] %v2378_v33  ;;  %v2384_v36 = vld [vmem:[%s2937_s14 + $0x68] sm:$0xff] }
 0x55c   : >> { %2381 = vst [vmem:[%s2933_s9 + $0x38] sm:$0xff] %v2380_v34  ;;  %2383 = vst [vmem:[%s2933_s9 + $0x50] sm:$0xff] %v2382_v35  ;;  %v2386_v37 = vld [vmem:[%s2937_s14 + $0x80] sm:$0xff]  ;;  %v2388_v38 = vld [vmem:[%s2937_s14 + $0x98] sm:$0xff]  ;;  %s4353_s24 = scalar_lea.vmem %s3155_s22, %s2507_s21 [#allocation4]   ;;  %s4356_s26 = scalar_lea.vmem %s4274_s6, %s2507_s21  }
 0x55d   : >> { %2385 = vst [vmem:[%s2933_s9 + $0x68] sm:$0xff] %v2384_v36  ;;  %2387 = vst [vmem:[%s2933_s9 + $0x80] sm:$0xff] %v2386_v37  ;;  %v2390_v39 = vld [vmem:[%s2937_s14 + $0xb0] sm:$0xff]  ;;  %v2394_v41 = vld [vmem:[%s2937_s14 + $0x28] sm:$0xff] }
 0x55e   : >> { %2389 = vst [vmem:[%s2933_s9 + $0x98] sm:$0xff] %v2388_v38  ;;  %v2392_v40 = vld [vmem:[%s2937_s14 + $0x10] sm:$0xff]  ;;  %2391 = vst [vmem:[%s2933_s9 + $0xb0] sm:$0xff] %v2390_v39  ;;  %v2396_v42 = vld [vmem:[%s2937_s14 + $0x40] sm:$0xff] }
 0x55f   : >> { %2393 = vst [vmem:[%s2933_s9 + $0x10] sm:$0xff] %v2392_v40  ;;  %2395 = vst [vmem:[%s2933_s9 + $0x28] sm:$0xff] %v2394_v41  ;;  %v2398_v43 = vld [vmem:[%s2937_s14 + $0x58] sm:$0xff]  ;;  %v2400_v44 = vld [vmem:[%s2937_s14 + $0x70] sm:$0xff] }
 0x560   : >> { %2397 = vst [vmem:[%s2933_s9 + $0x40] sm:$0xff] %v2396_v42  ;;  %2399 = vst [vmem:[%s2933_s9 + $0x58] sm:$0xff] %v2398_v43  ;;  %v2402_v45 = vld [vmem:[%s2937_s14 + $0x88] sm:$0xff]  ;;  %v2404_v46 = vld [vmem:[%s2937_s14 + $0xa0] sm:$0xff] }
 0x561   : >> { %2401 = vst [vmem:[%s2933_s9 + $0x70] sm:$0xff] %v2400_v44  ;;  %v2406_v47 = vld [vmem:[%s2937_s14 + $0xb8] sm:$0xff]  ;;  %2403 = vst [vmem:[%s2933_s9 + $0x88] sm:$0xff] %v2402_v45  ;;  %v2408_v48 = vld [vmem:[%s2937_s14 + $0x600] sm:$0xff] }
 0x562   : >> { %2405 = vst [vmem:[%s2933_s9 + $0xa0] sm:$0xff] %v2404_v46  ;;  %2407 = vst [vmem:[%s2933_s9 + $0xb8] sm:$0xff] %v2406_v47  ;;  %v2410_v49 = vld [vmem:[%s2937_s14 + $0x618] sm:$0xff]  ;;  %v2412_v50 = vld [vmem:[%s2937_s14 + $0x630] sm:$0xff] }
 0x563   : >> { %2409 = vst [vmem:[%s2933_s9 + $0x780] sm:$0xff] %v2408_v48  ;;  %2411 = vst [vmem:[%s2933_s9 + $0x798] sm:$0xff] %v2410_v49  ;;  %v2414_v51 = vld [vmem:[%s2937_s14 + $0x648] sm:$0xff]  ;;  %v2416_v52 = vld [vmem:[%s2937_s14 + $0x660] sm:$0xff] }
 0x564   : >> { %2413 = vst [vmem:[%s2933_s9 + $0x7b0] sm:$0xff] %v2412_v50  ;;  %v2418_v53 = vld [vmem:[%s2937_s14 + $0x678] sm:$0xff]  ;;  %2415 = vst [vmem:[%s2933_s9 + $0x7c8] sm:$0xff] %v2414_v51  ;;  %v2420_v54 = vld [vmem:[%s2937_s14 + $0x690] sm:$0xff] }
 0x565   : >> { %2417 = vst [vmem:[%s2933_s9 + $0x7e0] sm:$0xff] %v2416_v52  ;;  %2419 = vst [vmem:[%s2933_s9 + $0x7f8] sm:$0xff] %v2418_v53  ;;  %v2422_v55 = vld [vmem:[%s2937_s14 + $0x6a8] sm:$0xff]  ;;  %v2426_v57 = vld [vmem:[%s2937_s14 + $0x620] sm:$0xff] }
 0x566   : >> { %v2424_v56 = vld [vmem:[%s2937_s14 + $0x608] sm:$0xff]  ;;  %2421 = vst [vmem:[%s2933_s9 + $0x810] sm:$0xff] %v2420_v54  ;;  %2423 = vst [vmem:[%s2933_s9 + $0x828] sm:$0xff] %v2422_v55  ;;  %v2428_v58 = vld [vmem:[%s2937_s14 + $0x638] sm:$0xff] }
 0x567   : >> { %2425 = vst [vmem:[%s2933_s9 + $0x788] sm:$0xff] %v2424_v56  ;;  %v2430_v59 = vld [vmem:[%s2937_s14 + $0x650] sm:$0xff]  ;;  %2427 = vst [vmem:[%s2933_s9 + $0x7a0] sm:$0xff] %v2426_v57  ;;  %v2432_v60 = vld [vmem:[%s2937_s14 + $0x668] sm:$0xff] }
 0x568   : >> { %2429 = vst [vmem:[%s2933_s9 + $0x7b8] sm:$0xff] %v2428_v58  ;;  %2431 = vst [vmem:[%s2933_s9 + $0x7d0] sm:$0xff] %v2430_v59  ;;  %v2434_v61 = vld [vmem:[%s2937_s14 + $0x680] sm:$0xff]  ;;  %v2436_v62 = vld [vmem:[%s2937_s14 + $0x698] sm:$0xff] }
 0x569   : >> { %2433 = vst [vmem:[%s2933_s9 + $0x7e8] sm:$0xff] %v2432_v60  ;;  %2435 = vst [vmem:[%s2933_s9 + $0x800] sm:$0xff] %v2434_v61  ;;  %v2438_v63 = vld [vmem:[%s2937_s14 + $0x6b0] sm:$0xff]  ;;  %v2442_v1 = vld [vmem:[%s2937_s14 + $0x628] sm:$0xff] }
 0x56a   : >> { %2437 = vst [vmem:[%s2933_s9 + $0x818] sm:$0xff] %v2436_v62  ;;  %v2440_v0 = vld [vmem:[%s2937_s14 + $0x610] sm:$0xff]  ;;  %2439 = vst [vmem:[%s2933_s9 + $0x830] sm:$0xff] %v2438_v63  ;;  %v2444_v2 = vld [vmem:[%s2937_s14 + $0x640] sm:$0xff] }
 0x56b   : >> { %2441 = vst [vmem:[%s2933_s9 + $0x790] sm:$0xff] %v2440_v0  ;;  %2443 = vst [vmem:[%s2933_s9 + $0x7a8] sm:$0xff] %v2442_v1  ;;  %v2446_v3 = vld [vmem:[%s2937_s14 + $0x658] sm:$0xff]  ;;  %v2448_v4 = vld [vmem:[%s2937_s14 + $0x670] sm:$0xff] }
 0x56c   : >> { %2445 = vst [vmem:[%s2933_s9 + $0x7c0] sm:$0xff] %v2444_v2  ;;  %2447 = vst [vmem:[%s2933_s9 + $0x7d8] sm:$0xff] %v2446_v3  ;;  %v2450_v5 = vld [vmem:[%s2937_s14 + $0x688] sm:$0xff]  ;;  %v2452_v6 = vld [vmem:[%s2937_s14 + $0x6a0] sm:$0xff] }
 0x56d   : >> { %2449 = vst [vmem:[%s2933_s9 + $0x7f0] sm:$0xff] %v2448_v4  ;;  %v2454_v7 = vld [vmem:[%s2937_s14 + $0x6b8] sm:$0xff]  ;;  %2451 = vst [vmem:[%s2933_s9 + $0x808] sm:$0xff] %v2450_v5  ;;  %v2456_v8 = vld [vmem:[%s2937_s14 + $0xc00] sm:$0xff] }
 0x56e   : >> { %2453 = vst [vmem:[%s2933_s9 + $0x820] sm:$0xff] %v2452_v6  ;;  %2455 = vst [vmem:[%s2933_s9 + $0x838] sm:$0xff] %v2454_v7  ;;  %v2458_v9 = vld [vmem:[%s2937_s14 + $0xc18] sm:$0xff]  ;;  %v2460_v10 = vld [vmem:[%s2937_s14 + $0xc30] sm:$0xff] }
 0x56f   : >> { %2457 = vst [vmem:[%s2933_s9 + $0xf00] sm:$0xff] %v2456_v8  ;;  %2459 = vst [vmem:[%s2933_s9 + $0xf18] sm:$0xff] %v2458_v9  ;;  %v2462_v11 = vld [vmem:[%s2937_s14 + $0xc48] sm:$0xff]  ;;  %v2464_v12 = vld [vmem:[%s2937_s14 + $0xc60] sm:$0xff] }
 0x570   : >> { %2461 = vst [vmem:[%s2933_s9 + $0xf30] sm:$0xff] %v2460_v10  ;;  %v2466_v13 = vld [vmem:[%s2937_s14 + $0xc78] sm:$0xff]  ;;  %2463 = vst [vmem:[%s2933_s9 + $0xf48] sm:$0xff] %v2462_v11  ;;  %v2468_v14 = vld [vmem:[%s2937_s14 + $0xc90] sm:$0xff] }
 0x571   : >> { %2465 = vst [vmem:[%s2933_s9 + $0xf60] sm:$0xff] %v2464_v12  ;;  %2467 = vst [vmem:[%s2933_s9 + $0xf78] sm:$0xff] %v2466_v13  ;;  %v2470_v15 = vld [vmem:[%s2937_s14 + $0xca8] sm:$0xff]  ;;  %v2474_v17 = vld [vmem:[%s2937_s14 + $0xc20] sm:$0xff] }
 0x572   : >> { %v2472_v16 = vld [vmem:[%s2937_s14 + $0xc08] sm:$0xff]  ;;  %2469 = vst [vmem:[%s2933_s9 + $0xf90] sm:$0xff] %v2468_v14  ;;  %2471 = vst [vmem:[%s2933_s9 + $0xfa8] sm:$0xff] %v2470_v15  ;;  %v2476_v18 = vld [vmem:[%s2937_s14 + $0xc38] sm:$0xff] }
 0x573   : >> { %2473 = vst [vmem:[%s2933_s9 + $0xf08] sm:$0xff] %v2472_v16  ;;  %v2478_v19 = vld [vmem:[%s2937_s14 + $0xc50] sm:$0xff]  ;;  %2475 = vst [vmem:[%s2933_s9 + $0xf20] sm:$0xff] %v2474_v17  ;;  %v2480_v20 = vld [vmem:[%s2937_s14 + $0xc68] sm:$0xff] }
 0x574   : >> { %2477 = vst [vmem:[%s2933_s9 + $0xf38] sm:$0xff] %v2476_v18  ;;  %2479 = vst [vmem:[%s2933_s9 + $0xf50] sm:$0xff] %v2478_v19  ;;  %v2482_v21 = vld [vmem:[%s2937_s14 + $0xc80] sm:$0xff]  ;;  %v2484_v22 = vld [vmem:[%s2937_s14 + $0xc98] sm:$0xff]  ;;  %2356 = sbr.rel (!%p2353_p10) target bundleno = 1366 (0x556), region = 96 }
 0x575   : >> { %2481 = vst [vmem:[%s2933_s9 + $0xf68] sm:$0xff] %v2480_v20  ;;  %2483 = vst [vmem:[%s2933_s9 + $0xf80] sm:$0xff] %v2482_v21  ;;  %v2486_v23 = vld [vmem:[%s2937_s14 + $0xcb0] sm:$0xff]  ;;  %v2490_v25 = vld [vmem:[%s2937_s14 + $0xc28] sm:$0xff] }
 0x576   : >> { %2485 = vst [vmem:[%s2933_s9 + $0xf98] sm:$0xff] %v2484_v22  ;;  %v2488_v24 = vld [vmem:[%s2937_s14 + $0xc10] sm:$0xff]  ;;  %2487 = vst [vmem:[%s2933_s9 + $0xfb0] sm:$0xff] %v2486_v23  ;;  %v2492_v26 = vld [vmem:[%s2937_s14 + $0xc40] sm:$0xff] }
 0x577   : >> { %2489 = vst [vmem:[%s2933_s9 + $0xf10] sm:$0xff] %v2488_v24  ;;  %2491 = vst [vmem:[%s2933_s9 + $0xf28] sm:$0xff] %v2490_v25  ;;  %v2494_v27 = vld [vmem:[%s2937_s14 + $0xc58] sm:$0xff]  ;;  %v2496_v28 = vld [vmem:[%s2937_s14 + $0xc70] sm:$0xff] }
 0x578   : >> { %2493 = vst [vmem:[%s2933_s9 + $0xf40] sm:$0xff] %v2492_v26  ;;  %2495 = vst [vmem:[%s2933_s9 + $0xf58] sm:$0xff] %v2494_v27  ;;  %v2498_v29 = vld [vmem:[%s2937_s14 + $0xc88] sm:$0xff]  ;;  %v2500_v30 = vld [vmem:[%s2937_s14 + $0xca0] sm:$0xff] }
 0x579   : >> { %2497 = vst [vmem:[%s2933_s9 + $0xf70] sm:$0xff] %v2496_v28  ;;  %v2502_v31 = vld [vmem:[%s2937_s14 + $0xcb8] sm:$0xff]  ;;  %2499 = vst [vmem:[%s2933_s9 + $0xf88] sm:$0xff] %v2498_v29  ;;  %s4535_s14 = smov %s4353_s24 }
 0x57a   : >> { %2501 = vst [vmem:[%s2933_s9 + $0xfa0] sm:$0xff] %v2500_v30  ;;  %2503 = vst [vmem:[%s2933_s9 + $0xfb8] sm:$0xff] %v2502_v31  ;;  %s4534_s9 = smov %s4356_s26 }
 0x57b PF: > { %s4471_s27 = sand.u32 7, %s4550_s30   ;;  %s2693_s28 = smul.u32 192, %s4280_s18 }
 0x57c   : > { %p2695_p11 = scmp.le.s32.totalorder %s4471_s27, 0 }
 0x57d   : > { %s4475_s29 = scalar_lea.vmem %s3155_s22, %s2693_s28 [#allocation4]   ;;  %s4478_s4 = scalar_lea.vmem %s4274_s6, %s2693_s28  }
 0x57e   : > { %2630 = sbr.rel (%p2695_p11) target bundleno = 1423 (0x58f), region = 101  ;;  %s4537_s5 = smov (!%p2695_p11), %s4478_s4 }
 0x57f   : > { %s4538_s16 = smov (!%p2695_p11), %s4475_s29  ;;  %s4487_s23 = smov (!%p2695_p11), 0  }
 0x580   : > { %s4489_s25 = smov (!%p2695_p11), 0  }
 0x585 LB: >> { %v2527_v32 = vld [vmem:[%s2953_s16] sm:$0xff]  ;;  %v2529_v33 = vld [vmem:[%s2953_s16 + $0x8] sm:$0xff]  ;;  %v2531_v34 = vld [vmem:[%s2953_s16 + $0x10] sm:$0xff]  ;;  %s2545_s22 = sadd.s32 1, %s2957_s23  ;;  %s2521_s25 = sadd.s32 1, %s2961_s25   ;;  %s2961_s25 = sphi %s4489_s25, %s2521_s25   ;;  %s2957_s23 = sphi %s4487_s23, %s4539_s23   ;;  %s2953_s16 = sphi %s4538_s16, %s2550_s16   ;;  %s2949_s5 = sphi %s4537_s5, %s2551_s5  }
 0x586   : >> { %2528 = vst [vmem:[%s2949_s5] sm:$0xff] %v2527_v32  ;;  %2530 = vst [vmem:[%s2949_s5 + $0x8] sm:$0xff] %v2529_v33  ;;  %v2533_v35 = vld [vmem:[%s2953_s16 + $0x600] sm:$0xff]  ;;  %v2535_v36 = vld [vmem:[%s2953_s16 + $0x608] sm:$0xff]  ;;  %p2546_p13 = scmp.ge.s32.totalorder %s2545_s22, %s4471_s27  ;;  %p2520_p0 = scmp.ge.s32.totalorder %s2521_s25, %s4471_s27 }
 0x587   : >> { %2532 = vst [vmem:[%s2949_s5 + $0x10] sm:$0xff] %v2531_v34  ;;  %v2537_v37 = vld [vmem:[%s2953_s16 + $0x610] sm:$0xff]  ;;  %2534 = vst [vmem:[%s2949_s5 + $0x780] sm:$0xff] %v2533_v35  ;;  %v2539_v38 = vld [vmem:[%s2953_s16 + $0xc00] sm:$0xff] }
 0x588   : >> { %2536 = vst [vmem:[%s2949_s5 + $0x788] sm:$0xff] %v2535_v36  ;;  %2538 = vst [vmem:[%s2949_s5 + $0x790] sm:$0xff] %v2537_v37  ;;  %v2541_v39 = vld [vmem:[%s2953_s16 + $0xc08] sm:$0xff]  ;;  %v2543_v40 = vld [vmem:[%s2953_s16 + $0xc10] sm:$0xff]  ;;  %s4554_s22 = smov (%p2546_p13, %s2545_s22), 0  ;;  %2523 = sbr.rel (!%p2520_p0) target bundleno = 1413 (0x585), region = 107 }
 0x589   : >> { %2540 = vst [vmem:[%s2949_s5 + $0xf00] sm:$0xff] %v2539_v38  ;;  %2542 = vst [vmem:[%s2949_s5 + $0xf08] sm:$0xff] %v2541_v39  ;;  %s2548_s30 = smul.u32 24, %s4554_s22  ;;  %s4539_s23 = smov %s4554_s22 }
 0x58a   : >> { %2544 = vst [vmem:[%s2949_s5 + $0xf10] sm:$0xff] %v2543_v40 }
 0x58b   : >> { %s2550_s16 = scalar_lea.vmem %s4475_s29, %s2548_s30 [#allocation4]   ;;  %s2551_s5 = scalar_lea.vmem %s4478_s4, %s2548_s30  }
 0x58f PF: > { %s14_s11 = sadd.s32 1, %s2929_s11   ;;  %s4540_s6 = smov %s2913_s7 }
 0x590   : > { %p11_p2 = scmp.ge.s32.totalorder %s14_s11, 4   ;;  %s4541_s7 = smov %s2917_s8 }
 0x591   : > { %s4542_s8 = smov %s3020_s17  ;;  %s4543_s9 = smov %s2925_s10 }
 0x592   : > { %s4544_s10 = smov %s4546_s13  ;;  %13 = sbr.rel (!%p11_p2) target bundleno = 4 (0x4), region = 118 }
 0x599   :  { %2567 = vsyncpa [#allocation3], 1 }
 0x59a   :  { %2569 = vsyncpa [#allocation3 + $0x1], 1 }

</bundles_post_ra>
